<compile_context>
chip_gen: v6e
topology: v6e:2x2x1
jax: 0.10.0
libtpu: 0.0.40
codegen_flags: <defaults>
</compile_context>

<pallas_src>
import functools

import jax
import jax.numpy as jnp
from jax.experimental import pallas as pl
from jax.experimental.pallas import tpu as pltpu


_MIN_TILE_M = 512      # keeps every point-tile (8,128)-aligned
_MAX_TILE_M = 8192     # ~1.3 MB of per-tile traffic; far below scoped VMEM
_VPU_INPUT_MAX_K = 8   # below this, input layer is broadcast-FMAs on the VPU


def _round_up(x, m):
    return ((x + m - 1) // m) * m


def _leaky_relu(x, slope=0.01):
    return jnp.where(x > 0, x, slope * x)


def _final_act(y, final_act):
    if final_act == "sigmoid":
        return jax.nn.sigmoid(y)
    elif final_act == "tanh":
        return jnp.tanh(y)
    elif final_act == "relu":        # PyTorch module maps 'relu' -> LeakyReLU
        return _leaky_relu(y)
    elif not final_act:              # Identity
        return y
    else:
        raise ValueError(f"Unknown final activation {final_act}")


def _choose_tiling(n):
    """Pick (tile_m, num_tiles, n_pad).

    Large tiles amortize the ~0.35 us/grid-step overhead and give long
    contiguous DMA rows; the grid is kept even (and >= 2) so the "parallel"
    axis shards across v7x's two TensorCores (v5e/v6e just see fewer steps).
    """
    num_tiles = max(2, pl.cdiv(n, _MAX_TILE_M))
    if num_tiles % 2:
        num_tiles += 1
    tile_m = _round_up(pl.cdiv(n, num_tiles), _MIN_TILE_M)
    num_tiles = max(2, pl.cdiv(n, tile_m))
    if num_tiles % 2:
        num_tiles += 1
    return tile_m, num_tiles, tile_m * num_tiles


def _neural_field_kernel(x_ref, w_in_ref, b_in_ref, *rest, final_act,
                         num_hidden_layers, compute_dtype, input_on_vpu):
    # Refs arrive as: [x, W_in, b_in, (W_hid, b_hid)?, W_out, b_out, out]
    if num_hidden_layers > 0:
        w_hid_ref, b_hid_ref, w_out_ref, b_out_ref, out_ref = rest
    else:
        w_out_ref, b_out_ref, out_ref = rest

    x = x_ref[...]                                    # [num_in, TM] f32
    if input_on_vpu:
        # K = num_in is tiny (2-3 coords): num_in broadcast-FMAs on the VPU
        # beat a [H, num_in]@[num_in, TM] matmul using <3/256 MXU rows and
        # keep the MXU slot free for the K=hidden layers.  All f32 (v5e-safe).
        w_in = w_in_ref[...]                          # [H, num_in] f32
        num_in = x.shape[0]
        h = w_in[:, 0:1] * x[0:1, :]
        for k in range(1, num_in):
            h = h + w_in[:, k:k + 1] * x[k:k + 1, :]
        h = h + b_in_ref[...]
    else:
        h = jnp.dot(w_in_ref[...], x.astype(compute_dtype),
                    preferred_element_type=jnp.float32) + b_in_ref[...]
    h = _leaky_relu(h)                                # f32 on the VPU

    # Hidden layers (statically unrolled; transposed weights stacked on axis 0).
    for l in range(num_hidden_layers):
        h = jnp.dot(w_hid_ref[l], h.astype(compute_dtype),
                    preferred_element_type=jnp.float32) + b_hid_ref[l]
        h = _leaky_relu(h)

    # Output layer: [num_out, H] @ [H, TM] -> [num_out, TM]  (lane-dense store).
    y = jnp.dot(w_out_ref[...], h.astype(compute_dtype),
                preferred_element_type=jnp.float32) + b_out_ref[...]
    # TODO(synk): padded columns (n_pad > n) still run the final activation
    #             (wasted EUP work in the last tile); results are sliced away.
    out_ref[...] = _final_act(y, final_act).astype(out_ref.dtype)


def prepare_params(params, compute_dtype=jnp.bfloat16):
    """One-time weight prep, hoisted out of the per-call path.

    Transposes weights to [out_features, in_features], casts MXU operands to
    `compute_dtype`, and reshapes biases to [out_features, 1] f32.  The input
    layer's weights stay f32 when it runs on the VPU (tiny num_in).
    """
    w_in, b_in, w_hid, b_hid, w_out, b_out = params
    num_in, hidden = w_in.shape
    num_out = w_out.shape[1]
    input_on_vpu = num_in <= _VPU_INPUT_MAX_K

    w_in_t = w_in.T if input_on_vpu else w_in.T.astype(compute_dtype)  # [H, num_in]
    b_in_t = b_in.reshape(hidden, 1).astype(jnp.float32)               # [H, 1]
    if w_hid is not None and w_hid.shape[0] > 0:
        w_hid_t = jnp.transpose(w_hid, (0, 2, 1)).astype(compute_dtype)  # [nhl,H,H]
        b_hid_t = jnp.transpose(b_hid, (0, 2, 1)).astype(jnp.float32)    # [nhl,H,1]
    else:
        w_hid_t, b_hid_t = None, None
    w_out_t = w_out.T.astype(compute_dtype)                            # [num_out, H]
    b_out_t = b_out.reshape(num_out, 1).astype(jnp.float32)            # [num_out, 1]

    return dict(w_in=w_in_t, b_in=b_in_t, w_hid=w_hid_t, b_hid=b_hid_t,
                w_out=w_out_t, b_out=b_out_t)


@functools.partial(jax.jit, static_argnames=("final_act", "out_dtype", "compute_dtype"))
def neural_field_forward_fm(coords_fm, prepped, *, final_act=None,
                            out_dtype=jnp.float32, compute_dtype=jnp.bfloat16):
    """Feature-major forward.  coords_fm: [num_in, N] f32 -> [num_out, N].

    Keeping the external contract feature-major avoids two extra HBM passes
    (coords transpose in, output transpose out) on an otherwise memory-light
    kernel.  Set out_dtype=jnp.bfloat16 if the consumer tolerates it: the
    output is the largest per-point HBM stream.
    """
    w_in, b_in = prepped["w_in"], prepped["b_in"]
    w_hid, b_hid = prepped["w_hid"], prepped["b_hid"]
    w_out, b_out = prepped["w_out"], prepped["b_out"]

    num_in, n = coords_fm.shape
    hidden = w_in.shape[0]
    num_out = w_out.shape[0]
    nhl = 0 if w_hid is None else int(w_hid.shape[0])
    input_on_vpu = num_in <= _VPU_INPUT_MAX_K

    tile_m, num_tiles, n_pad = _choose_tiling(n)
    x = coords_fm.astype(jnp.float32)
    if n_pad != n:
        x = jnp.pad(x, ((0, 0), (0, n_pad - n)))

    # Coords tile (lane-dense).  A third buffer costs ~12*tile_m bytes; only
    # worth it when the grid is long enough for DMA latency to be exposed.
    if num_tiles >= 3:
        coords_spec = pl.BlockSpec((num_in, tile_m), lambda i: (0, i),
                                   pipeline_mode=pl.Buffered(3))
    else:
        coords_spec = pl.BlockSpec((num_in, tile_m), lambda i: (0, i))

    inputs = [x, w_in, b_in]
    in_specs = [
        coords_spec,
        pl.BlockSpec((hidden, num_in), lambda i: (0, 0)),     # W_in^T (whole)
        pl.BlockSpec((hidden, 1), lambda i: (0, 0)),          # b_in
    ]
    if nhl > 0:
        inputs += [w_hid, b_hid]
        in_specs += [
            pl.BlockSpec((nhl, hidden, hidden), lambda i: (0, 0, 0)),  # W_hid^T
            pl.BlockSpec((nhl, hidden, 1), lambda i: (0, 0, 0)),       # b_hid
        ]
    inputs += [w_out, b_out]
    in_specs += [
        pl.BlockSpec((num_out, hidden), lambda i: (0, 0)),    # W_out^T
        pl.BlockSpec((num_out, 1), lambda i: (0, 0)),         # b_out
    ]

    kernel = functools.partial(
        _neural_field_kernel, final_act=final_act, num_hidden_layers=nhl,
        compute_dtype=compute_dtype, input_on_vpu=input_on_vpu)

    flops = 2 * n_pad * (num_in * hidden + nhl * hidden * hidden + hidden * num_out)
    transcendentals = n_pad * num_out if final_act in ("sigmoid", "tanh") else 0
    weight_bytes = sum(int(a.size) * a.dtype.itemsize for a in inputs[1:])
    bytes_accessed = (int(x.size) * x.dtype.itemsize
                      + int(n_pad) * num_out * jnp.dtype(out_dtype).itemsize
                      + weight_bytes)

    out_fm = pl.pallas_call(
        kernel,
        out_shape=jax.ShapeDtypeStruct((num_out, n_pad), out_dtype),
        grid_spec=pltpu.PrefetchScalarGridSpec(
            num_scalar_prefetch=0,
            grid=(num_tiles,),
            in_specs=in_specs,
            out_specs=pl.BlockSpec((num_out, tile_m), lambda i: (0, i)),
        ),
        compiler_params=pltpu.CompilerParams(
            dimension_semantics=("parallel",)),
        cost_estimate=pl.CostEstimate(
            flops=flops,
            transcendentals=transcendentals,
            bytes_accessed=bytes_accessed),
    )(*inputs)

    if n_pad != n:
        out_fm = out_fm[:, :n]
    return out_fm


@functools.partial(jax.jit, static_argnames=("final_act", "out_dtype", "compute_dtype"))
def neural_field_forward(coords, prepped, *, final_act=None,
                         out_dtype=jnp.float32, compute_dtype=jnp.bfloat16):
    """Point-major convenience wrapper: coords [N, num_in] -> [N, num_out].
    Transposes are fused under jit; hot paths should use the feature-major
    entry point to avoid the extra HBM passes entirely."""
    out_fm = neural_field_forward_fm(coords.T, prepped, final_act=final_act,
                                     out_dtype=out_dtype, compute_dtype=compute_dtype)
    return out_fm.T


def init_params(key, num_in, num_layers, num_hidden_in, num_hidden_out, num_out):
    """Deterministic synthetic parameters (not a checkpoint load)."""
    assert num_hidden_in == num_hidden_out, "simple MLP: hidden sizes must match"
    h = num_hidden_out
    nhl = max(num_layers - 2, 0)
    ks = jax.random.split(key, 6)
    w_in = jax.random.normal(ks[0], (num_in, h), jnp.float32) * (1.0 / jnp.sqrt(num_in))
    b_in = jax.random.normal(ks[1], (1, h), jnp.float32) * 0.01
    if nhl > 0:
        w_hid = jax.random.normal(ks[2], (nhl, num_hidden_in, h), jnp.float32) * (1.0 / jnp.sqrt(h))
        b_hid = jax.random.normal(ks[3], (nhl, 1, h), jnp.float32) * 0.01
    else:
        w_hid, b_hid = None, None
    w_out = jax.random.normal(ks[4], (h, num_out), jnp.float32) * (1.0 / jnp.sqrt(h))
    b_out = jax.random.normal(ks[5], (1, num_out), jnp.float32) * 0.01
    return w_in, b_in, w_hid, b_hid, w_out, b_out


def reference_forward(coords, params, final_act, compute_dtype=jnp.bfloat16):
    """Pure-JAX reference mirroring the kernel's precision choices:
    f32 input layer for tiny num_in, bf16-operand / f32-accumulate MXU dots."""
    w_in, b_in, w_hid, b_hid, w_out, b_out = params
    num_in = coords.shape[1]

    def dot(a, b):
        return jnp.dot(a.astype(compute_dtype), b.astype(compute_dtype),
                       preferred_element_type=jnp.float32)

    if num_in <= _VPU_INPUT_MAX_K:
        h = jnp.dot(coords, w_in, preferred_element_type=jnp.float32) + b_in
    else:
        h = dot(coords, w_in) + b_in
    h = _leaky_relu(h)
    nhl = 0 if w_hid is None else w_hid.shape[0]
    for l in range(nhl):
        h = _leaky_relu(dot(h, w_hid[l]) + b_hid[l])
    return _final_act(dot(h, w_out) + b_out, final_act)


if __name__ == "__main__":
    # Small shapes consistent with the module: 3-D coords, 4 layers, hidden=32, out=4.
    num_in, num_layers, num_hidden_in, num_hidden_out, num_out = 3, 4, 32, 32, 4
    final_act = "sigmoid"
    n_points = 4096        # -> tile_m=2048, grid=(2,): both v7x TCs get a tile

    key = jax.random.PRNGKey(0)
    k_coords, k_params = jax.random.split(key)
    coords_fm = jax.random.uniform(k_coords, (num_in, n_points), jnp.float32,
                                   minval=-1.0, maxval=1.0)        # feature-major
    params = init_params(k_params, num_in, num_layers,
                         num_hidden_in, num_hidden_out, num_out)
    prepped = prepare_params(params)                               # one-time weight prep

    # Feature-major entry point (preferred hot path).
    out_fm = neural_field_forward_fm(coords_fm, prepped, final_act=final_act)
    out_fm = jax.block_until_ready(out_fm)
    assert out_fm.shape == (num_out, n_points)

    # Point-major convenience wrapper (transposes fused under jit).
    out_nm = jax.block_until_ready(
        neural_field_forward(coords_fm.T, prepped, final_act=final_act))
    assert out_nm.shape == (n_points, num_out)
    assert jnp.allclose(out_nm, out_fm.T)

    ref = reference_forward(coords_fm.T, params, final_act)
    assert jnp.allclose(out_fm.T, ref, atol=2e-3, rtol=2e-3), "mismatch vs reference"

    print("KERNEL_OK")
</pallas_src>

<mosaic_0001>
module attributes {stable_mosaic.version = 11 : i64} {
  func.func @_neural_field_kernel(%arg0: i32, %arg1: memref<3x2048xf32, #tpu.memory_space<vmem>>, %arg2: memref<32x3xf32, #tpu.memory_space<vmem>>, %arg3: memref<32x1xf32, #tpu.memory_space<vmem>>, %arg4: memref<2x32x32xbf16, #tpu.memory_space<vmem>>, %arg5: memref<2x32x1xf32, #tpu.memory_space<vmem>>, %arg6: memref<4x32xbf16, #tpu.memory_space<vmem>>, %arg7: memref<4x1xf32, #tpu.memory_space<vmem>>, %arg8: memref<4x2048xf32, #tpu.memory_space<vmem>>) attributes {dimension_semantics = [#tpu.dimension_semantics<parallel>], iteration_bounds = array<i64: 2>, scalar_prefetch = 0 : i64, scratch_operands = 0 : i64, tpu.core_type = #tpu.core_type<tc>, window_params = [{transform_indices = @transform_0, window_bounds = array<i64: 3, 2048>}, {pipeline_mode = #tpu.pipeline_mode<synchronous>, transform_indices = @transform_1, window_bounds = array<i64: 32, 3>}, {pipeline_mode = #tpu.pipeline_mode<synchronous>, transform_indices = @transform_2, window_bounds = array<i64: 32, 1>}, {pipeline_mode = #tpu.pipeline_mode<synchronous>, transform_indices = @transform_3, window_bounds = array<i64: 2, 32, 32>}, {pipeline_mode = #tpu.pipeline_mode<synchronous>, transform_indices = @transform_4, window_bounds = array<i64: 2, 32, 1>}, {pipeline_mode = #tpu.pipeline_mode<synchronous>, transform_indices = @transform_5, window_bounds = array<i64: 4, 32>}, {pipeline_mode = #tpu.pipeline_mode<synchronous>, transform_indices = @transform_6, window_bounds = array<i64: 4, 1>}, {transform_indices = @transform_7, window_bounds = array<i64: 4, 2048>}]} {
    %c0 = arith.constant 0 : index
    %c0_0 = arith.constant 0 : index
    %0 = vector.load %arg1[%c0, %c0_0] : memref<3x2048xf32, #tpu.memory_space<vmem>>, vector<3x2048xf32>
    %c0_1 = arith.constant 0 : index
    %c0_2 = arith.constant 0 : index
    %1 = vector.load %arg2[%c0_1, %c0_2] : memref<32x3xf32, #tpu.memory_space<vmem>>, vector<32x3xf32>
    %2 = vector.extract_strided_slice %1 {offsets = [0, 0], sizes = [32, 1], strides = [1, 1]} : vector<32x3xf32> to vector<32x1xf32>
    %3 = vector.extract_strided_slice %0 {offsets = [0, 0], sizes = [1, 2048], strides = [1, 1]} : vector<3x2048xf32> to vector<1x2048xf32>
    %4 = vector.broadcast %2 : vector<32x1xf32> to vector<32x2048xf32>
    %5 = vector.broadcast %3 : vector<1x2048xf32> to vector<32x2048xf32>
    %6 = arith.mulf %4, %5 : vector<32x2048xf32>
    %7 = vector.extract_strided_slice %1 {offsets = [0, 1], sizes = [32, 1], strides = [1, 1]} : vector<32x3xf32> to vector<32x1xf32>
    %8 = vector.extract_strided_slice %0 {offsets = [1, 0], sizes = [1, 2048], strides = [1, 1]} : vector<3x2048xf32> to vector<1x2048xf32>
    %9 = vector.broadcast %7 : vector<32x1xf32> to vector<32x2048xf32>
    %10 = vector.broadcast %8 : vector<1x2048xf32> to vector<32x2048xf32>
    %11 = arith.mulf %9, %10 : vector<32x2048xf32>
    %12 = arith.addf %6, %11 : vector<32x2048xf32>
    %13 = vector.extract_strided_slice %1 {offsets = [0, 2], sizes = [32, 1], strides = [1, 1]} : vector<32x3xf32> to vector<32x1xf32>
    %14 = vector.extract_strided_slice %0 {offsets = [2, 0], sizes = [1, 2048], strides = [1, 1]} : vector<3x2048xf32> to vector<1x2048xf32>
    %15 = vector.broadcast %13 : vector<32x1xf32> to vector<32x2048xf32>
    %16 = vector.broadcast %14 : vector<1x2048xf32> to vector<32x2048xf32>
    %17 = arith.mulf %15, %16 : vector<32x2048xf32>
    %18 = arith.addf %12, %17 : vector<32x2048xf32>
    %c0_3 = arith.constant 0 : index
    %c0_4 = arith.constant 0 : index
    %19 = vector.load %arg3[%c0_3, %c0_4] : memref<32x1xf32, #tpu.memory_space<vmem>>, vector<32x1xf32>
    %20 = vector.broadcast %19 : vector<32x1xf32> to vector<32x2048xf32>
    %21 = arith.addf %18, %20 : vector<32x2048xf32>
    %cst = arith.constant 0.000000e+00 : f32
    %22 = vector.broadcast %cst : f32 to vector<32x2048xf32>
    %23 = arith.cmpf ogt, %21, %22 : vector<32x2048xf32>
    %cst_5 = arith.constant 0.00999999977 : f32
    %24 = vector.broadcast %cst_5 : f32 to vector<32x2048xf32>
    %25 = arith.mulf %24, %21 : vector<32x2048xf32>
    %26 = arith.select %23, %21, %25 : vector<32x2048xi1>, vector<32x2048xf32>
    %c0_6 = arith.constant 0 : index
    %c0_7 = arith.constant 0 : index
    %c0_8 = arith.constant 0 : index
    %27 = vector.load %arg4[%c0_6, %c0_7, %c0_8] : memref<2x32x32xbf16, #tpu.memory_space<vmem>>, vector<1x32x32xbf16>
    %28 = vector.shape_cast %27 : vector<1x32x32xbf16> to vector<32x32xbf16>
    %29 = arith.truncf %26 : vector<32x2048xf32> to vector<32x2048xbf16>
    %cst_9 = arith.constant dense<0.000000e+00> : vector<32x2048xf32>
    %30 = tpu.matmul %28, %29, %cst_9 {dimension_numbers = #tpu.dot_dimension_numbers<[1], [0], [0], [1], [0, 0, 1, 1], [], []>} : vector<32x32xbf16>, vector<32x2048xbf16>, vector<32x2048xf32> -> vector<32x2048xf32>
    %c0_10 = arith.constant 0 : index
    %c0_11 = arith.constant 0 : index
    %c0_12 = arith.constant 0 : index
    %31 = vector.load %arg5[%c0_10, %c0_11, %c0_12] : memref<2x32x1xf32, #tpu.memory_space<vmem>>, vector<1x32x1xf32>
    %32 = vector.shape_cast %31 : vector<1x32x1xf32> to vector<32x1xf32>
    %33 = vector.broadcast %32 : vector<32x1xf32> to vector<32x2048xf32>
    %34 = arith.addf %30, %33 : vector<32x2048xf32>
    %cst_13 = arith.constant 0.000000e+00 : f32
    %35 = vector.broadcast %cst_13 : f32 to vector<32x2048xf32>
    %36 = arith.cmpf ogt, %34, %35 : vector<32x2048xf32>
    %cst_14 = arith.constant 0.00999999977 : f32
    %37 = vector.broadcast %cst_14 : f32 to vector<32x2048xf32>
    %38 = arith.mulf %37, %34 : vector<32x2048xf32>
    %39 = arith.select %36, %34, %38 : vector<32x2048xi1>, vector<32x2048xf32>
    %c1 = arith.constant 1 : index
    %c0_15 = arith.constant 0 : index
    %c0_16 = arith.constant 0 : index
    %40 = vector.load %arg4[%c1, %c0_15, %c0_16] : memref<2x32x32xbf16, #tpu.memory_space<vmem>>, vector<1x32x32xbf16>
    %41 = vector.shape_cast %40 : vector<1x32x32xbf16> to vector<32x32xbf16>
    %42 = arith.truncf %39 : vector<32x2048xf32> to vector<32x2048xbf16>
    %cst_17 = arith.constant dense<0.000000e+00> : vector<32x2048xf32>
    %43 = tpu.matmul %41, %42, %cst_17 {dimension_numbers = #tpu.dot_dimension_numbers<[1], [0], [0], [1], [0, 0, 1, 1], [], []>} : vector<32x32xbf16>, vector<32x2048xbf16>, vector<32x2048xf32> -> vector<32x2048xf32>
    %c1_18 = arith.constant 1 : index
    %c0_19 = arith.constant 0 : index
    %c0_20 = arith.constant 0 : index
    %44 = vector.load %arg5[%c1_18, %c0_19, %c0_20] : memref<2x32x1xf32, #tpu.memory_space<vmem>>, vector<1x32x1xf32>
    %45 = vector.shape_cast %44 : vector<1x32x1xf32> to vector<32x1xf32>
    %46 = vector.broadcast %45 : vector<32x1xf32> to vector<32x2048xf32>
    %47 = arith.addf %43, %46 : vector<32x2048xf32>
    %cst_21 = arith.constant 0.000000e+00 : f32
    %48 = vector.broadcast %cst_21 : f32 to vector<32x2048xf32>
    %49 = arith.cmpf ogt, %47, %48 : vector<32x2048xf32>
    %cst_22 = arith.constant 0.00999999977 : f32
    %50 = vector.broadcast %cst_22 : f32 to vector<32x2048xf32>
    %51 = arith.mulf %50, %47 : vector<32x2048xf32>
    %52 = arith.select %49, %47, %51 : vector<32x2048xi1>, vector<32x2048xf32>
    %c0_23 = arith.constant 0 : index
    %c0_24 = arith.constant 0 : index
    %53 = vector.load %arg6[%c0_23, %c0_24] : memref<4x32xbf16, #tpu.memory_space<vmem>>, vector<4x32xbf16>
    %54 = arith.truncf %52 : vector<32x2048xf32> to vector<32x2048xbf16>
    %cst_25 = arith.constant dense<0.000000e+00> : vector<4x2048xf32>
    %55 = tpu.matmul %53, %54, %cst_25 {dimension_numbers = #tpu.dot_dimension_numbers<[1], [0], [0], [1], [0, 0, 1, 1], [], []>} : vector<4x32xbf16>, vector<32x2048xbf16>, vector<4x2048xf32> -> vector<4x2048xf32>
    %c0_26 = arith.constant 0 : index
    %c0_27 = arith.constant 0 : index
    %56 = vector.load %arg7[%c0_26, %c0_27] : memref<4x1xf32, #tpu.memory_space<vmem>>, vector<4x1xf32>
    %57 = vector.broadcast %56 : vector<4x1xf32> to vector<4x2048xf32>
    %58 = arith.addf %55, %57 : vector<4x2048xf32>
    %59 = arith.negf %58 : vector<4x2048xf32>
    %60 = math.exp %59 : vector<4x2048xf32>
    %cst_28 = arith.constant 1.000000e+00 : f32
    %61 = vector.broadcast %cst_28 : f32 to vector<4x2048xf32>
    %62 = arith.addf %61, %60 : vector<4x2048xf32>
    %63 = arith.divf %61, %62 : vector<4x2048xf32>
    %c0_29 = arith.constant 0 : index
    %c0_30 = arith.constant 0 : index
    %64 = vector.load %arg8[%c0_29, %c0_30] : memref<4x2048xf32, #tpu.memory_space<vmem>>, vector<4x2048xf32>
    tpu.vector_store %arg8[%c0_29, %c0_30], %63 {strides = array<i32>} : memref<4x2048xf32, #tpu.memory_space<vmem>>, vector<4x2048xf32>,
    return
  }
  func.func @transform_0(%arg0: i32) -> (i32, i32) {
    %c0_i32 = arith.constant 0 : i32
    %c0_i32_0 = arith.constant 0 : i32
    return %c0_i32, %arg0 : i32, i32
  }
  func.func @transform_1(%arg0: i32) -> (i32, i32) {
    %c0_i32 = arith.constant 0 : i32
    %c0_i32_0 = arith.constant 0 : i32
    %c0_i32_1 = arith.constant 0 : i32
    return %c0_i32, %c0_i32_0 : i32, i32
  }
  func.func @transform_2(%arg0: i32) -> (i32, i32) {
    %c0_i32 = arith.constant 0 : i32
    %c0_i32_0 = arith.constant 0 : i32
    %c0_i32_1 = arith.constant 0 : i32
    return %c0_i32, %c0_i32_0 : i32, i32
  }
  func.func @transform_3(%arg0: i32) -> (i32, i32, i32) {
    %c0_i32 = arith.constant 0 : i32
    %c0_i32_0 = arith.constant 0 : i32
    %c0_i32_1 = arith.constant 0 : i32
    %c0_i32_2 = arith.constant 0 : i32
    return %c0_i32, %c0_i32_0, %c0_i32_1 : i32, i32, i32
  }
  func.func @transform_4(%arg0: i32) -> (i32, i32, i32) {
    %c0_i32 = arith.constant 0 : i32
    %c0_i32_0 = arith.constant 0 : i32
    %c0_i32_1 = arith.constant 0 : i32
    %c0_i32_2 = arith.constant 0 : i32
    return %c0_i32, %c0_i32_0, %c0_i32_1 : i32, i32, i32
  }
  func.func @transform_5(%arg0: i32) -> (i32, i32) {
    %c0_i32 = arith.constant 0 : i32
    %c0_i32_0 = arith.constant 0 : i32
    %c0_i32_1 = arith.constant 0 : i32
    return %c0_i32, %c0_i32_0 : i32, i32
  }
  func.func @transform_6(%arg0: i32) -> (i32, i32) {
    %c0_i32 = arith.constant 0 : i32
    %c0_i32_0 = arith.constant 0 : i32
    %c0_i32_1 = arith.constant 0 : i32
    return %c0_i32, %c0_i32_0 : i32, i32
  }
  func.func @transform_7(%arg0: i32) -> (i32, i32) {
    %c0_i32 = arith.constant 0 : i32
    %c0_i32_0 = arith.constant 0 : i32
    return %c0_i32, %arg0 : i32, i32
  }
}

</mosaic_0001>

<bundles_post_ra>
// kernel: neural_field_forward_fm.1
= control target key start
LH: loop header
LB: loop body
LE: loop exit
PB: predicated region body
PF: predicated region fallthrough
CT: control target
= control target key end

     0   :  { %12 = vsyncpa [#allocation3], 0  ;;  %s5246_s0 = inlined_call_operand.vmem [shape: f32[3,4096], index: 0, kind: input, shape index: {}]   ;;  %s5247_s1 = inlined_call_operand.vmem [shape: f32[32,3], index: 1, kind: input, shape index: {}]   ;;  %s5248_s2 = inlined_call_operand.vmem [shape: f32[32,1], index: 2, kind: input, shape index: {}]   ;;  %s5249_s3 = inlined_call_operand.hbm [shape: bf16[2,32,32], index: 3, kind: input, shape index: {}]   ;;  %s5250_s4 = inlined_call_operand.vmem [shape: f32[2,32,1], index: 4, kind: input, shape index: {}]   ;;  %s5251_s5 = inlined_call_operand.vmem [shape: bf16[4,32], index: 5, kind: input, shape index: {}]   ;;  %s5252_s6 = inlined_call_operand.vmem [shape: f32[4,1], index: 6, kind: input, shape index: {}]   ;;  %s5253_s7 = inlined_call_operand.hbm [shape: f32[4,4096], index: 7, kind: output, shape index: {}]  }
   0x1   :  { %13 = vsyncpa [#allocation4], 0 }
   0x2   :  { %15 = vsyncpa [#allocation4 + $0x1], 0  ;;  %s3729_s24 = smov 0   ;;  %s3731_s25 = smov 0  }
   0x3   :  { %s3733_s26 = smov 0   ;;  %s3735_s27 = smov 0  }
   0x4 LB: > { %s3750_s28 = sadd.s32 4294967295, %s3680_s27   ;;  %s3379_s29 = sadd.s32 4294967294, %s3680_s27   ;;  %s3680_s27 = sphi %s3735_s27, %s5425_s27   ;;  %s3676_s26 = sphi %s3733_s26, %s5424_s26   ;;  %s3672_s25 = sphi %s3731_s25, %s5423_s25   ;;  %s3668_s24 = sphi %s3729_s24, %s5422_s24  }
   0x5   : > { %s3754_s30 = sadd.s32 1, %s3680_s27   ;;  %s180_s8 = sadd.s32 1, %s3676_s26 }
   0x6   : > { %s177_s9 = ssub.s32 %s3680_s27, %s3754_s30  ;;  %p190_p0 = scmp.ne.s32.totalorder %s3676_s26, %s3672_s25 }
   0x7   : > { %p178_p1 = scmp.eq.s32.totalorder %s177_s9, 0  ;;  %p191_p2 = scmp.eq.s32.totalorder %s3750_s28, 1 }
   0x8   : > { %p196_p3 = scmp.ne.s32.totalorder %s3672_s25, %s3668_s24  ;;  %p197_p4 = scmp.eq.s32.totalorder %s3379_s29, 1 }
   0x9   : > { %s3765_s10 = scalar_select %p178_p1, %s3676_s26, %s180_s8  }
   0xa   : > { %p3767_p5 = por %p191_p2, %p190_p0  ;;  %p3771_p6 = por %p197_p4, %p196_p3 }
   0xb   : > { %p3380_p7 = scmp.ge.s32.totalorder %s3680_s27, 1  ;;  %p204_p8 = scmp.lt.s32.totalorder %s3680_s27, 3 }
   0xc   : > { %s5314_s12 = scalar_select %p3771_p6, 1, 0 }
   0xd   : > { %p3472_p9 = scmp.eq.s32.totalorder %s3750_s28, 0  ;;  %p3778_p10 = pnand %p3380_p7, %p204_p8 }
   0xe   : > { %s3682_s14 = smov [#allocation2]  }
   0xf   : > { %s222_s15 = sshll.u32 %s3682_s14, 4  ;;  %p3464_p11 = pneg %p3778_p10  ;;  %s223_s15 = int_to_ptr.vmem [resolvable:$true] %s222_s15 }
  0x10   : > { %s3601_s16 = scalar_lea.vmem %s223_s15, 512  ;;  %p3609_p3 = scmp.lt.s32.totalorder %s223_s15, %s223_s15 }
  0x11   : > { %p3465_p12 = pnand %p3472_p9, %p3464_p11  ;;  %p3602_p0 = scmp.ne.s32.totalorder %s223_s15, %s3601_s16 }
  0x12   : > { %p3610_p4 = scmp.lt.s32.totalorder %s3601_s16, %s3601_s16 }
  0x13   : > { %p3592_p13 = pneg %p3465_p12 }
  0x14   : > { %p3611_p6 = por %p3610_p4, %p3609_p3 }
  0x15   : > { %p3604_p1 = pnand %p3602_p0, %p3592_p13 }
  0x17   : > { %p3605_p2 = pneg %p3604_p1 }
  0x19   : > { %p3612_p7 = pnand %p3611_p6, %p3605_p2 }
  0x1b   : > { %3615 = shalt.err (!%p3612_p7)
}
  0x1c   : > { %s3683_s17 = smov 64   ;;  %s3684_s18 = smov 4  }
  0x1d   : > { %3467 = dma.hbm_to_vmem [thread:$0]  (!%p3465_p12), %s5249_s3, 512, %s223_s15, [#allocation3], %s3683_s17, %s3683_s17, %s3684_s18  }
  0x1e   : > { %256 = sbr.rel (%p3778_p10) target bundleno = 1014 (0x3f6), region = 48 }
  0x23   : > { %3659 = dma.done.wait (%p3472_p9), [#allocation3], 512  }
  0x24   : > { %3661 = vsyncadd (%p3472_p9), [#allocation3], 4294966784  ;;  %v3685_v0 = vmov 2   ;;  %v3686_v1 = vmov 1   ;;  %v5254_v2 = vmov 0   ;;  %v306_v3 = vld [vmem:[%s5247_s1 + $0x10] sm:$0xff]  ;;  %v336_v20 = vlaneseq }
  0x25   : > { %3514 = vset.pattern.permute.xlu0 %v3685_v0  ;;  %3513 = vset.pattern.permute.xlu1 %v3686_v1  ;;  %v307_v4 = vld [vmem:[%s5247_s1 + $0x18] sm:$0xff]  ;;  %v304_v5 = vld [vmem:[%s5247_s1] sm:$0xff]  ;;  %v305_v6 = vld [vmem:[%s5247_s1 + $0x8] sm:$0xff]  ;;  %s3386_s13 = sshll.u32 %s3750_s28, 4  ;;  %vm1470_vm11 = vcmask 261120   ;;  %s285_s20 = sand.u32 1, %s3672_s25  }
  0x26   : > { %1509 = vmatprep.mubr.bf16.mxu0 %v5254_v2  ;;  %1562 = vmatprep.mubr.bf16.mxu1 %v5254_v2  ;;  %v1123_v7 = vld [vmem:[%s5248_s2 + $0x18] sm:$0xff]  ;;  %v1438_v8 = vld [vmem:[%s5250_s4 + $0x10] sm:$0xff]  ;;  %v1436_v9 = vld [vmem:[%s5250_s4] sm:$0xff]  ;;  %p289_p6 = scmp.lt.s32.totalorder %s3386_s13, 31  ;;  %v337_v21 = vshrl.u32 %v336_v20, 7  ;;  %s3385_s21 = sshll.u32 %s285_s20, 6 }
  0x27   : > { %841 = vperm.xlu0 %3514, %v306_v3   ;;  %553 = vperm.xlu1 %3513, %v306_v3   ;;  %v3408_v10 = vld [vmem:[%s5250_s4 + $0x30] sm:$0xff]  ;;  %v3406_v12 = vld [vmem:[%s5250_s4 + $0x20] sm:$0xff]  ;;  %v1121_v15 = vld [vmem:[%s5248_s2 + $0x8] sm:$0xff]  ;;  %s5192_s22 = scalar_lea.vmem [#allocation5], %s3385_s21  ;;  %s3457_s23 = sshll.u32 %s3750_s28, 10 }
  0x28   : > { %v1122_v11 = vld [vmem:[%s5248_s2 + $0x10] sm:$0xff]  ;;  %v1120_v13 = vld [vmem:[%s5248_s2] sm:$0xff]  ;;  %v1439_v16 = vld [vmem:[%s5250_s4 + $0x18] sm:$0xff]  ;;  %s5427_s13 = smov (!%p289_p6, %s3386_s13), 31  ;;  %v3857_v22 = vsub.s32 4, %v337_v21  ;;  %v3859_v23 = vsub.s32 0, %v337_v21 }
  0x29   : > { %v2820_v14 = vld [vmem:[%s5252_s6] sm:$0xf]  ;;  %v1437_v17 = vld [vmem:[%s5250_s4 + $0x8] sm:$0xff]  ;;  %v3409_v18 = vld [vmem:[%s5250_s4 + $0x38] sm:$0xff]  ;;  %s3387_s14 = sshll.u32 %s5427_s13, 2  ;;  %v3861_v24 = vsub.s32 5, %v337_v21  ;;  %s3306_s13 = scalar_lea.hbm %s5253_s7, %s3457_s23 }
  0x2a   : > { %v3407_v19 = vld [vmem:[%s5250_s4 + $0x28] sm:$0xff]  ;;  %s3855_s17 = scalar_lea.vmem %s5246_s0, %s3387_s14  ;;  %v3863_v25 = vsub.s32 6, %v337_v21  ;;  %v3866_v27 = vsub.s32 1, %v337_v21  ;;  %v3868_v28 = vsub.s32 2, %v337_v21  ;;  %s3308_s29 = sshll.u32 %s5192_s22, 4  ;;  %s3309_s29 = int_to_ptr.vmem [resolvable:$true] %s3308_s29 }
  0x2b   : > { %557 = vperm.xlu1 %3513, %v307_v4   ;;  %833 = vperm.xlu0 %3514, %v304_v5   ;;  %v296_v26 = vld [vmem:[%s3855_s17] sm:$0x77]  ;;  %v297_v29 = vld [vmem:[%s3855_s17 + $0x8] sm:$0x77]  ;;  %v298_v41 = vld [vmem:[%s3855_s17 + $0x10] sm:$0x77] }
  0x2c   : > { %5316 = vst [vmem:[#allocation8_spill] sm:$0xff] %v3868_v28  ;;  %v343_v30 = vrot.slane %v296_v26, %v3857_v22  ;;  %v567_v31 = vrot.slane %v296_v26, %v3861_v24  ;;  %v855_v32 = vrot.slane %v296_v26, %v3863_v25  ;;  %v351_v33 = vrot.slane %v297_v29, %v3857_v22  ;;  %v299_v49 = vld [vmem:[%s3855_s17 + $0x18] sm:$0x77]  ;;  %v300_v62 = vld [vmem:[%s3855_s17 + $0x20] sm:$0x77]  ;;  %s3294_s14 = scalar_lea.sflag [#allocation4], %s285_s20 }
  0x2d   : > { %v339_v34 = vrot.slane %v296_v26, %v3859_v23  ;;  %v575_v35 = vrot.slane %v297_v29, %v3861_v24  ;;  %v863_v36 = vrot.slane %v297_v29, %v3863_v25  ;;  %v563_v37 = vrot.slane %v296_v26, %v3866_v27  ;;  %v301_v63 = vld [vmem:[%s3855_s17 + $0x28] sm:$0x77]  ;;  %s3616_s15 = scalar_lea.vmem %s3309_s29, 1024  ;;  %s3688_s16 = smov [#allocation5]  }
  0x2e   : > { %v851_v38 = vrot.slane %v296_v26, %v3868_v28  ;;  %v347_v39 = vrot.slane %v297_v29, %v3859_v23  ;;  %v571_v40 = vrot.slane %v297_v29, %v3866_v27  ;;  %v3884_v42 = vrot.slane %v343_v30, %v3859_v23  ;;  %p3617_p8 = scmp.ne.s32.totalorder %s3309_s29, %s3616_s15  ;;  %s3620_s28 = sshll.u32 %s3688_s16, 4  ;;  %s3621_s28 = int_to_ptr.vmem [resolvable:$false] %s3620_s28 }
  0x2f   : > { %3515 = vset.pattern.permute.xlu1 %v3685_v0  ;;  %3518 = vset.pattern.permute.xlu0 %v5254_v2  ;;  %v859_v43 = vrot.slane %v297_v29, %v3868_v28  ;;  %v359_v44 = vrot.slane %v298_v41, %v3857_v22  ;;  %v3889_v45 = vrot.slane %v567_v31, %v3866_v27  ;;  %p3623_p11 = scmp.lt.s32.totalorder %s3309_s29, %s3621_s28 }
  0x30   : > { %845 = vperm.xlu1 %3515, %v307_v4   ;;  %320 = vperm.xlu0 %3518, %v306_v3   ;;  %v3892_v46 = vrot.slane %v855_v32, %v3868_v28  ;;  %v3895_v47 = vrot.slane %v351_v33, %v3859_v23  ;;  %v3898_v48 = vrot.slane %v339_v34, %v3859_v23  ;;  %p3618_p9 = pnand %p3617_p8, %p3767_p5 }
  0x31   : > { %v3902_v50 = vrot.slane %v575_v35, %v3866_v27  ;;  %v3905_v51 = vrot.slane %v863_v36, %v3868_v28  ;;  %v583_v52 = vrot.slane %v298_v41, %v3861_v24  ;;  %v871_v53 = vrot.slane %v298_v41, %v3863_v25  ;;  %v302_v35 = vld [vmem:[%s3855_s17 + $0x30] sm:$0x77]  ;;  %v303_v36 = vld [vmem:[%s3855_s17 + $0x38] sm:$0x77] }
  0x32   : > { %v3910_v54 = vrot.slane %v563_v37, %v3866_v27  ;;  %v3913_v55 = vrot.slane %v851_v38, %v3868_v28  ;;  %v3916_v56 = vrot.slane %v347_v39, %v3859_v23  ;;  %v3919_v57 = vrot.slane %v571_v40, %v3866_v27  ;;  %p3619_p10 = pneg %p3618_p9 }
  0x33   : > { %v3922_v58 = vrot.slane %v859_v43, %v3868_v28  ;;  %v3925_v59 = vrot.slane %v359_v44, %v3859_v23  ;;  %v591_v60 = vrot.slane %v299_v49, %v3861_v24  ;;  %v579_v61 = vrot.slane %v298_v41, %v3866_v27 }
  0x34   : > { %3516 = vset.pattern.permute.xlu1 %v5254_v2  ;;  %325 = vperm.xlu0 %3518, %v307_v4   ;;  %v355_v3 = vrot.slane %v298_v41, %v3859_v23  ;;  %v587_v4 = vrot.slane %v299_v49, %v3866_v27  ;;  %v383_v29 = vrot.slane %v301_v63, %v3857_v22 }
  0x35   : > { %310 = vperm.xlu1 %3516, %v304_v5   ;;  %5317 = vst [vmem:[#allocation9_spill] sm:$0xff] %v3925_v59  ;;  %v895_v30 = vrot.slane %v301_v63, %v3863_v25  ;;  %v371_v38 = vrot.slane %v300_v62, %v3859_v23  ;;  %v603_v40 = vrot.slane %v301_v63, %v3866_v27 }
  0x36   : > { %v3965_v20 = vrot.slane %v587_v4, %v3866_v27  ;;  %v379_v43 = vrot.slane %v301_v63, %v3859_v23  ;;  %v891_v44 = vrot.slane %v301_v63, %v3868_v28 }
  0x37   : > { %v4017_v4 = vrot.slane %v603_v40, %v3866_v27 }
  0x38   : > { %315 = vperm.xlu0 %3518, %v305_v6   ;;  %5323 = vst [vmem:[#allocation15_spill] sm:$0xff] %v3965_v20 }
  0x39   : > { %3517 = vset.pattern.permute.xlu1 %v3686_v1  ;;  %v879_v1 = vrot.slane %v299_v49, %v3863_v25  ;;  %5334 = vst [vmem:[#allocation26_spill] sm:$0xff] %v4017_v4 }
  0x3a   : > { %545 = vperm.xlu1 %3517, %v304_v5   ;;  %v3936_v5 = vrot.slane %v583_v52, %v3866_v27  ;;  %v4002_v52 = vrot.slane %v383_v29, %v3859_v23 }
  0x3c   : > { %1141 = vperm.xlu0 %3518, %v1123_v7   ;;  %5318 = vst [vmem:[#allocation10_spill] sm:$0xff] %v3936_v5  ;;  %v867_v7 = vrot.slane %v298_v41, %v3868_v28  ;;  %v883_v41 = vrot.slane %v300_v62, %v3868_v28  ;;  %5331 = vst [vmem:[#allocation23_spill] sm:$0xff] %v4002_v52 }
  0x3e   : > { %549 = vperm.xlu1 %3517, %v305_v6   ;;  %v3968_v21 = vrot.slane %v867_v7, %v3868_v28  ;;  %v911_v7 = vrot.slane %v303_v36, %v3863_v25 }
  0x40   : > { %1452 = vperm.xlu0 %3518, %v1438_v8   ;;  %v363_v8 = vrot.slane %v299_v49, %v3859_v23 }
  0x42   : > { %3519 = vset.pattern.permute.xlu1 %v3685_v0  ;;  %v367_v0 = vrot.slane %v299_v49, %v3857_v22  ;;  %v3971_v26 = vrot.slane %v363_v8, %v3859_v23  ;;  %v387_v8 = vrot.slane %v302_v35, %v3859_v23 }
  0x43   : > { %837 = vperm.xlu1 %3519, %v305_v6   ;;  %v3939_v6 = vrot.slane %v871_v53, %v3868_v28  ;;  %v4005_v53 = vrot.slane %v895_v30, %v3868_v28 }
  0x44   : > { %1442 = vperm.xlu0 %3518, %v1436_v9   ;;  %v875_v9 = vrot.slane %v299_v49, %v3868_v28  ;;  %5324 = vst [vmem:[#allocation16_spill] sm:$0xff] %v3971_v26  ;;  %v391_v49 = vrot.slane %v302_v35, %v3857_v22 }
  0x45   : > { %5319 = vst [vmem:[#allocation11_spill] sm:$0xff] %v3939_v6  ;;  %5332 = vst [vmem:[#allocation24_spill] sm:$0xff] %v4005_v53 }
  0x46   : > { %v3976_v31 = vrot.slane %v875_v9, %v3868_v28  ;;  %v4025_v9 = vrot.slane %v379_v43, %v3859_v23 }
  0x47   : > { %3520 = vset.pattern.permute.xlu1 %v5254_v2 }
  0x48   : > { %2147 = vperm.xlu0 %3518, %v3408_v10   ;;  %1136 = vperm.xlu1 %3520, %v1122_v11   ;;  %v375_v10 = vrot.slane %v300_v62, %v3857_v22  ;;  %v599_v11 = vrot.slane %v300_v62, %v3861_v24  ;;  %5325 = vst [vmem:[#allocation17_spill] sm:$0xff] %v3976_v31  ;;  %5336 = vst [vmem:[#allocation28_spill] sm:$0xff] %v4025_v9 }
  0x4a   : > { %v3979_v32 = vrot.slane %v375_v10, %v3859_v23  ;;  %v3982_v33 = vrot.slane %v599_v11, %v3866_v27  ;;  %v4031_v10 = vrot.slane %v391_v49, %v3859_v23 }
  0x4c   : > { %2137 = vperm.xlu0 %3518, %v3406_v12   ;;  %1126 = vperm.xlu1 %3520, %v1120_v13   ;;  %v607_v12 = vrot.slane %v301_v63, %v3861_v24  ;;  %v3948_v13 = vrot.slane %v591_v60, %v3866_v27  ;;  %5326 = vst [vmem:[#allocation18_spill] sm:$0xff] %v3979_v32  ;;  %5327 = vst [vmem:[#allocation19_spill] sm:$0xff] %v3982_v33 }
  0x4d   : > { %v615_v60 = vrot.slane %v302_v35, %v3861_v24  ;;  %v619_v63 = vrot.slane %v303_v36, %v3866_v27  ;;  %5338 = vst [vmem:[#allocation30_spill] sm:$0xff] %v4031_v10 }
  0x4e   : > { %5320 = vst [vmem:[#allocation12_spill] sm:$0xff] %v3948_v13  ;;  %v3985_v34 = vrot.slane %v607_v12, %v3866_v27 }
  0x4f   : > { %v4034_v11 = vrot.slane %v615_v60, %v3866_v27 }
  0x50   : > { %2823 = vperm.xlu0 %3518, %v2820_v14   ;;  %1131 = vperm.xlu1 %3520, %v1121_v15   ;;  %v3951_v14 = vrot.slane %v579_v61, %v3866_v27  ;;  %v887_v15 = vrot.slane %v300_v62, %v3863_v25  ;;  %5328 = vst [vmem:[#allocation20_spill] sm:$0xff] %v3985_v34 }
  0x51   : > { %v623_v61 = vrot.slane %v303_v36, %v3861_v24  ;;  %v4022_v24 = vrot.slane %v883_v41, %v3868_v28  ;;  %5339 = vst [vmem:[#allocation31_spill] sm:$0xff] %v4034_v11 }
  0x52   : > { %5321 = vst [vmem:[#allocation13_spill] sm:$0xff] %v3951_v14  ;;  %v3990_v37 = vrot.slane %v887_v15, %v3868_v28  ;;  %v395_v15 = vrot.slane %v303_v36, %v3859_v23 }
  0x53   : > { %5335 = vst [vmem:[#allocation27_spill] sm:$0xff] %v4022_v24  ;;  %v4037_v12 = vrot.slane %v623_v61, %v3866_v27 }
  0x54   : > { %1457 = vperm.xlu1 %3520, %v1439_v16   ;;  %v595_v16 = vrot.slane %v300_v62, %v3866_v27  ;;  %5329 = vst [vmem:[#allocation21_spill] sm:$0xff] %v3990_v37  ;;  %v399_v62 = vrot.slane %v303_v36, %v3857_v22  ;;  %v4028_v22 = vrot.slane %v891_v44, %v3868_v28 }
  0x55   : > { %5340 = vst [vmem:[#allocation32_spill] sm:$0xff] %v4037_v12  ;;  %v4061_v36 = vrot.slane %v387_v8, %v3859_v23  ;;  %v4067_v44 = vrot.slane %v395_v15, %v3859_v23 }
  0x56   : > { %v3994_v39 = vrot.slane %v595_v16, %v3866_v27  ;;  %5337 = vst [vmem:[#allocation29_spill] sm:$0xff] %v4028_v22  ;;  %v4045_v29 = vrot.slane %v399_v62, %v3859_v23 }
  0x57   : > { %5348 = vst [vmem:[#allocation40_spill] sm:$0xff] %v4061_v36  ;;  %5350 = vst [vmem:[#allocation42_spill] sm:$0xff] %v4067_v44 }
  0x58   : > { %1447 = vperm.xlu1 %3520, %v1437_v17   ;;  %v3956_v17 = vrot.slane %v367_v0, %v3859_v23  ;;  %5330 = vst [vmem:[#allocation22_spill] sm:$0xff] %v3994_v39  ;;  %v903_v0 = vrot.slane %v302_v35, %v3863_v25  ;;  %v899_v25 = vrot.slane %v302_v35, %v3868_v28  ;;  %5342 = vst [vmem:[#allocation34_spill] sm:$0xff] %v4045_v29 }
  0x5a   : > { %v4042_v16 = vrot.slane %v903_v0, %v3868_v28  ;;  %v4064_v43 = vrot.slane %v899_v25, %v3868_v28 }
  0x5c   : > { %2152 = vperm.xlu1 %3520, %v3409_v18   ;;  %v3959_v18 = vrot.slane %v879_v1, %v3868_v28  ;;  %v611_v1 = vrot.slane %v302_v35, %v3866_v27  ;;  %5341 = vst [vmem:[#allocation33_spill] sm:$0xff] %v4042_v16  ;;  %v4058_v35 = vrot.slane %v911_v7, %v3868_v28  ;;  %5349 = vst [vmem:[#allocation41_spill] sm:$0xff] %v4064_v43 }
  0x5e   : > { %5322 = vst [vmem:[#allocation14_spill] sm:$0xff] %v3959_v18  ;;  %v4048_v30 = vrot.slane %v611_v1, %v3866_v27  ;;  %5347 = vst [vmem:[#allocation39_spill] sm:$0xff] %v4058_v35 }
  0x60   : > { %2142 = vperm.xlu1 %3520, %v3407_v19   ;;  %v3962_v19 = vrot.slane %v355_v3, %v3859_v23  ;;  %v4014_v3 = vrot.slane %v371_v38, %v3859_v23  ;;  %5343 = vst [vmem:[#allocation35_spill] sm:$0xff] %v4048_v30  ;;  %v4051_v38 = vrot.slane %v619_v63, %v3866_v27 }
  0x62   : > { %5333 = vst [vmem:[#allocation25_spill] sm:$0xff] %v4014_v3  ;;  %5344 = vst [vmem:[#allocation36_spill] sm:$0xff] %v4051_v38 }
  0xa2   : > { %v4053_v40 = vpop.permute.xlu1 %553  ;;  %v4055_v41 = vpop.permute.xlu0 %841 }
  0xa3   : > { %5345 = vst [vmem:[#allocation37_spill] sm:$0xff] %v4053_v40  ;;  %5346 = vst [vmem:[#allocation38_spill] sm:$0xff] %v4055_v41  ;;  %v737_v27 = vmul.f32 %v3889_v45, %v4053_v40  ;;  %v1025_v49 = vmul.f32 %v3892_v46, %v4055_v41  ;;  %v739_v60 = vmul.f32 %v3902_v50, %v4053_v40 }
  0xa4   : > { %v1027_v61 = vmul.f32 %v3905_v51, %v4055_v41  ;;  %v736_v0 = vmul.f32 %v3910_v54, %v4053_v40  ;;  %v1024_v62 = vmul.f32 %v3913_v55, %v4055_v41  ;;  %v738_v23 = vmul.f32 %v3919_v57, %v4053_v40 }
  0xa5   : > { %v1026_v1 = vmul.f32 %v3922_v58, %v4055_v41  ;;  %v4087_v63 = vmul.f32 %v3936_v5, %v4053_v40  ;;  %v4091_v7 = vmul.f32 %v3939_v6, %v4055_v41  ;;  %v4095_v8 = vmul.f32 %v3948_v13, %v4053_v40 }
  0xa6   : > { %v4099_v25 = vmul.f32 %v3959_v18, %v4055_v41  ;;  %v4101_v15 = vpop.permute.xlu1 %557  ;;  %v4103_v2 = vpop.permute.xlu0 %833  ;;  %v4107_v28 = vmul.f32 %v3951_v14, %v4053_v40  ;;  %v4111_v38 = vmul.f32 %v3968_v21, %v4055_v41  ;;  %v4115_v44 = vmul.f32 %v3965_v20, %v4053_v40 }
  0xa7   : > { %5351 = vst [vmem:[#allocation43_spill] sm:$0xff] %v4101_v15  ;;  %5352 = vst [vmem:[#allocation44_spill] sm:$0xff] %v4103_v2  ;;  %v4119_v43 = vmul.f32 %v3976_v31, %v4055_v41  ;;  %v753_v30 = vmul.f32 %v3889_v45, %v4101_v15  ;;  %v755_v36 = vmul.f32 %v3902_v50, %v4101_v15 }
  0xa8   : > { %5353 = vst [vmem:[#allocation45_spill] sm:$0xff] %v4111_v38  ;;  %5354 = vst [vmem:[#allocation46_spill] sm:$0xff] %v4115_v44  ;;  %v752_v35 = vmul.f32 %v3910_v54, %v4101_v15  ;;  %v754_v12 = vmul.f32 %v3919_v57, %v4101_v15  ;;  %v4131_v29 = vmul.f32 %v3892_v46, %v4103_v2 }
  0xa9   : > { %5355 = vst [vmem:[#allocation47_spill] sm:$0xff] %v4119_v43  ;;  %v4135_v16 = vmul.f32 %v3905_v51, %v4103_v2  ;;  %v4139_v11 = vmul.f32 %v3913_v55, %v4103_v2  ;;  %v4143_v10 = vmul.f32 %v3922_v58, %v4103_v2  ;;  %v4147_v22 = vmul.f32 %v3936_v5, %v4101_v15 }
  0xaa   : > { %v4151_v4 = vmul.f32 %v3948_v13, %v4101_v15  ;;  %v4155_v9 = vmul.f32 %v3951_v14, %v4101_v15  ;;  %v4159_v24 = vmul.f32 %v3965_v20, %v4101_v15  ;;  %v4163_v39 = vmul.f32 %v3939_v6, %v4103_v2 }
  0xab   : > { %v4167_v3 = vmul.f32 %v3959_v18, %v4103_v2  ;;  %v4171_v53 = vmul.f32 %v3968_v21, %v4103_v2  ;;  %v4175_v52 = vmul.f32 %v3976_v31, %v4103_v2  ;;  %v4177_v32 = vpop.permute.xlu1 %845  ;;  %v4179_v20 = vpop.permute.xlu0 %320  ;;  %v4183_v14 = vmul.f32 %v3982_v33, %v4053_v40 }
  0xac   : > { %5356 = vst [vmem:[#allocation48_spill] sm:$0xff] %v4159_v24  ;;  %5357 = vst [vmem:[#allocation49_spill] sm:$0xff] %v4163_v39  ;;  %v4187_v13 = vmul.f32 %v3982_v33, %v4101_v15  ;;  %v4195_v2 = vmul.f32 %v3985_v34, %v4053_v40  ;;  %v1043_v33 = vmul.f32 %v3905_v51, %v4177_v32 }
  0xad   : > { %5358 = vst [vmem:[#allocation50_spill] sm:$0xff] %v4167_v3  ;;  %5359 = vst [vmem:[#allocation51_spill] sm:$0xff] %v4171_v53  ;;  %v4191_v3 = vmul.f32 %v3990_v37, %v4055_v41  ;;  %v1041_v53 = vmul.f32 %v3892_v46, %v4177_v32  ;;  %v512_v41 = vmul.f32 %v3898_v48, %v4179_v20 }
  0xae   : > { %5360 = vst [vmem:[#allocation52_spill] sm:$0xff] %v4175_v52  ;;  %5361 = vst [vmem:[#allocation53_spill] sm:$0xff] %v4183_v14  ;;  %v513_v52 = vmul.f32 %v3884_v42, %v4179_v20  ;;  %v515_v14 = vmul.f32 %v3895_v47, %v4179_v20  ;;  %v1040_v15 = vmul.f32 %v3913_v55, %v4177_v32 }
  0xaf   : > { %5362 = vst [vmem:[#allocation54_spill] sm:$0xff] %v4187_v13  ;;  %5363 = vst [vmem:[#allocation55_spill] sm:$0xff] %v4191_v3  ;;  %v514_v40 = vmul.f32 %v3916_v56, %v4179_v20  ;;  %v517_v37 = vmul.f32 %v3925_v59, %v4179_v20  ;;  %v4217_v13 = vmul.f32 %v3939_v6, %v4177_v32  ;;  %v4219_v39 = vpop.permute.xlu0 %325 }
  0xb0   : > { %5364 = vst [vmem:[#allocation56_spill] sm:$0xff] %v4195_v2  ;;  %v1042_v2 = vmul.f32 %v3922_v58, %v4177_v32  ;;  %v801_v34 = vadd.f32 %v737_v27, %v513_v52  ;;  %v803_v3 = vadd.f32 %v739_v60, %v515_v14  ;;  %v800_v43 = vadd.f32 %v736_v0, %v512_v41  ;;  %v4227_v52 = vpop.permute.xlu1 %310 }
  0xb1   : > { %v802_v5 = vadd.f32 %v738_v23, %v514_v40  ;;  %v519_v24 = vmul.f32 %v3956_v17, %v4179_v20  ;;  %v4225_v44 = vmul.f32 %v3959_v18, %v4177_v32  ;;  %5365 = vst [vmem:[#allocation57_spill] sm:$0xff] %v4227_v52  ;;  %v529_v14 = vmul.f32 %v3884_v42, %v4219_v39 }
  0xb2   : > { %v4231_v27 = vadd.f32 %v1025_v49, %v801_v34  ;;  %v531_v60 = vmul.f32 %v3895_v47, %v4219_v39  ;;  %v4235_v6 = vadd.f32 %v1027_v61, %v803_v3  ;;  %v528_v40 = vmul.f32 %v3898_v48, %v4219_v39 }
  0xb3   : > { %v4239_v41 = vadd.f32 %v1024_v62, %v800_v43  ;;  %v530_v0 = vmul.f32 %v3916_v56, %v4219_v39  ;;  %v4243_v23 = vadd.f32 %v1026_v1, %v802_v5  ;;  %v817_v18 = vadd.f32 %v753_v30, %v529_v14  ;;  %v4249_v3 = vpop.permute.xlu0 %315 }
  0xb4   : > { %v819_v31 = vadd.f32 %v755_v36, %v531_v60  ;;  %v481_v34 = vmul.f32 %v3884_v42, %v4227_v52  ;;  %v483_v49 = vmul.f32 %v3895_v47, %v4227_v52  ;;  %5366 = vst [vmem:[#allocation58_spill] sm:$0xff] %v4249_v3  ;;  %v816_v61 = vadd.f32 %v752_v35, %v528_v40 }
  0xb5   : > { %v818_v26 = vadd.f32 %v754_v12, %v530_v0  ;;  %v480_v43 = vmul.f32 %v3898_v48, %v4227_v52  ;;  %v482_v62 = vmul.f32 %v3916_v56, %v4227_v52  ;;  %v1105_v5 = vadd.f32 %v1041_v53, %v817_v18  ;;  %v4259_v14 = vpop.permute.xlu1 %545 }
  0xb6   : > { %v1107_v1 = vadd.f32 %v1043_v33, %v819_v31  ;;  %v497_v30 = vmul.f32 %v3884_v42, %v4249_v3  ;;  %v499_v36 = vmul.f32 %v3895_v47, %v4249_v3  ;;  %5367 = vst [vmem:[#allocation59_spill] sm:$0xff] %v4259_v14  ;;  %v1104_v60 = vadd.f32 %v1040_v15, %v816_v61 }
  0xb7   : > { %v1106_v38 = vadd.f32 %v1042_v2, %v818_v26  ;;  %v496_v12 = vmul.f32 %v3898_v48, %v4249_v3  ;;  %v498_v35 = vmul.f32 %v3916_v56, %v4249_v3  ;;  %v705_v18 = vmul.f32 %v3889_v45, %v4259_v14  ;;  %v4273_v33 = vpop.permute.xlu0 %1141 }
  0xb8   : > { %v707_v31 = vmul.f32 %v3902_v50, %v4259_v14  ;;  %v704_v42 = vmul.f32 %v3910_v54, %v4259_v14  ;;  %v706_v47 = vmul.f32 %v3919_v57, %v4259_v14  ;;  %v533_v2 = vmul.f32 %v3925_v59, %v4219_v39 }
  0xb9   : > { %v805_v48 = vadd.f32 %v4087_v63, %v517_v37  ;;  %v535_v56 = vmul.f32 %v3956_v17, %v4219_v39  ;;  %v807_v26 = vadd.f32 %v4095_v8, %v519_v24  ;;  %v1193_v53 = vadd.f32 %v4273_v33, %v1105_v5  ;;  %v4285_v61 = vpop.permute.xlu1 %549 }
  0xba   : > { %v1195_v15 = vadd.f32 %v4273_v33, %v1107_v1  ;;  %v1192_v40 = vadd.f32 %v4273_v33, %v1104_v60  ;;  %v1194_v0 = vadd.f32 %v4273_v33, %v1106_v38  ;;  %v769_v14 = vadd.f32 %v705_v18, %v481_v34 }
  0xbb   : > { %v771_v3 = vadd.f32 %v707_v31, %v483_v49  ;;  %v768_v59 = vadd.f32 %v704_v42, %v480_v43  ;;  %v770_v52 = vadd.f32 %v706_v47, %v482_v62  ;;  %vm1257_vm0 = vcmp.gt.f32.partialorder %v1193_v53, 0.0 }
  0xbc   : > { %v1321_v37 = vmul.f32 0.01, %v1193_v53  ;;  %vm1259_vm1 = vcmp.gt.f32.partialorder %v1195_v15, 0.0  ;;  %v1323_v63 = vmul.f32 0.01, %v1195_v15  ;;  %vm1256_vm2 = vcmp.gt.f32.partialorder %v1192_v40, 0.0 }
  0xbd   : > { %v1320_v24 = vmul.f32 0.01, %v1192_v40  ;;  %vm1258_vm3 = vcmp.gt.f32.partialorder %v1194_v0, 0.0  ;;  %v1322_v8 = vmul.f32 0.01, %v1194_v0  ;;  %v721_v38 = vmul.f32 %v3889_v45, %v4285_v61 }
  0xbe   : > { %v4287_v5 = vsel %vm1257_vm0, %v1193_v53, %v1321_v37  ;;  %v4289_v1 = vsel %vm1259_vm1, %v1195_v15, %v1323_v63  ;;  %v1057_v34 = vadd.f32 %v4131_v29, %v769_v14  ;;  %v723_v62 = vmul.f32 %v3902_v50, %v4285_v61  ;;  %v4301_v18 = vpop.permute.xlu1 %837 }
  0xbf   : > { %v4294_v49 = vsel %vm1256_vm2, %v1192_v40, %v1320_v24  ;;  %v4296_v43 = vsel %vm1258_vm3, %v1194_v0, %v1322_v8  ;;  %v1059_v60 = vadd.f32 %v4135_v16, %v771_v3  ;;  %v785_v31 = vadd.f32 %v721_v38, %v497_v30 }
  0xc0   : > { %v720_v42 = vmul.f32 %v3910_v54, %v4285_v61  ;;  %v1056_v47 = vadd.f32 %v4139_v11, %v768_v59  ;;  %v722_v45 = vmul.f32 %v3919_v57, %v4285_v61  ;;  %v1009_v29 = vmul.f32 %v3892_v46, %v4301_v18 }
  0xc1   : > { %v787_v14 = vadd.f32 %v723_v62, %v499_v36  ;;  %v1011_v50 = vmul.f32 %v3905_v51, %v4301_v18  ;;  %v1008_v16 = vmul.f32 %v3913_v55, %v4301_v18  ;;  %v1010_v54 = vmul.f32 %v3922_v58, %v4301_v18 }
  0xc2   : > { %v784_v3 = vadd.f32 %v720_v42, %v496_v12  ;;  %v786_v30 = vadd.f32 %v722_v45, %v498_v35  ;;  %v1058_v59 = vadd.f32 %v4143_v10, %v770_v52  ;;  %v1073_v11 = vadd.f32 %v1009_v29, %v785_v31 }
  0xc3   : > { %v1075_v53 = vadd.f32 %v1011_v50, %v787_v14  ;;  %v821_v57 = vadd.f32 %v4147_v22, %v533_v2  ;;  %v1093_v46 = vadd.f32 %v4091_v7, %v805_v48  ;;  %v823_v51 = vadd.f32 %v4151_v4, %v535_v56  ;;  %v4323_v12 = vpop.permute.xlu1 %1136 }
  0xc4   : > { %v1072_v36 = vadd.f32 %v1008_v16, %v784_v3  ;;  %v4319_v15 = vadd.f32 %v1010_v54, %v786_v30  ;;  %v1095_v55 = vadd.f32 %v4099_v25, %v807_v26  ;;  %v4328_v58 = vmul.f32 %v3962_v19, %v4179_v20 }
  0xc5   : > { %v1109_v35 = vadd.f32 %v4217_v13, %v821_v57  ;;  %v4332_v22 = vmul.f32 %v3962_v19, %v4219_v39  ;;  %v4336_v10 = vmul.f32 %v3968_v21, %v4177_v32  ;;  %v1177_v4 = vadd.f32 %v4323_v12, %v4231_v27 }
  0xc6   : > { %v1179_v7 = vadd.f32 %v4323_v12, %v4235_v6  ;;  %v1176_v13 = vadd.f32 %v4323_v12, %v4239_v41  ;;  %v1178_v25 = vadd.f32 %v4323_v12, %v4243_v23  ;;  %v4347_v52 = vadd.f32 %v4323_v12, %v1093_v46 }
  0xc7   : > { %v4350_v2 = vadd.f32 %v4273_v33, %v1109_v35  ;;  %v4353_v48 = vadd.f32 %v4225_v44, %v823_v51  ;;  %v4356_v27 = vadd.f32 %v4323_v12, %v1095_v55  ;;  %vm1241_vm4 = vcmp.gt.f32.partialorder %v1177_v4, 0.0  ;;  %v4358_v41 = vpop.permute.xlu1 %1126 }
  0xc8   : > { %v1305_v6 = vmul.f32 0.01, %v1177_v4  ;;  %vm1243_vm5 = vcmp.gt.f32.partialorder %v1179_v7, 0.0  ;;  %v1307_v56 = vmul.f32 0.01, %v1179_v7  ;;  %vm1240_vm6 = vcmp.gt.f32.partialorder %v1176_v13, 0.0 }
  0xc9   : > { %v1304_v23 = vmul.f32 0.01, %v1176_v13  ;;  %vm1242_vm7 = vcmp.gt.f32.partialorder %v1178_v25, 0.0  ;;  %v1306_v26 = vmul.f32 0.01, %v1178_v25  ;;  %v1145_v37 = vadd.f32 %v4358_v41, %v1057_v34 }
  0xca   : > { %v1369_v40 = vsel %vm1241_vm4, %v1177_v4, %v1305_v6  ;;  %v1371_v0 = vsel %vm1243_vm5, %v1179_v7, %v1307_v56  ;;  %v1147_v44 = vadd.f32 %v4358_v41, %v1059_v60  ;;  %v1144_v60 = vadd.f32 %v4358_v41, %v1056_v47 }
  0xcb   : > { %v1421_v63 = vpack.c.bf16 %v4287_v5, %v1369_v40  ;;  %v1423_v24 = vpack.c.bf16 %v4289_v1, %v1371_v0  ;;  %v1368_v8 = vsel %vm1240_vm6, %v1176_v13, %v1304_v23  ;;  %v1370_v38 = vsel %vm1242_vm7, %v1178_v25, %v1306_v26  ;;  %v4366_v45 = vpop.permute.xlu1 %1131  ;;  %v4382_v13 = vld [vmem:[#allocation2] sm:$0xff]  }
  0xcc   : > { %v1420_v62 = vpack.c.bf16 %v4294_v49, %v1368_v8  ;;  %v1422_v31 = vpack.c.bf16 %v4296_v43, %v1370_v38  ;;  %vm1209_vm8 = vcmp.gt.f32.partialorder %v1145_v37, 0.0  ;;  %v1273_v42 = vmul.f32 0.01, %v1145_v37  ;;  %v5371_v38 = vld [vmem:[#allocation57_spill] sm:$0xff] }
  0xcd   : > { %1489 = vmatprep.subr.bf16.mxu0 %v1421_v63  ;;  %1542 = vmatprep.subr.bf16.mxu1 %v1423_v24  ;;  %vm1211_vm9 = vcmp.gt.f32.partialorder %v1147_v44, 0.0  ;;  %v1275_v34 = vmul.f32 0.01, %v1147_v44  ;;  %v1146_v5 = vadd.f32 %v4358_v41, %v1058_v59  ;;  %v1161_v1 = vadd.f32 %v4366_v45, %v1073_v11  ;;  %v5368_v63 = vld [vmem:[#allocation45_spill] sm:$0xff] }
  0xce   : > { %1490 = vmatpush1.bf16.msra.mxu0 %v1420_v62  ;;  %1543 = vmatpush1.bf16.msra.mxu1 %v1422_v31  ;;  %v1337_v29 = vsel %vm1209_vm8, %v1145_v37, %v1273_v42  ;;  %v1163_v49 = vadd.f32 %v4366_v45, %v1075_v53  ;;  %vm1245_vm10 = vcmp.gt.f32.partialorder %v4347_v52, 0.0  ;;  %v1160_v14 = vadd.f32 %v4366_v45, %v1072_v36  ;;  %v5372_v62 = vld [vmem:[#allocation9_spill] sm:$0xff] }
  0xcf   : > { %v1339_v43 = vsel %vm1211_vm9, %v1147_v44, %v1275_v34  ;;  %vm1208_vm12 = vcmp.gt.f32.partialorder %v1144_v60, 0.0  ;;  %v1272_v50 = vmul.f32 0.01, %v1144_v60  ;;  %vm1225_vm13 = vcmp.gt.f32.partialorder %v1161_v1, 0.0 }
  0xd0   : > { %v1289_v16 = vmul.f32 0.01, %v1161_v1  ;;  %vm1227_vm14 = vcmp.gt.f32.partialorder %v1163_v49, 0.0  ;;  %v1291_v47 = vmul.f32 0.01, %v1163_v49  ;;  %vm1224_vm15 = vcmp.gt.f32.partialorder %v1160_v14, 0.0 }
  0xd1   : > { %v1288_v3 = vmul.f32 0.01, %v1160_v14  ;;  %v1336_v30 = vsel %vm1208_vm12, %v1144_v60, %v1272_v50  ;;  %v1162_v54 = vadd.f32 %v4366_v45, %v4319_v15  ;;  %vm1210_vm0 = vcmp.gt.f32.partialorder %v1146_v5, 0.0  ;;  %v5377_v50 = vld [vmem:[#allocation59_spill] sm:$0xff] }
  0xd2   : > { %v1353_v59 = vsel %vm1225_vm13, %v1161_v1, %v1289_v16  ;;  %v1355_v11 = vsel %vm1227_vm14, %v1163_v49, %v1291_v47  ;;  %v1274_v53 = vmul.f32 0.01, %v1146_v5  ;;  %vm1261_vm2 = vcmp.gt.f32.partialorder %v4350_v2, 0.0  ;;  %v5378_v16 = vld [vmem:[#allocation10_spill] sm:$0xff] }
  0xd3   : > { %v1405_v57 = vpack.c.bf16 %v1353_v59, %v1337_v29  ;;  %v1407_v46 = vpack.c.bf16 %v1355_v11, %v1339_v43  ;;  %v1352_v51 = vsel %vm1224_vm15, %v1160_v14, %v1288_v3  ;;  %vm1226_vm1 = vcmp.gt.f32.partialorder %v1162_v54, 0.0  ;;  %v5376_v43 = vld [vmem:[#allocation58_spill] sm:$0xff]  ;;  %v4419_v11 = vld [vmem:[#allocation2 + $0x8] sm:$0xff]  }
  0xd4   : > { %v1404_v36 = vpack.c.bf16 %v1352_v51, %v1336_v30  ;;  %v1290_v55 = vmul.f32 0.01, %v1162_v54  ;;  %v1338_v35 = vsel %vm1210_vm0, %v1146_v5, %v1274_v53  ;;  %v1309_v4 = vmul.f32 0.01, %v4347_v52  ;;  %v5374_v5 = vld [vmem:[#allocation48_spill] sm:$0xff]  ;;  %v5379_v30 = vld [vmem:[#allocation47_spill] sm:$0xff] }
  0xd5   : > { %1491 = vmatprep.subr.bf16.mxu0 %v1405_v57  ;;  %1544 = vmatprep.subr.bf16.mxu1 %v1407_v46  ;;  %v1325_v7 = vmul.f32 0.01, %v4350_v2  ;;  %v1199_v15 = vadd.f32 %v4273_v33, %v4353_v48  ;;  %vm1247_vm3 = vcmp.gt.f32.partialorder %v4356_v27, 0.0  ;;  %v1311_v6 = vmul.f32 0.01, %v4356_v27  ;;  %v5380_v51 = vld [vmem:[#allocation11_spill] sm:$0xff] }
  0xd6   : > { %1492 = vmatpush1.bf16.msra.mxu0 %v1404_v36  ;;  %v1354_v25 = vsel %vm1226_vm1, %v1162_v54, %v1290_v55  ;;  %v804_v56 = vadd.f32 %v4107_v28, %v4328_v58  ;;  %v820_v23 = vadd.f32 %v4155_v9, %v4332_v22  ;;  %v1373_v40 = vsel %vm1245_vm10, %v4347_v52, %v1309_v4  ;;  %v5369_v9 = vld [vmem:[#allocation16_spill] sm:$0xff] }
  0xd7   : > { %v1406_v26 = vpack.c.bf16 %v1354_v25, %v1338_v35  ;;  %v1389_v48 = vsel %vm1261_vm2, %v4350_v2, %v1325_v7  ;;  %vm1263_vm4 = vcmp.gt.f32.partialorder %v1199_v15, 0.0  ;;  %v1327_v37 = vmul.f32 0.01, %v1199_v15 }
  0xd8   : > { %v1425_v0 = vpack.c.bf16 %v1389_v48, %v1373_v40  ;;  %v1375_v44 = vsel %vm1247_vm3, %v4356_v27, %v1311_v6  ;;  %v1092_v24 = vadd.f32 %v5368_v63, %v804_v56  ;;  %v1108_v28 = vadd.f32 %v4336_v10, %v820_v23  ;;  %v5370_v27 = vld [vmem:[#allocation17_spill] sm:$0xff]  ;;  %v5373_v10 = vld [vmem:[#allocation46_spill] sm:$0xff] }
  0xd9   : > { %1545 = vmatpush1.bf16.msra.mxu1 %v1406_v26  ;;  %3390 = vmatmul.mubr.msk.bf16.vlgmr.msra.gmra.mxu0 %vm1470_vm11, %v4382_v13  ;;  %v518_v58 = vmul.f32 %v5369_v9, %v4179_v20  ;;  %v534_v22 = vmul.f32 %v5369_v9, %v4219_v39  ;;  %v1391_v52 = vsel %vm1263_vm4, %v1199_v15, %v1327_v37  ;;  %v5375_v29 = vmov 0   ;;  %v5381_v6 = vld [vmem:[#allocation49_spill] sm:$0xff]  ;;  %v5382_v37 = vld [vmem:[#allocation12_spill] sm:$0xff] }
  0xda   : > { %1595 = vmatprep.subr.bf16.mxu0 %v1425_v0  ;;  %v1180_v2 = vadd.f32 %v4323_v12, %v1092_v24  ;;  %v1046_v8 = vmul.f32 %v5370_v27, %v4177_v32  ;;  %v485_v31 = vmul.f32 %v5372_v62, %v5371_v38  ;;  %v1427_v42 = vpack.c.bf16 %v1391_v52, %v1375_v44 }
  0xdb   : > { %v1196_v34 = vadd.f32 %v4273_v33, %v1108_v28  ;;  %v806_v60 = vadd.f32 %v5373_v10, %v518_v58  ;;  %v822_v1 = vadd.f32 %v5374_v5, %v534_v22  ;;  %1519 = vmatprep.mubr.bf16.mxu0 %v5375_v29  ;;  %v501_v14 = vmul.f32 %v5372_v62, %v5376_v43 }
  0xdc   : > { %3392 = vmatmul.mubr.msk.bf16.vlgmr.msra.gmra.mxu1 %vm1470_vm11, %v4382_v13  ;;  %vm1244_vm5 = vcmp.gt.f32.partialorder %v1180_v2, 0.0  ;;  %v1308_v49 = vmul.f32 0.01, %v1180_v2  ;;  %v709_v47 = vmul.f32 %v5378_v16, %v5377_v50  ;;  %1648 = vmatprep.subr.bf16.mxu1 %v1427_v42  ;;  %v725_v57 = vmul.f32 %v5378_v16, %v4285_v61 }
  0xdd   : > { %vm1260_vm6 = vcmp.gt.f32.partialorder %v1196_v34, 0.0  ;;  %v1324_v3 = vmul.f32 0.01, %v1196_v34  ;;  %v1094_v54 = vadd.f32 %v5379_v30, %v806_v60  ;;  %v1110_v59 = vadd.f32 %v1046_v8, %v822_v1  ;;  %1572 = vmatprep.mubr.bf16.mxu1 %v5375_v29 }
  0xde   : > { %v1372_v53 = vsel %vm1244_vm5, %v1180_v2, %v1308_v49  ;;  %v773_v46 = vadd.f32 %v709_v47, %v485_v31  ;;  %v1013_v36 = vmul.f32 %v5380_v51, %v4301_v18  ;;  %v487_v7 = vmul.f32 %v3956_v17, %v5371_v38  ;;  %v5385_v49 = vld [vmem:[#allocation50_spill] sm:$0xff]  ;;  %v5386_v51 = vld [vmem:[#allocation51_spill] sm:$0xff] }
  0xdf   : > { %v1388_v55 = vsel %vm1260_vm6, %v1196_v34, %v1324_v3  ;;  %v1182_v35 = vadd.f32 %v4323_v12, %v1094_v54  ;;  %v1198_v4 = vadd.f32 %v4273_v33, %v1110_v59  ;;  %v789_v25 = vadd.f32 %v725_v57, %v501_v14  ;;  %v5384_v34 = vld [vmem:[#allocation13_spill] sm:$0xff] }
  0xe0   : > { %v1424_v15 = vpack.c.bf16 %v1388_v55, %v1372_v53  ;;  %v1061_v56 = vadd.f32 %v5381_v6, %v773_v46  ;;  %v503_v23 = vmul.f32 %v3956_v17, %v5376_v43  ;;  %v711_v44 = vmul.f32 %v5382_v37, %v5377_v50  ;;  %v5383_v17 = vld [vmem:[#allocation14_spill] sm:$0xff] }
  0xe1   : > { %vm1246_vm7 = vcmp.gt.f32.partialorder %v1182_v35, 0.0  ;;  %vm1262_vm8 = vcmp.gt.f32.partialorder %v1198_v4, 0.0  ;;  %v1310_v26 = vmul.f32 0.01, %v1182_v35  ;;  %v1326_v40 = vmul.f32 0.01, %v1198_v4  ;;  %3391 = vmatmul.mubr.msk.bf16.gmra.mxu0 %vm1470_vm11, %v4419_v11 }
  0xe2   : > { %1596 = vmatpush1.bf16.msra.mxu0 %v1424_v15  ;;  %v1077_v48 = vadd.f32 %v1013_v36, %v789_v25  ;;  %v1149_v0 = vadd.f32 %v4358_v41, %v1061_v56  ;;  %v727_v63 = vmul.f32 %v5382_v37, %v4285_v61  ;;  %v1015_v58 = vmul.f32 %v5383_v17, %v4301_v18 }
  0xe3   : > { %v1374_v24 = vsel %vm1246_vm7, %v1182_v35, %v1310_v26  ;;  %v1390_v28 = vsel %vm1262_vm8, %v1198_v4, %v1326_v40  ;;  %v484_v22 = vmul.f32 %v3962_v19, %v5371_v38  ;;  %1615 = vmatprep.mubr.bf16.mxu0 %v5375_v29  ;;  %v775_v62 = vadd.f32 %v711_v44, %v487_v7  ;;  %v5387_v35 = vld [vmem:[#allocation15_spill] sm:$0xff] }
  0xe4   : > { %v1426_v52 = vpack.c.bf16 %v1390_v28, %v1374_v24  ;;  %v1165_v2 = vadd.f32 %v4366_v45, %v1077_v48  ;;  %vm1213_vm9 = vcmp.gt.f32.partialorder %v1149_v0, 0.0  ;;  %v1277_v8 = vmul.f32 0.01, %v1149_v0  ;;  %3393 = vmatmul.mubr.msk.bf16.gmra.mxu1 %vm1470_vm11, %v4419_v11  ;;  %v5388_v48 = vld [vmem:[#allocation18_spill] sm:$0xff]  ;;  %v5389_v24 = vld [vmem:[#allocation52_spill] sm:$0xff] }
  0xe5   : > { %v791_v31 = vadd.f32 %v727_v63, %v503_v23  ;;  %v500_v42 = vmul.f32 %v3962_v19, %v5376_v43  ;;  %v708_v10 = vmul.f32 %v5384_v34, %v5377_v50  ;;  %1668 = vmatprep.mubr.bf16.mxu1 %v5375_v29  ;;  %v724_v1 = vmul.f32 %v5384_v34, %v4285_v61 }
  0xe6   : > { %1649 = vmatpush1.bf16.msra.mxu1 %v1426_v52  ;;  %vm1229_vm10 = vcmp.gt.f32.partialorder %v1165_v2, 0.0  ;;  %v1293_v60 = vmul.f32 0.01, %v1165_v2  ;;  %v1341_v5 = vsel %vm1213_vm9, %v1149_v0, %v1277_v8  ;;  %v1063_v14 = vadd.f32 %v5385_v49, %v775_v62  ;;  %v5392_v62 = vld [vmem:[#allocation21_spill] sm:$0xff] }
  0xe7   : > { %v1079_v16 = vadd.f32 %v1015_v58, %v791_v31  ;;  %v772_v47 = vadd.f32 %v708_v10, %v484_v22  ;;  %v1012_v3 = vmul.f32 %v3968_v21, %v4301_v18  ;;  %v788_v30 = vadd.f32 %v724_v1, %v500_v42  ;;  %v5390_v58 = vld [vmem:[#allocation53_spill] sm:$0xff]  ;;  %v5393_v42 = vld [vmem:[#allocation23_spill] sm:$0xff] }
  0xe8   : > { %v1357_v19 = vsel %vm1229_vm10, %v1165_v2, %v1293_v60  ;;  %v486_v54 = vmul.f32 %v5369_v9, %v5371_v38  ;;  %v502_v59 = vmul.f32 %v5369_v9, %v5376_v43  ;;  %v1151_v57 = vadd.f32 %v4358_v41, %v1063_v14  ;;  %v5391_v2 = vld [vmem:[#allocation54_spill] sm:$0xff]  ;;  %v5394_v1 = vld [vmem:[#allocation55_spill] sm:$0xff] }
  0xe9   : > { %v1409_v53 = vpack.c.bf16 %v1357_v19, %v1341_v5  ;;  %v1167_v46 = vadd.f32 %v4366_v45, %v1079_v16  ;;  %v1060_v36 = vadd.f32 %v5386_v51, %v772_v47  ;;  %v1076_v55 = vadd.f32 %v1012_v3, %v788_v30  ;;  %v5395_v3 = vld [vmem:[#allocation43_spill] sm:$0xff]  ;;  %v5396_v19 = vld [vmem:[#allocation20_spill] sm:$0xff] }
  0xea   : > { %v710_v4 = vmul.f32 %v5387_v35, %v5377_v50  ;;  %v726_v21 = vmul.f32 %v5387_v35, %v4285_v61  ;;  %v1014_v7 = vmul.f32 %v5370_v27, %v4301_v18  ;;  %vm1215_vm12 = vcmp.gt.f32.partialorder %v1151_v57, 0.0 }
  0xeb   : > { %1597 = vmatprep.subr.bf16.mxu0 %v1409_v53  ;;  %vm1231_vm13 = vcmp.gt.f32.partialorder %v1167_v46, 0.0  ;;  %v1279_v9 = vmul.f32 0.01, %v1151_v57  ;;  %v1295_v15 = vmul.f32 0.01, %v1167_v46  ;;  %v1148_v25 = vadd.f32 %v4358_v41, %v1060_v36 }
  0xec   : > { %v1164_v6 = vadd.f32 %v4366_v45, %v1076_v55  ;;  %v774_v56 = vadd.f32 %v710_v4, %v486_v54  ;;  %v790_v23 = vadd.f32 %v726_v21, %v502_v59  ;;  %v521_v0 = vmul.f32 %v5388_v48, %v4179_v20  ;;  %v5398_v4 = vld [vmem:[#allocation38_spill] sm:$0xff]  ;;  %v5399_v21 = vld [vmem:[#allocation24_spill] sm:$0xff] }
  0xed   : > { %v1343_v26 = vsel %vm1215_vm12, %v1151_v57, %v1279_v9  ;;  %v1359_v40 = vsel %vm1231_vm13, %v1167_v46, %v1295_v15  ;;  %v537_v37 = vmul.f32 %v5388_v48, %v4219_v39  ;;  %vm1212_vm14 = vcmp.gt.f32.partialorder %v1148_v25, 0.0  ;;  %v5397_v46 = vld [vmem:[#allocation56_spill] sm:$0xff] }
  0xee   : > { %v1411_v27 = vpack.c.bf16 %v1359_v40, %v1343_v26  ;;  %vm1228_vm15 = vcmp.gt.f32.partialorder %v1164_v6, 0.0  ;;  %v1276_v44 = vmul.f32 0.01, %v1148_v25  ;;  %v1292_v63 = vmul.f32 0.01, %v1164_v6  ;;  %v5400_v26 = vld [vmem:[#allocation25_spill] sm:$0xff] }
  0xef   : > { %v1062_v28 = vadd.f32 %v5389_v24, %v774_v56  ;;  %v1078_v17 = vadd.f32 %v1014_v7, %v790_v23  ;;  %v809_v22 = vadd.f32 %v5390_v58, %v521_v0  ;;  %v825_v8 = vadd.f32 %v5391_v2, %v537_v37 }
  0xf0   : > { %1650 = vmatprep.subr.bf16.mxu1 %v1411_v27  ;;  %v1340_v52 = vsel %vm1212_vm14, %v1148_v25, %v1276_v44  ;;  %v1049_v31 = vmul.f32 %v5392_v62, %v4177_v32  ;;  %v523_v34 = vmul.f32 %v5393_v42, %v4179_v20  ;;  %v1356_v10 = vsel %vm1228_vm15, %v1164_v6, %v1292_v63  ;;  %v5401_v27 = vld [vmem:[#allocation37_spill] sm:$0xff]  ;;  %v5402_v44 = vld [vmem:[#allocation22_spill] sm:$0xff] }
  0xf1   : > { %v1150_v60 = vadd.f32 %v4358_v41, %v1062_v28  ;;  %v1166_v5 = vadd.f32 %v4366_v45, %v1078_v17  ;;  %v1097_v49 = vadd.f32 %v5394_v1, %v809_v22  ;;  %v1408_v14 = vpack.c.bf16 %v1356_v10, %v1340_v52  ;;  %v5403_v22 = vld [vmem:[#allocation27_spill] sm:$0xff] }
  0xf2   : > { %v1113_v16 = vadd.f32 %v1049_v31, %v825_v8  ;;  %v539_v47 = vmul.f32 %v5393_v42, %v4219_v39  ;;  %v763_v30 = vmul.f32 %v5396_v19, %v5395_v3  ;;  %v811_v51 = vadd.f32 %v5397_v46, %v523_v34 }
  0xf3   : > { %vm1214_vm0 = vcmp.gt.f32.partialorder %v1150_v60, 0.0  ;;  %vm1230_vm1 = vcmp.gt.f32.partialorder %v1166_v5, 0.0  ;;  %v1278_v54 = vmul.f32 0.01, %v1150_v60  ;;  %v1294_v59 = vmul.f32 0.01, %v1166_v5  ;;  %1598 = vmatpush1.bf16.msra.mxu0 %v1408_v14 }
  0xf4   : > { %v1185_v53 = vadd.f32 %v4323_v12, %v1097_v49  ;;  %v1201_v57 = vadd.f32 %v4273_v33, %v1113_v16  ;;  %v827_v36 = vadd.f32 %v763_v30, %v539_v47  ;;  %v1035_v7 = vmul.f32 %v5399_v21, %v5398_v4  ;;  %v5404_v49 = vld [vmem:[#allocation28_spill] sm:$0xff] }
  0xf5   : > { %v1342_v55 = vsel %vm1214_vm0, %v1150_v60, %v1278_v54  ;;  %v1358_v35 = vsel %vm1230_vm1, %v1166_v5, %v1294_v59  ;;  %v1051_v9 = vmul.f32 %v5399_v21, %v4177_v32  ;;  %v520_v40 = vmul.f32 %v5400_v26, %v4179_v20  ;;  %v5405_v54 = vld [vmem:[#allocation26_spill] sm:$0xff] }
  0xf6   : > { %v1410_v15 = vpack.c.bf16 %v1358_v35, %v1342_v55  ;;  %vm1249_vm2 = vcmp.gt.f32.partialorder %v1185_v53, 0.0  ;;  %vm1265_vm3 = vcmp.gt.f32.partialorder %v1201_v57, 0.0  ;;  %v1313_v25 = vmul.f32 0.01, %v1185_v53  ;;  %3394 = vmatmul.mubr.msk.bf16.vlgmr.msra.gmra.mxu0 %vm1470_vm11, %v4382_v13 }
  0xf7   : > { %v1329_v6 = vmul.f32 0.01, %v1201_v57  ;;  %v1099_v56 = vadd.f32 %v1035_v7, %v811_v51  ;;  %v1115_v23 = vadd.f32 %v1051_v9, %v827_v36  ;;  %v536_v37 = vmul.f32 %v5400_v26, %v4219_v39  ;;  %1625 = vmatprep.mubr.bf16.mxu0 %v5375_v29  ;;  %v5406_v36 = vld [vmem:[#allocation29_spill] sm:$0xff] }
  0xf8   : > { %1651 = vmatpush1.bf16.msra.mxu1 %v1410_v15  ;;  %v1377_v0 = vsel %vm1249_vm2, %v1185_v53, %v1313_v25  ;;  %v744_v63 = vmul.f32 %v5402_v44, %v5401_v27  ;;  %v760_v24 = vmul.f32 %v5402_v44, %v5395_v3  ;;  %v1032_v52 = vmul.f32 %v5403_v22, %v5398_v4 }
  0xf9   : > { %v1393_v28 = vsel %vm1265_vm3, %v1201_v57, %v1329_v6  ;;  %v1187_v17 = vadd.f32 %v4323_v12, %v1099_v56  ;;  %v1203_v58 = vadd.f32 %v4273_v33, %v1115_v23  ;;  %v1048_v34 = vmul.f32 %v5403_v22, %v4177_v32 }
  0xfa   : > { %v1429_v2 = vpack.c.bf16 %v1393_v28, %v1377_v0  ;;  %v808_v8 = vadd.f32 %v744_v63, %v520_v40  ;;  %v824_v31 = vadd.f32 %v760_v24, %v536_v37  ;;  %v522_v14 = vmul.f32 %v5404_v49, %v4179_v20  ;;  %v5407_v0 = vld [vmem:[#allocation19_spill] sm:$0xff] }
  0xfb   : > { %vm1251_vm4 = vcmp.gt.f32.partialorder %v1187_v17, 0.0  ;;  %vm1267_vm5 = vcmp.gt.f32.partialorder %v1203_v58, 0.0  ;;  %v1315_v10 = vmul.f32 0.01, %v1187_v17  ;;  %v1331_v60 = vmul.f32 0.01, %v1203_v58  ;;  %3396 = vmatmul.mubr.msk.bf16.vlgmr.msra.gmra.mxu1 %vm1470_vm11, %v4382_v13 }
  0xfc   : > { %1701 = vmatprep.subr.bf16.mxu0 %v1429_v2  ;;  %v1096_v5 = vadd.f32 %v1032_v52, %v808_v8  ;;  %v1112_v1 = vadd.f32 %v1048_v34, %v824_v31  ;;  %v538_v16 = vmul.f32 %v5404_v49, %v4219_v39  ;;  %v746_v59 = vmul.f32 %v5405_v54, %v5401_v27 }
  0xfd   : > { %v1379_v47 = vsel %vm1251_vm4, %v1187_v17, %v1315_v10  ;;  %v1395_v30 = vsel %vm1267_vm5, %v1203_v58, %v1331_v60  ;;  %v762_v53 = vmul.f32 %v5405_v54, %v5395_v3  ;;  %1678 = vmatprep.mubr.bf16.mxu1 %v5375_v29  ;;  %v1034_v55 = vmul.f32 %v5406_v36, %v5398_v4  ;;  %v5408_v17 = vld [vmem:[#allocation44_spill] sm:$0xff] }
  0xfe   : > { %v1431_v57 = vpack.c.bf16 %v1395_v30, %v1379_v47  ;;  %v1184_v46 = vadd.f32 %v4323_v12, %v1096_v5  ;;  %v1200_v51 = vadd.f32 %v4273_v33, %v1112_v1  ;;  %v810_v35 = vadd.f32 %v746_v59, %v522_v14  ;;  %3395 = vmatmul.mubr.msk.bf16.gmra.mxu0 %vm1470_vm11, %v4419_v11 }
  0xff   : > { %v826_v7 = vadd.f32 %v762_v53, %v538_v16  ;;  %v1050_v9 = vmul.f32 %v5406_v36, %v4177_v32  ;;  %v489_v15 = vmul.f32 %v5388_v48, %v5371_v38  ;;  %1721 = vmatprep.mubr.bf16.mxu0 %v5375_v29  ;;  %v505_v40 = vmul.f32 %v5388_v48, %v5376_v43 }
 0x100   : > { %1754 = vmatprep.subr.bf16.mxu1 %v1431_v57  ;;  %vm1248_vm6 = vcmp.gt.f32.partialorder %v1184_v46, 0.0  ;;  %vm1264_vm7 = vcmp.gt.f32.partialorder %v1200_v51, 0.0  ;;  %v1312_v25 = vmul.f32 0.01, %v1184_v46  ;;  %v1328_v6 = vmul.f32 0.01, %v1200_v51 }
 0x101   : > { %v1098_v56 = vadd.f32 %v1034_v55, %v810_v35  ;;  %v1114_v23 = vadd.f32 %v1050_v9, %v826_v7  ;;  %v713_v37 = vmul.f32 %v5407_v0, %v5377_v50  ;;  %v729_v28 = vmul.f32 %v5407_v0, %v4285_v61 }
 0x102   : > { %v1376_v63 = vsel %vm1248_vm6, %v1184_v46, %v1312_v25  ;;  %v1392_v24 = vsel %vm1264_vm7, %v1200_v51, %v1328_v6  ;;  %v1001_v58 = vmul.f32 %v5392_v62, %v5408_v17  ;;  %v1017_v34 = vmul.f32 %v5392_v62, %v4301_v18 }
 0x103   : > { %v1428_v52 = vpack.c.bf16 %v1392_v24, %v1376_v63  ;;  %v1186_v2 = vadd.f32 %v4323_v12, %v1098_v56  ;;  %v1202_v8 = vadd.f32 %v4273_v33, %v1114_v23  ;;  %v777_v31 = vadd.f32 %v713_v37, %v489_v15  ;;  %3397 = vmatmul.mubr.msk.bf16.gmra.mxu1 %vm1470_vm11, %v4419_v11 }
 0x104   : > { %v793_v48 = vadd.f32 %v729_v28, %v505_v40  ;;  %v491_v10 = vmul.f32 %v5393_v42, %v5371_v38  ;;  %v507_v60 = vmul.f32 %v5393_v42, %v5376_v43  ;;  %1774 = vmatprep.mubr.bf16.mxu1 %v5375_v29  ;;  %v715_v47 = vmul.f32 %v5396_v19, %v5377_v50 }
 0x105   : > { %1702 = vmatpush1.bf16.msra.mxu0 %v1428_v52  ;;  %vm1250_vm8 = vcmp.gt.f32.partialorder %v1186_v2, 0.0  ;;  %vm1266_vm9 = vcmp.gt.f32.partialorder %v1202_v8, 0.0  ;;  %v1314_v5 = vmul.f32 0.01, %v1186_v2  ;;  %v1330_v1 = vmul.f32 0.01, %v1202_v8 }
 0x106   : > { %v1065_v14 = vadd.f32 %v1001_v58, %v777_v31  ;;  %v1081_v16 = vadd.f32 %v1017_v34, %v793_v48  ;;  %v731_v62 = vmul.f32 %v5396_v19, %v4285_v61  ;;  %v1003_v42 = vmul.f32 %v5399_v21, %v5408_v17 }
 0x107   : > { %v1378_v30 = vsel %vm1250_vm8, %v1186_v2, %v1314_v5  ;;  %v1394_v59 = vsel %vm1266_vm9, %v1202_v8, %v1330_v1  ;;  %v1019_v53 = vmul.f32 %v5399_v21, %v4301_v18  ;;  %v779_v55 = vadd.f32 %v715_v47, %v491_v10 }
 0x108   : > { %v1430_v57 = vpack.c.bf16 %v1394_v59, %v1378_v30  ;;  %v1153_v46 = vadd.f32 %v4358_v41, %v1065_v14  ;;  %v1169_v51 = vadd.f32 %v4366_v45, %v1081_v16  ;;  %v795_v35 = vadd.f32 %v731_v62, %v507_v60 }
 0x109   : > { %v488_v7 = vmul.f32 %v5400_v26, %v5371_v38  ;;  %v504_v19 = vmul.f32 %v5400_v26, %v5376_v43  ;;  %v712_v9 = vmul.f32 %v5402_v44, %v5377_v50  ;;  %v1067_v25 = vadd.f32 %v1003_v42, %v779_v55  ;;  %v5409_v42 = vld [vmem:[#allocation30_spill] sm:$0xff] }
 0x10a   : > { %1755 = vmatpush1.bf16.msra.mxu1 %v1430_v57  ;;  %vm1217_vm10 = vcmp.gt.f32.partialorder %v1153_v46, 0.0  ;;  %vm1233_vm12 = vcmp.gt.f32.partialorder %v1169_v51, 0.0  ;;  %v1281_v21 = vmul.f32 0.01, %v1153_v46  ;;  %v1297_v15 = vmul.f32 0.01, %v1169_v51 }
 0x10b   : > { %v1083_v6 = vadd.f32 %v1019_v53, %v795_v35  ;;  %v728_v56 = vmul.f32 %v5402_v44, %v4285_v61  ;;  %v776_v23 = vadd.f32 %v712_v9, %v488_v7  ;;  %v1000_v37 = vmul.f32 %v5403_v22, %v5408_v17 }
 0x10c   : > { %v1345_v40 = vsel %vm1217_vm10, %v1153_v46, %v1281_v21  ;;  %v1361_v0 = vsel %vm1233_vm12, %v1169_v51, %v1297_v15  ;;  %v1016_v26 = vmul.f32 %v5403_v22, %v4301_v18  ;;  %v1155_v24 = vadd.f32 %v4358_v41, %v1067_v25  ;;  %v5410_v51 = vld [vmem:[#allocation31_spill] sm:$0xff] }
 0x10d   : > { %v1413_v63 = vpack.c.bf16 %v1361_v0, %v1345_v40  ;;  %v1171_v28 = vadd.f32 %v4366_v45, %v1083_v6  ;;  %v792_v58 = vadd.f32 %v728_v56, %v504_v19  ;;  %v1064_v52 = vadd.f32 %v1000_v37, %v776_v23  ;;  %v5411_v19 = vld [vmem:[#allocation33_spill] sm:$0xff]  ;;  %v5412_v6 = vld [vmem:[#allocation34_spill] sm:$0xff] }
 0x10e   : > { %v490_v2 = vmul.f32 %v5404_v49, %v5371_v38  ;;  %v506_v44 = vmul.f32 %v5404_v49, %v5376_v43  ;;  %v714_v8 = vmul.f32 %v5405_v54, %v5377_v50  ;;  %vm1219_vm13 = vcmp.gt.f32.partialorder %v1155_v24, 0.0 }
 0x10f   : > { %1703 = vmatprep.subr.bf16.mxu0 %v1413_v63  ;;  %vm1235_vm14 = vcmp.gt.f32.partialorder %v1171_v28, 0.0  ;;  %v1283_v22 = vmul.f32 0.01, %v1155_v24  ;;  %v1299_v31 = vmul.f32 0.01, %v1171_v28  ;;  %v1080_v48 = vadd.f32 %v1016_v26, %v792_v58 }
 0x110   : > { %v1152_v34 = vadd.f32 %v4358_v41, %v1064_v52  ;;  %v730_v10 = vmul.f32 %v5405_v54, %v4285_v61  ;;  %v778_v60 = vadd.f32 %v714_v8, %v490_v2  ;;  %v1002_v49 = vmul.f32 %v5406_v36, %v5408_v17 }
 0x111   : > { %v1347_v5 = vsel %vm1219_vm13, %v1155_v24, %v1283_v22  ;;  %v1363_v1 = vsel %vm1235_vm14, %v1171_v28, %v1299_v31  ;;  %v1018_v14 = vmul.f32 %v5406_v36, %v4301_v18  ;;  %v1168_v47 = vadd.f32 %v4366_v45, %v1080_v48  ;;  %v5413_v24 = vld [vmem:[#allocation32_spill] sm:$0xff]  ;;  %v5414_v31 = vld [vmem:[#allocation39_spill] sm:$0xff] }
 0x112   : > { %v1415_v16 = vpack.c.bf16 %v1363_v1, %v1347_v5  ;;  %vm1216_vm15 = vcmp.gt.f32.partialorder %v1152_v34, 0.0  ;;  %v1280_v62 = vmul.f32 0.01, %v1152_v34  ;;  %v794_v30 = vadd.f32 %v730_v10, %v506_v44  ;;  %v5415_v5 = vld [vmem:[#allocation40_spill] sm:$0xff] }
 0x113   : > { %v1066_v59 = vadd.f32 %v1002_v49, %v778_v60  ;;  %v525_v53 = vmul.f32 %v5409_v42, %v4179_v20  ;;  %v541_v54 = vmul.f32 %v5409_v42, %v4219_v39  ;;  %vm1232_vm0 = vcmp.gt.f32.partialorder %v1168_v47, 0.0 }
 0x114   : > { %1756 = vmatprep.subr.bf16.mxu1 %v1415_v16  ;;  %v1296_v57 = vmul.f32 0.01, %v1168_v47  ;;  %v1344_v46 = vsel %vm1216_vm15, %v1152_v34, %v1280_v62  ;;  %v749_v36 = vmul.f32 %v5410_v51, %v5401_v27  ;;  %v1082_v55 = vadd.f32 %v1018_v14, %v794_v30 }
 0x115   : > { %v1154_v35 = vadd.f32 %v4358_v41, %v1066_v59  ;;  %v765_v7 = vmul.f32 %v5410_v51, %v5395_v3  ;;  %v1037_v9 = vmul.f32 %v5411_v19, %v5398_v4  ;;  %v1053_v25 = vmul.f32 %v5411_v19, %v4177_v32  ;;  %v5416_v59 = vld [vmem:[#allocation35_spill] sm:$0xff] }
 0x116   : > { %v1360_v21 = vsel %vm1232_vm0, %v1168_v47, %v1296_v57  ;;  %v813_v15 = vadd.f32 %v749_v36, %v525_v53  ;;  %v527_v56 = vmul.f32 %v5412_v6, %v4179_v20  ;;  %v1170_v40 = vadd.f32 %v4366_v45, %v1082_v55 }
 0x117   : > { %v1412_v23 = vpack.c.bf16 %v1360_v21, %v1344_v46  ;;  %vm1218_vm1 = vcmp.gt.f32.partialorder %v1154_v35, 0.0  ;;  %v1282_v0 = vmul.f32 0.01, %v1154_v35  ;;  %v829_v37 = vadd.f32 %v765_v7, %v541_v54  ;;  %v5417_v7 = vld [vmem:[#allocation41_spill] sm:$0xff] }
 0x118   : > { %v1101_v26 = vadd.f32 %v1037_v9, %v813_v15  ;;  %v543_v63 = vmul.f32 %v5412_v6, %v4219_v39  ;;  %v751_v28 = vmul.f32 %v5413_v24, %v5401_v27  ;;  %vm1234_vm2 = vcmp.gt.f32.partialorder %v1170_v40, 0.0 }
 0x119   : > { %1704 = vmatpush1.bf16.msra.mxu0 %v1412_v23  ;;  %v1298_v58 = vmul.f32 0.01, %v1170_v40  ;;  %v1346_v52 = vsel %vm1218_vm1, %v1154_v35, %v1282_v0  ;;  %v767_v2 = vmul.f32 %v5413_v24, %v5395_v3  ;;  %v1117_v44 = vadd.f32 %v1053_v25, %v829_v37 }
 0x11a   : > { %v1189_v8 = vadd.f32 %v4323_v12, %v1101_v26  ;;  %v815_v22 = vadd.f32 %v751_v28, %v527_v56  ;;  %v1039_v48 = vmul.f32 %v5414_v31, %v5398_v4  ;;  %v1055_v60 = vmul.f32 %v5414_v31, %v4177_v32  ;;  %v5418_v56 = vld [vmem:[#allocation42_spill] sm:$0xff] }
 0x11b   : > { %v1362_v34 = vsel %vm1234_vm2, %v1170_v40, %v1298_v58  ;;  %v831_v10 = vadd.f32 %v767_v2, %v543_v63  ;;  %v524_v1 = vmul.f32 %v5415_v5, %v4179_v20  ;;  %v1205_v14 = vadd.f32 %v4273_v33, %v1117_v44  ;;  %v3589_v44 = vld [vmem:[%s3855_s17 + $0x38] sm:$0x77]  ;;  %s3622_s17 = scalar_lea.vmem %s3621_s28, 2048 }
 0x11c   : > { %v1414_v49 = vpack.c.bf16 %v1362_v34, %v1346_v52  ;;  %vm1253_vm3 = vcmp.gt.f32.partialorder %v1189_v8, 0.0  ;;  %v1317_v16 = vmul.f32 0.01, %v1189_v8  ;;  %3398 = vmatmul.mubr.msk.bf16.vlgmr.msra.gmra.mxu0 %vm1470_vm11, %v4382_v13  ;;  %v1103_v47 = vadd.f32 %v1039_v48, %v815_v22  ;;  %v5419_v52 = vld [vmem:[#allocation36_spill] sm:$0xff]  ;;  %p3624_p12 = scmp.lt.s32.totalorder %s3622_s17, %s3616_s15 }
 0x11d   : > { %v1119_v62 = vadd.f32 %v1055_v60, %v831_v10  ;;  %v540_v30 = vmul.f32 %v5415_v5, %v4219_v39  ;;  %v748_v53 = vmul.f32 %v5416_v59, %v5401_v27  ;;  %1731 = vmatprep.mubr.bf16.mxu0 %v5375_v29  ;;  %vm1269_vm4 = vcmp.gt.f32.partialorder %v1205_v14, 0.0 }
 0x11e   : > { %1757 = vmatpush1.bf16.msra.mxu1 %v1414_v49  ;;  %v1333_v54 = vmul.f32 0.01, %v1205_v14  ;;  %v1381_v57 = vsel %vm1253_vm3, %v1189_v8, %v1317_v16  ;;  %v764_v46 = vmul.f32 %v5416_v59, %v5395_v3  ;;  %v1191_v36 = vadd.f32 %v4323_v12, %v1103_v47  ;;  %v5420_v8 = vld [vmem:[#allocation8_spill] sm:$0xff]  ;;  %p3625_p13 = por %p3624_p12, %p3623_p11 }
 0x11f   : > { %v1207_v55 = vadd.f32 %v4273_v33, %v1119_v62  ;;  %v812_v35 = vadd.f32 %v748_v53, %v524_v1  ;;  %v1036_v9 = vmul.f32 %v5417_v7, %v5398_v4  ;;  %v1052_v25 = vmul.f32 %v5417_v7, %v4177_v32 }
 0x120   : > { %v1397_v21 = vsel %vm1269_vm4, %v1205_v14, %v1333_v54  ;;  %v828_v15 = vadd.f32 %v764_v46, %v540_v30  ;;  %v526_v23 = vmul.f32 %v5418_v56, %v4179_v20  ;;  %vm1255_vm5 = vcmp.gt.f32.partialorder %v1191_v36, 0.0  ;;  %p3626_p0 = pnand %p3625_p13, %p3619_p10 }
 0x121   : > { %v1433_v40 = vpack.c.bf16 %v1397_v21, %v1381_v57  ;;  %vm1271_vm6 = vcmp.gt.f32.partialorder %v1207_v55, 0.0  ;;  %v1319_v0 = vmul.f32 0.01, %v1191_v36  ;;  %3400 = vmatmul.mubr.msk.bf16.vlgmr.msra.gmra.mxu1 %vm1470_vm11, %v4382_v13  ;;  %v1335_v37 = vmul.f32 0.01, %v1207_v55 }
 0x122   : > { %v1100_v26 = vadd.f32 %v1036_v9, %v812_v35  ;;  %v1116_v63 = vadd.f32 %v1052_v25, %v828_v15  ;;  %v542_v28 = vmul.f32 %v5418_v56, %v4219_v39  ;;  %1784 = vmatprep.mubr.bf16.mxu1 %v5375_v29  ;;  %v750_v20 = vmul.f32 %v5419_v52, %v5401_v27 }
 0x123   : > { %1807 = vmatprep.subr.bf16.mxu0 %v1433_v40  ;;  %v1383_v58 = vsel %vm1255_vm5, %v1191_v36, %v1319_v0  ;;  %v766_v2 = vmul.f32 %v5419_v52, %v5395_v3  ;;  %v907_v22 = vrot.slane %v3589_v44, %v5420_v8  ;;  %v1399_v48 = vsel %vm1271_vm6, %v1207_v55, %v1335_v37 }
 0x124   : > { %v1188_v34 = vadd.f32 %v4323_v12, %v1100_v26  ;;  %v1204_v10 = vadd.f32 %v4273_v33, %v1116_v63  ;;  %v493_v39 = vmul.f32 %v5409_v42, %v5371_v38  ;;  %3399 = vmatmul.mubr.msk.bf16.gmra.mxu0 %vm1470_vm11, %v4419_v11  ;;  %v1435_v60 = vpack.c.bf16 %v1399_v48, %v1383_v58 }
 0x125   : > { %v814_v1 = vadd.f32 %v750_v20, %v526_v23  ;;  %v830_v27 = vadd.f32 %v766_v2, %v542_v28  ;;  %v4658_v49 = vrot.slane %v907_v22, %v5420_v8  ;;  %1827 = vmatprep.mubr.bf16.mxu0 %v5375_v29  ;;  %v509_v62 = vmul.f32 %v5409_v42, %v5376_v43 }
 0x126   : > { %vm1252_vm7 = vcmp.gt.f32.partialorder %v1188_v34, 0.0  ;;  %vm1268_vm8 = vcmp.gt.f32.partialorder %v1204_v10, 0.0  ;;  %v1316_v3 = vmul.f32 0.01, %v1188_v34  ;;  %v1332_v14 = vmul.f32 0.01, %v1204_v10  ;;  %1860 = vmatprep.subr.bf16.mxu1 %v1435_v60 }
 0x127   : > { %v1038_v16 = vmul.f32 %v4658_v49, %v5398_v4  ;;  %v1054_v47 = vmul.f32 %v4658_v49, %v4177_v32  ;;  %v717_v30 = vmul.f32 %v5410_v51, %v5377_v50  ;;  %v733_v57 = vmul.f32 %v5410_v51, %v4285_v61 }
 0x128   : > { %v1380_v53 = vsel %vm1252_vm7, %v1188_v34, %v1316_v3  ;;  %v1396_v54 = vsel %vm1268_vm8, %v1204_v10, %v1332_v14  ;;  %v1005_v46 = vmul.f32 %v5411_v19, %v5408_v17  ;;  %v1021_v42 = vmul.f32 %v5411_v19, %v4301_v18 }
 0x129   : > { %v1432_v36 = vpack.c.bf16 %v1396_v54, %v1380_v53  ;;  %v1102_v55 = vadd.f32 %v1038_v16, %v814_v1  ;;  %v1118_v4 = vadd.f32 %v1054_v47, %v830_v27  ;;  %v781_v35 = vadd.f32 %v717_v30, %v493_v39  ;;  %3401 = vmatmul.mubr.msk.bf16.gmra.mxu1 %vm1470_vm11, %v4419_v11 }
 0x12a   : > { %v797_v32 = vadd.f32 %v733_v57, %v509_v62  ;;  %v495_v9 = vmul.f32 %v5412_v6, %v5371_v38  ;;  %v511_v51 = vmul.f32 %v5412_v6, %v5376_v43  ;;  %1880 = vmatprep.mubr.bf16.mxu1 %v5375_v29  ;;  %v719_v23 = vmul.f32 %v5413_v24, %v5377_v50 }
 0x12b   : > { %1808 = vmatpush1.bf16.msra.mxu0 %v1432_v36  ;;  %v1190_v21 = vadd.f32 %v4323_v12, %v1102_v55  ;;  %v1206_v15 = vadd.f32 %v4273_v33, %v1118_v4  ;;  %v1069_v25 = vadd.f32 %v1005_v46, %v781_v35  ;;  %v735_v19 = vmul.f32 %v5413_v24, %v4285_v61 }
 0x12c   : > { %v1085_v40 = vadd.f32 %v1021_v42, %v797_v32  ;;  %v1007_v0 = vmul.f32 %v5414_v31, %v5408_v17  ;;  %v1023_v6 = vmul.f32 %v5414_v31, %v4301_v18  ;;  %v783_v63 = vadd.f32 %v719_v23, %v495_v9 }
 0x12d   : > { %vm1254_vm9 = vcmp.gt.f32.partialorder %v1190_v21, 0.0  ;;  %vm1270_vm10 = vcmp.gt.f32.partialorder %v1206_v15, 0.0  ;;  %v1318_v37 = vmul.f32 0.01, %v1190_v21  ;;  %v1334_v12 = vmul.f32 0.01, %v1206_v15 }
 0x12e   : > { %v1157_v33 = vadd.f32 %v4358_v41, %v1069_v25  ;;  %v1173_v26 = vadd.f32 %v4366_v45, %v1085_v40  ;;  %v799_v28 = vadd.f32 %v735_v19, %v511_v51  ;;  %v492_v24 = vmul.f32 %v5415_v5, %v5371_v38 }
 0x12f   : > { %v1382_v58 = vsel %vm1254_vm9, %v1190_v21, %v1318_v37  ;;  %v1398_v20 = vsel %vm1270_vm10, %v1206_v15, %v1334_v12  ;;  %v508_v2 = vmul.f32 %v5415_v5, %v5376_v43  ;;  %v1071_v22 = vadd.f32 %v1007_v0, %v783_v63 }
 0x130   : > { %v1434_v44 = vpack.c.bf16 %v1398_v20, %v1382_v58  ;;  %vm1221_vm12 = vcmp.gt.f32.partialorder %v1157_v33, 0.0  ;;  %vm1237_vm13 = vcmp.gt.f32.partialorder %v1173_v26, 0.0  ;;  %v1285_v31 = vmul.f32 0.01, %v1157_v33 }
 0x131   : > { %v1301_v8 = vmul.f32 0.01, %v1173_v26  ;;  %v1087_v48 = vadd.f32 %v1023_v6, %v799_v28  ;;  %v716_v34 = vmul.f32 %v5416_v59, %v5377_v50  ;;  %v732_v39 = vmul.f32 %v5416_v59, %v4285_v61 }
 0x132   : > { %1861 = vmatpush1.bf16.msra.mxu1 %v1434_v44  ;;  %v1349_v10 = vsel %vm1221_vm12, %v1157_v33, %v1285_v31  ;;  %v1004_v60 = vmul.f32 %v5417_v7, %v5408_v17  ;;  %v1020_v5 = vmul.f32 %v5417_v7, %v4301_v18  ;;  %v1159_v27 = vadd.f32 %v4358_v41, %v1071_v22 }
 0x133   : > { %v1365_v1 = vsel %vm1237_vm13, %v1173_v26, %v1301_v8  ;;  %v1175_v3 = vadd.f32 %v4366_v45, %v1087_v48  ;;  %v780_v14 = vadd.f32 %v716_v34, %v492_v24  ;;  %v796_v47 = vadd.f32 %v732_v39, %v508_v2 }
 0x134   : > { %v1417_v16 = vpack.c.bf16 %v1365_v1, %v1349_v10  ;;  %v494_v62 = vmul.f32 %v5418_v56, %v5371_v38  ;;  %v510_v59 = vmul.f32 %v5418_v56, %v5376_v43  ;;  %vm1223_vm14 = vcmp.gt.f32.partialorder %v1159_v27, 0.0 }
 0x135   : > { %vm1239_vm15 = vcmp.gt.f32.partialorder %v1175_v3, 0.0  ;;  %v1287_v30 = vmul.f32 0.01, %v1159_v27  ;;  %v1303_v53 = vmul.f32 0.01, %v1175_v3  ;;  %v1068_v7 = vadd.f32 %v1004_v60, %v780_v14 }
 0x136   : > { %1809 = vmatprep.subr.bf16.mxu0 %v1417_v16  ;;  %v1084_v54 = vadd.f32 %v1020_v5, %v796_v47  ;;  %v718_v57 = vmul.f32 %v5419_v52, %v5377_v50  ;;  %v734_v46 = vmul.f32 %v5419_v52, %v4285_v61  ;;  %v1022_v38 = vmul.f32 %v4658_v49, %v4301_v18 }
 0x137   : > { %v1351_v36 = vsel %vm1223_vm14, %v1159_v27, %v1287_v30  ;;  %v1367_v55 = vsel %vm1239_vm15, %v1175_v3, %v1303_v53  ;;  %v1156_v43 = vadd.f32 %v4358_v41, %v1068_v7  ;;  %v1006_v42 = vmul.f32 %v4658_v49, %v5408_v17 }
 0x138   : > { %v1419_v4 = vpack.c.bf16 %v1367_v55, %v1351_v36  ;;  %v1172_v56 = vadd.f32 %v4366_v45, %v1084_v54  ;;  %v782_v35 = vadd.f32 %v718_v57, %v494_v62  ;;  %v798_v32 = vadd.f32 %v734_v46, %v510_v59 }
 0x139   : > { %vm1220_vm0 = vcmp.gt.f32.partialorder %v1156_v43, 0.0  ;;  %v1284_v50 = vmul.f32 0.01, %v1156_v43 }
 0x13a   : > { %1862 = vmatprep.subr.bf16.mxu1 %v1419_v4  ;;  %vm1236_vm1 = vcmp.gt.f32.partialorder %v1172_v56, 0.0  ;;  %v1300_v61 = vmul.f32 0.01, %v1172_v56  ;;  %v1070_v52 = vadd.f32 %v1006_v42, %v782_v35  ;;  %v1086_v9 = vadd.f32 %v1022_v38, %v798_v32 }
 0x13b   : > { %v1348_v51 = vsel %vm1220_vm0, %v1156_v43, %v1284_v50 }
 0x13c   : > { %v1364_v21 = vsel %vm1236_vm1, %v1172_v56, %v1300_v61  ;;  %v1158_v15 = vadd.f32 %v4358_v41, %v1070_v52  ;;  %v1174_v25 = vadd.f32 %v4366_v45, %v1086_v9  ;;  %v4736_v41 = vpop.permute.xlu0 %1452  ;;  %v4738_v45 = vpop.permute.xlu1 %1457 }
 0x13d   : > { %v1416_v18 = vpack.c.bf16 %v1364_v21, %v1348_v51 }
 0x13e   : > { %vm1222_vm2 = vcmp.gt.f32.partialorder %v1158_v15, 0.0  ;;  %vm1238_vm3 = vcmp.gt.f32.partialorder %v1174_v25, 0.0  ;;  %v1286_v23 = vmul.f32 0.01, %v1158_v15  ;;  %v1302_v40 = vmul.f32 0.01, %v1174_v25 }
 0x13f   : > { %1810 = vmatpush1.bf16.msra.mxu0 %v1416_v18 }
 0x140   : > { %v1350_v17 = vsel %vm1222_vm2, %v1158_v15, %v1286_v23  ;;  %v1366_v49 = vsel %vm1238_vm3, %v1174_v25, %v1302_v40  ;;  %v4740_v37 = vpop.permute.xlu0 %1442  ;;  %v4743_v26 = vpop.permute.xlu1 %1447 }
 0x141   : > { %v1418_v19 = vpack.c.bf16 %v1366_v49, %v1350_v17 }
 0x142   : > { %3402 = vmatmul.mubr.msk.bf16.vlgmr.msra.gmra.mxu0 %vm1470_vm11, %v4382_v13 }
 0x143   : > { %1837 = vmatprep.mubr.bf16.mxu0 %v5375_v29  ;;  %1863 = vmatpush1.bf16.msra.mxu1 %v1418_v19 }
 0x146   : > { %3404 = vmatmul.mubr.msk.bf16.vlgmr.msra.gmra.mxu1 %vm1470_vm11, %v4382_v13 }
 0x147   : > { %1890 = vmatprep.mubr.bf16.mxu1 %v5375_v29 }
 0x14a   : > { %3403 = vmatmul.mubr.msk.bf16.gmra.mxu0 %vm1470_vm11, %v4419_v11 }
 0x14b   : > { %2203 = vmatprep.mubr.bf16.mxu0 %v5375_v29 }
 0x14e   : > { %3405 = vmatmul.mubr.msk.bf16.gmra.mxu1 %vm1470_vm11, %v4419_v11 }
 0x14f   : > { %2256 = vmatprep.mubr.bf16.mxu1 %v5375_v29 }
 0x199   : > { %v1511_v0 = vpop.f32.mrf.mxu0 }
 0x19a   : > { %v4746_v28 = vadd.f32 %v1511_v0, %v4740_v37 }
 0x19b   : > { %v1513_v6 = vpop.f32.mrf.mxu0 }
 0x19c   : > { %v1564_v13 = vpop.f32.mrf.mxu1  ;;  %v1514_v12 = vadd.f32 %v1513_v6, %v4740_v37  ;;  %v4755_v48 = vmul.f32 0.01, %v4746_v28  ;;  %vm1901_vm7 = vcmp.gt.f32.partialorder %v4746_v28, 0.0 }
 0x19d   : > { %v1515_v33 = vpop.f32.mrf.mxu0  ;;  %v4758_v34 = vadd.f32 %v1564_v13, %v4740_v37 }
 0x19e   : > { %v1566_v63 = vpop.f32.mrf.mxu1  ;;  %v1516_v11 = vadd.f32 %v1515_v33, %v4743_v26  ;;  %v1966_v2 = vmul.f32 0.01, %v1514_v12  ;;  %vm1902_vm4 = vcmp.gt.f32.partialorder %v1514_v12, 0.0 }
 0x19f   : > { %v1517_v58 = vpop.f32.mrf.mxu0  ;;  %v4751_v31 = vadd.f32 %v1566_v63, %v4740_v37  ;;  %v1967_v13 = vmul.f32 0.01, %v4758_v34  ;;  %v2029_v63 = vsel %vm1901_vm7, %v4746_v28, %v4755_v48 }
 0x1a0   : > { %v1568_v20 = vpop.f32.mrf.mxu1  ;;  %v1518_v24 = vadd.f32 %v1517_v58, %v4743_v26  ;;  %v1981_v10 = vmul.f32 0.01, %v1516_v11  ;;  %vm1917_vm5 = vcmp.gt.f32.partialorder %v1516_v11, 0.0  ;;  %v2030_v47 = vsel %vm1902_vm4, %v1514_v12, %v1966_v2 }
 0x1a1   : > { %v1521_v44 = vpop.f32.mrf.mxu0  ;;  %vm1904_vm8 = vcmp.gt.f32.partialorder %v4751_v31, 0.0  ;;  %v1968_v62 = vmul.f32 0.01, %v4751_v31  ;;  %v1569_v59 = vadd.f32 %v1568_v20, %v4743_v26  ;;  %vm1903_vm4 = vcmp.gt.f32.partialorder %v4758_v34, 0.0 }
 0x1a2   : > { %v1570_v8 = vpop.f32.mrf.mxu1  ;;  %v1522_v22 = vadd.f32 %v1521_v44, %v4736_v41  ;;  %v1982_v60 = vmul.f32 0.01, %v1518_v24  ;;  %vm1918_vm6 = vcmp.gt.f32.partialorder %v1518_v24, 0.0  ;;  %v2045_v53 = vsel %vm1917_vm5, %v1516_v11, %v1981_v10  ;;  %v4788_v44 = vld [vmem:[#allocation2 + $0x10] sm:$0xff]  }
 0x1a3   : > { %v1523_v39 = vpop.f32.mrf.mxu0  ;;  %v1571_v5 = vadd.f32 %v1570_v8, %v4743_v26  ;;  %vm1919_vm3 = vcmp.gt.f32.partialorder %v1569_v59, 0.0  ;;  %v1983_v23 = vmul.f32 0.01, %v1569_v59  ;;  %v2032_v58 = vsel %vm1904_vm8, %v4751_v31, %v1968_v62 }
 0x1a4   : > { %v1574_v1 = vpop.f32.mrf.mxu1  ;;  %v1524_v27 = vadd.f32 %v1523_v39, %v4736_v41  ;;  %v1997_v3 = vmul.f32 0.01, %v1522_v22  ;;  %vm1933_vm9 = vcmp.gt.f32.partialorder %v1522_v22, 0.0  ;;  %v2046_v38 = vsel %vm1918_vm6, %v1518_v24, %v1982_v60  ;;  %v4797_v39 = vld [vmem:[#allocation2 + $0x18] sm:$0xff]  }
 0x1a5   : > { %v1575_v14 = vadd.f32 %v1574_v1, %v4736_v41  ;;  %v1525_v16 = vpop.f32.mrf.mxu0  ;;  %vm1920_vm10 = vcmp.gt.f32.partialorder %v1571_v5, 0.0  ;;  %v1984_v4 = vmul.f32 0.01, %v1571_v5  ;;  %v2099_v0 = vpack.c.bf16 %v2046_v38, %v2030_v47 }
 0x1a6   : > { %v1576_v30 = vpop.f32.mrf.mxu1  ;;  %v1998_v7 = vmul.f32 0.01, %v1524_v27  ;;  %v1526_v57 = vadd.f32 %v1525_v16, %v4738_v45  ;;  %vm1934_vm12 = vcmp.gt.f32.partialorder %v1524_v27, 0.0  ;;  %v2061_v43 = vsel %vm1933_vm9, %v1522_v22, %v1997_v3 }
 0x1a7   : > { %v1577_v54 = vadd.f32 %v1576_v30, %v4736_v41  ;;  %v1527_v46 = vpop.f32.mrf.mxu0  ;;  %v1999_v56 = vmul.f32 0.01, %v1575_v14  ;;  %vm1935_vm1 = vcmp.gt.f32.partialorder %v1575_v14, 0.0  ;;  %v2048_v6 = vsel %vm1920_vm10, %v1571_v5, %v1984_v4 }
 0x1a8   : > { %v1578_v36 = vpop.f32.mrf.mxu1  ;;  %v1528_v55 = vadd.f32 %v1527_v46, %v4738_v45  ;;  %vm1949_vm13 = vcmp.gt.f32.partialorder %v1526_v57, 0.0  ;;  %v2013_v35 = vmul.f32 0.01, %v1526_v57  ;;  %v2062_v9 = vsel %vm1934_vm12, %v1524_v27, %v1998_v7 }
 0x1a9   : > { %v1579_v32 = vadd.f32 %v1578_v36, %v4738_v45  ;;  %vm1936_vm15 = vcmp.gt.f32.partialorder %v1577_v54, 0.0  ;;  %v2000_v61 = vmul.f32 0.01, %v1577_v54  ;;  %v2063_v12 = vsel %vm1935_vm1, %v1575_v14, %v1999_v56 }
 0x1aa   : > { %vm1950_vm14 = vcmp.gt.f32.partialorder %v1528_v55, 0.0  ;;  %v2014_v42 = vmul.f32 0.01, %v1528_v55  ;;  %v1580_v50 = vpop.f32.mrf.mxu1  ;;  %v2077_v51 = vsel %vm1949_vm13, %v1526_v57, %v2013_v35  ;;  %v2098_v20 = vpack.c.bf16 %v2045_v53, %v2029_v63 }
 0x1ab   : > { %v1581_v52 = vadd.f32 %v1580_v50, %v4738_v45  ;;  %vm1951_vm0 = vcmp.gt.f32.partialorder %v1579_v32, 0.0  ;;  %v2015_v21 = vmul.f32 0.01, %v1579_v32  ;;  %v2114_v40 = vpack.c.bf16 %v2077_v51, %v2061_v43 }
 0x1ac   : > { %v2078_v18 = vsel %vm1950_vm14, %v1528_v55, %v2014_v42  ;;  %v2064_v49 = vsel %vm1936_vm15, %v1577_v54, %v2000_v61  ;;  %v2047_v24 = vsel %vm1919_vm3, %v1569_v59, %v1983_v23  ;;  %v2101_v2 = vpack.c.bf16 %v2048_v6, %v2032_v58 }
 0x1ad   : > { %vm1952_vm2 = vcmp.gt.f32.partialorder %v1581_v52, 0.0  ;;  %v2016_v15 = vmul.f32 0.01, %v1581_v52  ;;  %v2115_v25 = vpack.c.bf16 %v2078_v18, %v2062_v9  ;;  %v2079_v17 = vsel %vm1951_vm0, %v1579_v32, %v2015_v21 }
 0x1ae   : > { %v2116_v11 = vpack.c.bf16 %v2079_v17, %v2063_v12  ;;  %v2031_v8 = vsel %vm1903_vm4, %v4758_v34, %v1967_v13 }
 0x1af   : > { %2183 = vmatprep.subr.bf16.mxu0 %v2115_v25  ;;  %v2080_v19 = vsel %vm1952_vm2, %v1581_v52, %v2016_v15  ;;  %v2100_v28 = vpack.c.bf16 %v2047_v24, %v2031_v8 }
 0x1b0   : > { %v2117_v33 = vpack.c.bf16 %v2080_v19, %v2064_v49  ;;  %2184 = vmatpush1.bf16.msra.mxu0 %v2114_v40 }
 0x1b1   : > { %2185 = vmatprep.subr.bf16.mxu0 %v2099_v0 }
 0x1b2   : > { %2236 = vmatprep.subr.bf16.mxu1 %v2117_v33 }
 0x1b3   : > { %2237 = vmatpush1.bf16.msra.mxu1 %v2116_v11 }
 0x1b4   : > { %2238 = vmatprep.subr.bf16.mxu1 %v2101_v2  ;;  %2186 = vmatpush1.bf16.msra.mxu0 %v2098_v20 }
 0x1b6   : > { %v1617_v22 = vpop.f32.mrf.mxu0 }
 0x1b7   : > { %2239 = vmatpush1.bf16.msra.mxu1 %v2100_v28  ;;  %3412 = vmatmul.mubr.msk.bf16.vlgmr.msra.gmra.mxu0 %vm1470_vm11, %v4788_v44  ;;  %v4801_v1 = vadd.f32 %v1617_v22, %v4740_v37 }
 0x1b8   : > { %2213 = vmatprep.mubr.bf16.mxu0 %v5375_v29  ;;  %v1619_v31 = vpop.f32.mrf.mxu0 }
 0x1b9   : > { %v1620_v34 = vadd.f32 %v1619_v31, %v4740_v37  ;;  %v4813_v7 = vmul.f32 0.01, %v4801_v1  ;;  %vm1905_vm8 = vcmp.gt.f32.partialorder %v4801_v1, 0.0 }
 0x1ba   : > { %3414 = vmatmul.mubr.msk.bf16.vlgmr.msra.gmra.mxu1 %vm1470_vm11, %v4788_v44  ;;  %v1621_v10 = vpop.f32.mrf.mxu0 }
 0x1bb   : > { %v1670_v48 = vpop.f32.mrf.mxu1  ;;  %2266 = vmatprep.mubr.bf16.mxu1 %v5375_v29  ;;  %v1622_v27 = vadd.f32 %v1621_v10, %v4743_v26  ;;  %v1970_v47 = vmul.f32 0.01, %v1620_v34  ;;  %vm1906_vm5 = vcmp.gt.f32.partialorder %v1620_v34, 0.0 }
 0x1bc   : > { %v1623_v5 = vpop.f32.mrf.mxu0  ;;  %v4816_v54 = vadd.f32 %v1670_v48, %v4740_v37 }
 0x1bd   : > { %v1672_v60 = vpop.f32.mrf.mxu1  ;;  %v1624_v14 = vadd.f32 %v1623_v5, %v4743_v26  ;;  %v1985_v57 = vmul.f32 0.01, %v1622_v27  ;;  %vm1921_vm6 = vcmp.gt.f32.partialorder %v1622_v27, 0.0  ;;  %v2034_v35 = vsel %vm1906_vm5, %v1620_v34, %v1970_v47 }
 0x1be   : > { %v1627_v16 = vpop.f32.mrf.mxu0  ;;  %v4809_v62 = vadd.f32 %v1672_v60, %v4740_v37  ;;  %v1971_v34 = vmul.f32 0.01, %v4816_v54  ;;  %vm1907_vm5 = vcmp.gt.f32.partialorder %v4816_v54, 0.0 }
 0x1bf   : > { %v1674_v3 = vpop.f32.mrf.mxu1  ;;  %3413 = vmatmul.mubr.msk.bf16.gmra.mxu0 %vm1470_vm11, %v4797_v39  ;;  %v1628_v30 = vadd.f32 %v1627_v16, %v4736_v41  ;;  %v1986_v46 = vmul.f32 0.01, %v1624_v14  ;;  %vm1922_vm7 = vcmp.gt.f32.partialorder %v1624_v14, 0.0  ;;  %v2049_v52 = vsel %vm1921_vm6, %v1622_v27, %v1985_v57 }
 0x1c0   : > { %2309 = vmatprep.mubr.bf16.mxu0 %v5375_v29  ;;  %v1629_v53 = vpop.f32.mrf.mxu0  ;;  %vm1908_vm9 = vcmp.gt.f32.partialorder %v4809_v62, 0.0  ;;  %v1972_v32 = vmul.f32 0.01, %v4809_v62  ;;  %v1675_v42 = vadd.f32 %v1674_v3, %v4743_v26  ;;  %v2033_v27 = vsel %vm1905_vm8, %v4801_v1, %v4813_v7 }
 0x1c1   : > { %v1676_v59 = vpop.f32.mrf.mxu1  ;;  %v1630_v38 = vadd.f32 %v1629_v53, %v4736_v41  ;;  %v2001_v43 = vmul.f32 0.01, %v1628_v30  ;;  %vm1937_vm10 = vcmp.gt.f32.partialorder %v1628_v30, 0.0  ;;  %v2050_v25 = vsel %vm1922_vm7, %v1624_v14, %v1986_v46 }
 0x1c2   : > { %3415 = vmatmul.mubr.msk.bf16.gmra.mxu1 %vm1470_vm11, %v4797_v39  ;;  %v1677_v36 = vadd.f32 %v1676_v59, %v4743_v26  ;;  %v1631_v4 = vpop.f32.mrf.mxu0  ;;  %vm1923_vm4 = vcmp.gt.f32.partialorder %v1675_v42, 0.0  ;;  %v1987_v2 = vmul.f32 0.01, %v1675_v42  ;;  %v2103_v48 = vpack.c.bf16 %v2050_v25, %v2034_v35 }
 0x1c3   : > { %v1680_v55 = vpop.f32.mrf.mxu1  ;;  %2362 = vmatprep.mubr.bf16.mxu1 %v5375_v29  ;;  %v2002_v9 = vmul.f32 0.01, %v1630_v38  ;;  %v1632_v21 = vadd.f32 %v1631_v4, %v4738_v45  ;;  %vm1938_vm13 = vcmp.gt.f32.partialorder %v1630_v38, 0.0  ;;  %v2065_v40 = vsel %vm1937_vm10, %v1628_v30, %v2001_v43 }
 0x1c4   : > { %v1681_v56 = vadd.f32 %v1680_v55, %v4736_v41  ;;  %v1633_v61 = vpop.f32.mrf.mxu0  ;;  %vm1924_vm12 = vcmp.gt.f32.partialorder %v1677_v36, 0.0  ;;  %v1988_v23 = vmul.f32 0.01, %v1677_v36  ;;  %v2036_v14 = vsel %vm1908_vm9, %v4809_v62, %v1972_v32 }
 0x1c5   : > { %v1682_v50 = vpop.f32.mrf.mxu1  ;;  %v1634_v15 = vadd.f32 %v1633_v61, %v4738_v45  ;;  %vm1953_vm14 = vcmp.gt.f32.partialorder %v1632_v21, 0.0  ;;  %v2017_v49 = vmul.f32 0.01, %v1632_v21  ;;  %v2066_v33 = vsel %vm1938_vm13, %v1630_v38, %v2002_v9 }
 0x1c6   : > { %v1683_v51 = vadd.f32 %v1682_v50, %v4736_v41  ;;  %v2003_v17 = vmul.f32 0.01, %v1681_v56  ;;  %vm1939_vm2 = vcmp.gt.f32.partialorder %v1681_v56, 0.0  ;;  %v2052_v10 = vsel %vm1924_vm12, %v1677_v36, %v1988_v23 }
 0x1c7   : > { %v1684_v18 = vpop.f32.mrf.mxu1  ;;  %vm1954_vm15 = vcmp.gt.f32.partialorder %v1634_v15, 0.0  ;;  %v2018_v0 = vmul.f32 0.01, %v1634_v15  ;;  %v2081_v63 = vsel %vm1953_vm14, %v1632_v21, %v2017_v49  ;;  %v2102_v16 = vpack.c.bf16 %v2049_v52, %v2033_v27 }
 0x1c8   : > { %v1685_v19 = vadd.f32 %v1684_v18, %v4738_v45  ;;  %vm1940_vm0 = vcmp.gt.f32.partialorder %v1683_v51, 0.0  ;;  %v2004_v13 = vmul.f32 0.01, %v1683_v51  ;;  %v2118_v8 = vpack.c.bf16 %v2081_v63, %v2065_v40 }
 0x1c9   : > { %v1686_v6 = vpop.f32.mrf.mxu1  ;;  %v2082_v58 = vsel %vm1954_vm15, %v1634_v15, %v2018_v0  ;;  %v2067_v60 = vsel %vm1939_vm2, %v1681_v56, %v2003_v17  ;;  %v2051_v47 = vsel %vm1923_vm4, %v1675_v42, %v1987_v2  ;;  %v2105_v59 = vpack.c.bf16 %v2052_v10, %v2036_v14 }
 0x1ca   : > { %v1687_v12 = vadd.f32 %v1686_v6, %v4738_v45  ;;  %vm1955_vm1 = vcmp.gt.f32.partialorder %v1685_v19, 0.0  ;;  %v2019_v11 = vmul.f32 0.01, %v1685_v19  ;;  %v2119_v24 = vpack.c.bf16 %v2082_v58, %v2066_v33 }
 0x1cb   : > { %v2068_v22 = vsel %vm1940_vm0, %v1683_v51, %v2004_v13  ;;  %v2035_v30 = vsel %vm1907_vm5, %v4816_v54, %v1971_v34 }
 0x1cc   : > { %vm1956_vm3 = vcmp.gt.f32.partialorder %v1687_v12, 0.0  ;;  %v2020_v20 = vmul.f32 0.01, %v1687_v12  ;;  %v2083_v28 = vsel %vm1955_vm1, %v1685_v19, %v2019_v11  ;;  %2289 = vmatprep.subr.bf16.mxu0 %v2119_v24  ;;  %v2104_v53 = vpack.c.bf16 %v2051_v47, %v2035_v30 }
 0x1cd   : > { %2290 = vmatpush1.bf16.msra.mxu0 %v2118_v8  ;;  %v2120_v3 = vpack.c.bf16 %v2083_v28, %v2067_v60 }
 0x1ce   : > { %v2084_v31 = vsel %vm1956_vm3, %v1687_v12, %v2020_v20  ;;  %2291 = vmatprep.subr.bf16.mxu0 %v2103_v48 }
 0x1cf   : > { %v2121_v5 = vpack.c.bf16 %v2084_v31, %v2068_v22 }
 0x1d1   : > { %2342 = vmatprep.subr.bf16.mxu1 %v2121_v5  ;;  %2292 = vmatpush1.bf16.msra.mxu0 %v2102_v16 }
 0x1d2   : > { %2343 = vmatpush1.bf16.msra.mxu1 %v2120_v3 }
 0x1d3   : > { %2344 = vmatprep.subr.bf16.mxu1 %v2105_v59 }
 0x1d4   : > { %3416 = vmatmul.mubr.msk.bf16.vlgmr.msra.gmra.mxu0 %vm1470_vm11, %v4788_v44 }
 0x1d5   : > { %2319 = vmatprep.mubr.bf16.mxu0 %v5375_v29 }
 0x1d6   : > { %2345 = vmatpush1.bf16.msra.mxu1 %v2104_v53 }
 0x1d9   : > { %3418 = vmatmul.mubr.msk.bf16.vlgmr.msra.gmra.mxu1 %vm1470_vm11, %v4788_v44 }
 0x1da   : > { %2372 = vmatprep.mubr.bf16.mxu1 %v5375_v29 }
 0x1dc   : > { %v1723_v1 = vpop.f32.mrf.mxu0  ;;  %3417 = vmatmul.mubr.msk.bf16.gmra.mxu0 %vm1470_vm11, %v4797_v39 }
 0x1dd   : > { %2415 = vmatprep.mubr.bf16.mxu0 %v5375_v29  ;;  %v4865_v4 = vadd.f32 %v1723_v1, %v4740_v37 }
 0x1de   : > { %v1725_v62 = vpop.f32.mrf.mxu0 }
 0x1df   : > { %v1726_v57 = vadd.f32 %v1725_v62, %v4740_v37  ;;  %v1973_v21 = vmul.f32 0.01, %v4865_v4  ;;  %vm1909_vm9 = vcmp.gt.f32.partialorder %v4865_v4, 0.0 }
 0x1e0   : > { %v1727_v7 = vpop.f32.mrf.mxu0 }
 0x1e1   : > { %v1776_v54 = vpop.f32.mrf.mxu1  ;;  %3419 = vmatmul.mubr.msk.bf16.gmra.mxu1 %vm1470_vm11, %v4797_v39  ;;  %v1728_v46 = vadd.f32 %v1727_v7, %v4743_v26  ;;  %v1974_v43 = vmul.f32 0.01, %v1726_v57  ;;  %vm1910_vm6 = vcmp.gt.f32.partialorder %v1726_v57, 0.0 }
 0x1e2   : > { %v1729_v36 = vpop.f32.mrf.mxu0  ;;  %2468 = vmatprep.mubr.bf16.mxu1 %v5375_v29  ;;  %v4875_v18 = vadd.f32 %v1776_v54, %v4740_v37 }
 0x1e3   : > { %v1778_v55 = vpop.f32.mrf.mxu1  ;;  %v1730_v35 = vadd.f32 %v1729_v36, %v4743_v26  ;;  %v1989_v42 = vmul.f32 0.01, %v1728_v46  ;;  %vm1925_vm7 = vcmp.gt.f32.partialorder %v1728_v46, 0.0  ;;  %v2038_v25 = vsel %vm1910_vm6, %v1726_v57, %v1974_v43 }
 0x1e4   : > { %v1733_v38 = vpop.f32.mrf.mxu0  ;;  %v4869_v32 = vadd.f32 %v1778_v55, %v4740_v37  ;;  %v2037_v57 = vsel %vm1909_vm9, %v4865_v4, %v1973_v21  ;;  %vm1911_vm6 = vcmp.gt.f32.partialorder %v4875_v18, 0.0 }
 0x1e5   : > { %v1780_v56 = vpop.f32.mrf.mxu1  ;;  %v1734_v50 = vadd.f32 %v1733_v38, %v4736_v41  ;;  %vm1926_vm8 = vcmp.gt.f32.partialorder %v1730_v35, 0.0  ;;  %v2053_v40 = vsel %vm1925_vm7, %v1728_v46, %v1989_v42  ;;  %v1990_v17 = vmul.f32 0.01, %v1730_v35 }
 0x1e6   : > { %v1735_v61 = vpop.f32.mrf.mxu0  ;;  %v1976_v23 = vmul.f32 0.01, %v4869_v32  ;;  %v1781_v2 = vadd.f32 %v1780_v56, %v4743_v26  ;;  %vm1912_vm4 = vcmp.gt.f32.partialorder %v4869_v32, 0.0  ;;  %v1975_v46 = vmul.f32 0.01, %v4875_v18 }
 0x1e7   : > { %v1782_v52 = vpop.f32.mrf.mxu1  ;;  %v1736_v9 = vadd.f32 %v1735_v61, %v4736_v41  ;;  %v2005_v49 = vmul.f32 0.01, %v1734_v50  ;;  %vm1941_vm10 = vcmp.gt.f32.partialorder %v1734_v50, 0.0  ;;  %v2054_v22 = vsel %vm1926_vm8, %v1730_v35, %v1990_v17 }
 0x1e8   : > { %v1737_v51 = vpop.f32.mrf.mxu0  ;;  %v1783_v0 = vadd.f32 %v1782_v52, %v4743_v26  ;;  %v1991_v30 = vmul.f32 0.01, %v1781_v2  ;;  %v2107_v1 = vpack.c.bf16 %v2054_v22, %v2038_v25  ;;  %vm1927_vm5 = vcmp.gt.f32.partialorder %v1781_v2, 0.0 }
 0x1e9   : > { %v1786_v15 = vpop.f32.mrf.mxu1  ;;  %v1738_v13 = vadd.f32 %v1737_v51, %v4738_v45  ;;  %vm1942_vm12 = vcmp.gt.f32.partialorder %v1736_v9, 0.0  ;;  %v2006_v63 = vmul.f32 0.01, %v1736_v9  ;;  %v2069_v8 = vsel %vm1941_vm10, %v1734_v50, %v2005_v49 }
 0x1ea   : > { %v1739_v19 = vpop.f32.mrf.mxu0  ;;  %v1787_v33 = vadd.f32 %v1786_v15, %v4736_v41  ;;  %v1992_v31 = vmul.f32 0.01, %v1783_v0  ;;  %vm1928_vm0 = vcmp.gt.f32.partialorder %v1783_v0, 0.0  ;;  %v2106_v38 = vpack.c.bf16 %v2053_v40, %v2037_v57 }
 0x1eb   : > { %v1788_v6 = vpop.f32.mrf.mxu1  ;;  %v1740_v12 = vadd.f32 %v1739_v19, %v4738_v45  ;;  %vm1957_vm13 = vcmp.gt.f32.partialorder %v1738_v13, 0.0  ;;  %v2021_v58 = vmul.f32 0.01, %v1738_v13  ;;  %v2070_v3 = vsel %vm1942_vm12, %v1736_v9, %v2006_v63 }
 0x1ec   : > { %v1789_v11 = vadd.f32 %v1788_v6, %v4736_v41  ;;  %v2007_v14 = vmul.f32 0.01, %v1787_v33  ;;  %vm1943_vm2 = vcmp.gt.f32.partialorder %v1787_v33, 0.0  ;;  %v2056_v54 = vsel %vm1928_vm0, %v1783_v0, %v1992_v31 }
 0x1ed   : > { %v1790_v20 = vpop.f32.mrf.mxu1  ;;  %vm1958_vm14 = vcmp.gt.f32.partialorder %v1740_v12, 0.0  ;;  %v2022_v24 = vmul.f32 0.01, %v1740_v12  ;;  %v2085_v10 = vsel %vm1957_vm13, %v1738_v13, %v2021_v58  ;;  %v2040_v56 = vsel %vm1912_vm4, %v4869_v32, %v1976_v23 }
 0x1ee   : > { %v1791_v28 = vadd.f32 %v1790_v20, %v4738_v45  ;;  %v2008_v48 = vmul.f32 0.01, %v1789_v11  ;;  %vm1944_vm1 = vcmp.gt.f32.partialorder %v1789_v11, 0.0  ;;  %v2122_v47 = vpack.c.bf16 %v2085_v10, %v2069_v8 }
 0x1ef   : > { %v1792_v34 = vpop.f32.mrf.mxu1  ;;  %v2086_v60 = vsel %vm1958_vm14, %v1740_v12, %v2022_v24  ;;  %v2071_v36 = vsel %vm1943_vm2, %v1787_v33, %v2007_v14  ;;  %v2055_v35 = vsel %vm1927_vm5, %v1781_v2, %v1991_v30  ;;  %v2109_v42 = vpack.c.bf16 %v2056_v54, %v2040_v56 }
 0x1f0   : > { %vm1959_vm15 = vcmp.gt.f32.partialorder %v1791_v28, 0.0  ;;  %v2023_v5 = vmul.f32 0.01, %v1791_v28  ;;  %v1793_v27 = vadd.f32 %v1792_v34, %v4738_v45  ;;  %v2123_v16 = vpack.c.bf16 %v2086_v60, %v2070_v3 }
 0x1f1   : > { %v2072_v62 = vsel %vm1944_vm1, %v1789_v11, %v2008_v48  ;;  %v2039_v4 = vsel %vm1911_vm6, %v4875_v18, %v1975_v46 }
 0x1f2   : > { %vm1960_vm3 = vcmp.gt.f32.partialorder %v1793_v27, 0.0  ;;  %v2024_v59 = vmul.f32 0.01, %v1793_v27  ;;  %v2087_v53 = vsel %vm1959_vm15, %v1791_v28, %v2023_v5  ;;  %2395 = vmatprep.subr.bf16.mxu0 %v2123_v16  ;;  %v2108_v50 = vpack.c.bf16 %v2055_v35, %v2039_v4 }
 0x1f3   : > { %2396 = vmatpush1.bf16.msra.mxu0 %v2122_v47  ;;  %v2124_v43 = vpack.c.bf16 %v2087_v53, %v2071_v36 }
 0x1f4   : > { %v2088_v7 = vsel %vm1960_vm3, %v1793_v27, %v2024_v59  ;;  %2397 = vmatprep.subr.bf16.mxu0 %v2107_v1 }
 0x1f5   : > { %v2125_v55 = vpack.c.bf16 %v2088_v7, %v2072_v62 }
 0x1f7   : > { %2448 = vmatprep.subr.bf16.mxu1 %v2125_v55  ;;  %2398 = vmatpush1.bf16.msra.mxu0 %v2106_v38 }
 0x1f8   : > { %2449 = vmatpush1.bf16.msra.mxu1 %v2124_v43 }
 0x1f9   : > { %2450 = vmatprep.subr.bf16.mxu1 %v2109_v42 }
 0x1fa   : > { %3420 = vmatmul.mubr.msk.bf16.vlgmr.msra.gmra.mxu0 %vm1470_vm11, %v4788_v44 }
 0x1fb   : > { %2425 = vmatprep.mubr.bf16.mxu0 %v5375_v29 }
 0x1fc   : > { %2451 = vmatpush1.bf16.msra.mxu1 %v2108_v50 }
 0x1ff   : > { %3422 = vmatmul.mubr.msk.bf16.vlgmr.msra.gmra.mxu1 %vm1470_vm11, %v4788_v44 }
 0x200   : > { %2478 = vmatprep.mubr.bf16.mxu1 %v5375_v29 }
 0x202   : > { %v1829_v32 = vpop.f32.mrf.mxu0  ;;  %3421 = vmatmul.mubr.msk.bf16.gmra.mxu0 %vm1470_vm11, %v4797_v39 }
 0x203   : > { %2521 = vmatprep.mubr.bf16.mxu0 %v5375_v29  ;;  %v4916_v23 = vadd.f32 %v1829_v32, %v4740_v37 }
 0x204   : > { %v1831_v61 = vpop.f32.mrf.mxu0 }
 0x205   : > { %v1832_v51 = vadd.f32 %v1831_v61, %v4740_v37  ;;  %v1977_v11 = vmul.f32 0.01, %v4916_v23  ;;  %vm1913_vm10 = vcmp.gt.f32.partialorder %v4916_v23, 0.0 }
 0x206   : > { %v1833_v52 = vpop.f32.mrf.mxu0  ;;  %v1882_v9 = vpop.f32.mrf.mxu1 }
 0x207   : > { %3423 = vmatmul.mubr.msk.bf16.gmra.mxu1 %vm1470_vm11, %v4797_v39  ;;  %v1834_v21 = vadd.f32 %v1833_v52, %v4743_v26  ;;  %v1978_v40 = vmul.f32 0.01, %v1832_v51  ;;  %vm1914_vm7 = vcmp.gt.f32.partialorder %v1832_v51, 0.0  ;;  %v4926_v58 = vadd.f32 %v1882_v9, %v4740_v37 }
 0x208   : > { %v1835_v18 = vpop.f32.mrf.mxu0  ;;  %2574 = vmatprep.mubr.bf16.mxu1 %v5375_v29  ;;  %v1884_v15 = vpop.f32.mrf.mxu1  ;;  %v2041_v32 = vsel %vm1913_vm10, %v4916_v23, %v1977_v11 }
 0x209   : > { %v1836_v49 = vadd.f32 %v1835_v18, %v4743_v26  ;;  %v4920_v19 = vadd.f32 %v1884_v15, %v4740_v37  ;;  %v1993_v0 = vmul.f32 0.01, %v1834_v21  ;;  %vm1929_vm8 = vcmp.gt.f32.partialorder %v1834_v21, 0.0 }
 0x20a   : > { %v1839_v25 = vpop.f32.mrf.mxu0  ;;  %v1886_v17 = vpop.f32.mrf.mxu1  ;;  %v2042_v24 = vsel %vm1914_vm7, %v1832_v51, %v1978_v40  ;;  %v1979_v61 = vmul.f32 0.01, %v4926_v58  ;;  %vm1915_vm7 = vcmp.gt.f32.partialorder %v4926_v58, 0.0 }
 0x20b   : > { %v1840_v6 = vadd.f32 %v1839_v25, %v4736_v41  ;;  %vm1930_vm9 = vcmp.gt.f32.partialorder %v1836_v49, 0.0  ;;  %v1980_v2 = vmul.f32 0.01, %v4920_v19  ;;  %v2057_v8 = vsel %vm1929_vm8, %v1834_v21, %v1993_v0 }
 0x20c   : > { %v1841_v13 = vpop.f32.mrf.mxu0  ;;  %v1888_v12 = vpop.f32.mrf.mxu1  ;;  %v1994_v28 = vmul.f32 0.01, %v1836_v49  ;;  %v1887_v47 = vadd.f32 %v1886_v17, %v4743_v26  ;;  %vm1916_vm5 = vcmp.gt.f32.partialorder %v4920_v19, 0.0  ;;  %v2110_v51 = vpack.c.bf16 %v2057_v8, %v2041_v32 }
 0x20d   : > { %v1842_v33 = vadd.f32 %v1841_v13, %v4736_v41  ;;  %v2009_v22 = vmul.f32 0.01, %v1840_v6  ;;  %v1889_v48 = vadd.f32 %v1888_v12, %v4743_v26  ;;  %vm1945_vm12 = vcmp.gt.f32.partialorder %v1840_v6, 0.0  ;;  %v4964_v17 = vpop.permute.xlu0 %2147 }
 0x20e   : > { %v1843_v63 = vpop.f32.mrf.mxu0  ;;  %v1892_v20 = vpop.f32.mrf.mxu1  ;;  %v2058_v53 = vsel %vm1930_vm9, %v1836_v49, %v1994_v28  ;;  %v1995_v56 = vmul.f32 0.01, %v1887_v47  ;;  %vm1931_vm6 = vcmp.gt.f32.partialorder %v1887_v47, 0.0  ;;  %v2044_v18 = vsel %vm1916_vm5, %v4920_v19, %v1980_v2 }
 0x20f   : > { %v1844_v34 = vadd.f32 %v1843_v63, %v4738_v45  ;;  %v1893_v60 = vadd.f32 %v1892_v20, %v4736_v41  ;;  %vm1946_vm13 = vcmp.gt.f32.partialorder %v1842_v33, 0.0  ;;  %v2010_v5 = vmul.f32 0.01, %v1842_v33  ;;  %v4966_v49 = vpop.permute.xlu1 %2152 }
 0x210   : > { %v1845_v31 = vpop.f32.mrf.mxu0  ;;  %v1894_v10 = vpop.f32.mrf.mxu1  ;;  %v2073_v59 = vsel %vm1945_vm12, %v1840_v6, %v2009_v22  ;;  %v1996_v1 = vmul.f32 0.01, %v1889_v48  ;;  %vm1932_vm1 = vcmp.gt.f32.partialorder %v1889_v48, 0.0  ;;  %v2111_v42 = vpack.c.bf16 %v2058_v53, %v2042_v24 }
 0x211   : > { %v1846_v37 = vadd.f32 %v1845_v31, %v4738_v45  ;;  %v1895_v27 = vadd.f32 %v1894_v10, %v4736_v41  ;;  %vm1961_vm14 = vcmp.gt.f32.partialorder %v1844_v34, 0.0  ;;  %v2025_v3 = vmul.f32 0.01, %v1844_v34  ;;  %v4968_v6 = vpop.permute.xlu0 %2137 }
 0x212   : > { %v1896_v14 = vpop.f32.mrf.mxu1  ;;  %v2074_v36 = vsel %vm1946_vm13, %v1842_v33, %v2010_v5  ;;  %v2011_v55 = vmul.f32 0.01, %v1893_v60  ;;  %vm1947_vm3 = vcmp.gt.f32.partialorder %v1893_v60, 0.0  ;;  %v2059_v15 = vsel %vm1931_vm6, %v1887_v47, %v1995_v56 }
 0x213   : > { %vm1962_vm15 = vcmp.gt.f32.partialorder %v1846_v37, 0.0  ;;  %v2026_v16 = vmul.f32 0.01, %v1846_v37  ;;  %v1897_v30 = vadd.f32 %v1896_v14, %v4738_v45  ;;  %v2012_v62 = vmul.f32 0.01, %v1895_v27  ;;  %v4971_v33 = vpop.permute.xlu1 %2142 }
 0x214   : > { %v2089_v7 = vsel %vm1961_vm14, %v1844_v34, %v2025_v3  ;;  %v1898_v54 = vpop.f32.mrf.mxu1  ;;  %vm1948_vm2 = vcmp.gt.f32.partialorder %v1895_v27, 0.0  ;;  %v2075_v52 = vsel %vm1947_vm3, %v1893_v60, %v2011_v55  ;;  %v2043_v23 = vsel %vm1915_vm7, %v4926_v58, %v1979_v61 }
 0x215   : > { %v2090_v57 = vsel %vm1962_vm15, %v1846_v37, %v2026_v16  ;;  %vm1963_vm0 = vcmp.gt.f32.partialorder %v1897_v30, 0.0  ;;  %v2027_v46 = vmul.f32 0.01, %v1897_v30  ;;  %v1899_v41 = vadd.f32 %v1898_v54, %v4738_v45 }
 0x216   : > { %v2127_v26 = vpack.c.bf16 %v2090_v57, %v2074_v36  ;;  %v2126_v38 = vpack.c.bf16 %v2089_v7, %v2073_v59  ;;  %v2076_v4 = vsel %vm1948_vm2, %v1895_v27, %v2012_v62  ;;  %v2060_v45 = vsel %vm1932_vm1, %v1889_v48, %v1996_v1 }
 0x217   : > { %vm1964_vm4 = vcmp.gt.f32.partialorder %v1899_v41, 0.0  ;;  %v2028_v43 = vmul.f32 0.01, %v1899_v41  ;;  %v2091_v35 = vsel %vm1963_vm0, %v1897_v30, %v2027_v46  ;;  %v2113_v25 = vpack.c.bf16 %v2060_v45, %v2044_v18 }
 0x218   : > { %2501 = vmatprep.subr.bf16.mxu0 %v2127_v26  ;;  %v2128_v21 = vpack.c.bf16 %v2091_v35, %v2075_v52  ;;  %v2112_v40 = vpack.c.bf16 %v2059_v15, %v2043_v23 }
 0x219   : > { %v2092_v50 = vsel %vm1964_vm4, %v1899_v41, %v2028_v43  ;;  %2502 = vmatpush1.bf16.msra.mxu0 %v2126_v38 }
 0x21a   : > { %v2129_v9 = vpack.c.bf16 %v2092_v50, %v2076_v4  ;;  %2503 = vmatprep.subr.bf16.mxu0 %v2111_v42 }
 0x21c   : > { %2554 = vmatprep.subr.bf16.mxu1 %v2129_v9 }
 0x21d   : > { %2555 = vmatpush1.bf16.msra.mxu1 %v2128_v21  ;;  %2504 = vmatpush1.bf16.msra.mxu0 %v2110_v51 }
 0x21e   : > { %2556 = vmatprep.subr.bf16.mxu1 %v2113_v25 }
 0x220   : > { %3424 = vmatmul.mubr.msk.bf16.vlgmr.msra.gmra.mxu0 %vm1470_vm11, %v4788_v44 }
 0x221   : > { %2557 = vmatpush1.bf16.msra.mxu1 %v2112_v40  ;;  %2531 = vmatprep.mubr.bf16.mxu0 %v5375_v29 }
 0x224   : > { %3426 = vmatmul.mubr.msk.bf16.vlgmr.msra.gmra.mxu1 %vm1470_vm11, %v4788_v44 }
 0x225   : > { %2584 = vmatprep.mubr.bf16.mxu1 %v5375_v29 }
 0x228   : > { %3425 = vmatmul.mubr.msk.bf16.gmra.mxu0 %vm1470_vm11, %v4797_v39 }
 0x229   : > { %2861 = vmatprep.mubr.bf16.mxu0 %v5375_v29 }
 0x22c   : > { %3427 = vmatmul.mubr.msk.bf16.gmra.mxu1 %vm1470_vm11, %v4797_v39 }
 0x22d   : > { %2902 = vmatprep.mubr.bf16.mxu1 %v5375_v29 }
 0x277   : > { %v2205_v19 = vpop.f32.mrf.mxu0 }
 0x278   : > { %v4974_v11 = vadd.f32 %v2205_v19, %v4968_v6 }
 0x279   : > { %v2207_v0 = vpop.f32.mrf.mxu0 }
 0x27a   : > { %v2258_v44 = vpop.f32.mrf.mxu1  ;;  %v2208_v13 = vadd.f32 %v2207_v0, %v4968_v6  ;;  %v4983_v48 = vmul.f32 0.01, %v4974_v11  ;;  %vm2595_vm12 = vcmp.gt.f32.partialorder %v4974_v11, 0.0 }
 0x27b   : > { %v2209_v12 = vpop.f32.mrf.mxu0  ;;  %v4986_v10 = vadd.f32 %v2258_v44, %v4968_v6 }
 0x27c   : > { %v2260_v63 = vpop.f32.mrf.mxu1  ;;  %v2210_v39 = vadd.f32 %v2209_v12, %v4971_v33  ;;  %v2660_v2 = vmul.f32 0.01, %v2208_v13  ;;  %vm2596_vm8 = vcmp.gt.f32.partialorder %v2208_v13, 0.0 }
 0x27d   : > { %v2211_v58 = vpop.f32.mrf.mxu0  ;;  %v4979_v28 = vadd.f32 %v2260_v63, %v4968_v6  ;;  %v2661_v44 = vmul.f32 0.01, %v4986_v10  ;;  %v2723_v63 = vsel %vm2595_vm12, %v4974_v11, %v4983_v48  ;;  %v5020_v11 = vld [vmem:[%s5251_s5] sm:$0x3] }
 0x27e   : > { %v2262_v20 = vpop.f32.mrf.mxu1  ;;  %v2212_v24 = vadd.f32 %v2211_v58, %v4971_v33  ;;  %v2675_v34 = vmul.f32 0.01, %v2210_v39  ;;  %vm2611_vm9 = vcmp.gt.f32.partialorder %v2210_v39, 0.0  ;;  %v2724_v59 = vsel %vm2596_vm8, %v2208_v13, %v2660_v2 }
 0x27f   : > { %v2215_v8 = vpop.f32.mrf.mxu0  ;;  %vm2598_vm13 = vcmp.gt.f32.partialorder %v4979_v28, 0.0  ;;  %v2662_v30 = vmul.f32 0.01, %v4979_v28  ;;  %v2263_v53 = vadd.f32 %v2262_v20, %v4971_v33  ;;  %vm2597_vm8 = vcmp.gt.f32.partialorder %v4986_v10, 0.0 }
 0x280   : > { %v2264_v22 = vpop.f32.mrf.mxu1  ;;  %v2216_v31 = vadd.f32 %v2215_v8, %v4964_v17  ;;  %v2676_v60 = vmul.f32 0.01, %v2212_v24  ;;  %vm2612_vm10 = vcmp.gt.f32.partialorder %v2212_v24, 0.0  ;;  %v2739_v62 = vsel %vm2611_vm9, %v2210_v39, %v2675_v34 }
 0x281   : > { %v2217_v37 = vpop.f32.mrf.mxu0  ;;  %v2265_v5 = vadd.f32 %v2264_v22, %v4971_v33  ;;  %vm2613_vm7 = vcmp.gt.f32.partialorder %v2263_v53, 0.0  ;;  %v2677_v18 = vmul.f32 0.01, %v2263_v53  ;;  %v2726_v58 = vsel %vm2598_vm13, %v4979_v28, %v2662_v30 }
 0x282   : > { %v2268_v27 = vpop.f32.mrf.mxu1  ;;  %v2218_v3 = vadd.f32 %v2217_v37, %v4964_v17  ;;  %v2691_v14 = vmul.f32 0.01, %v2216_v31  ;;  %vm2627_vm14 = vcmp.gt.f32.partialorder %v2216_v31, 0.0  ;;  %v2740_v55 = vsel %vm2612_vm10, %v2212_v24, %v2676_v60 }
 0x283   : > { %v2269_v16 = vadd.f32 %v2268_v27, %v4964_v17  ;;  %v2219_v47 = vpop.f32.mrf.mxu0  ;;  %vm2614_vm15 = vcmp.gt.f32.partialorder %v2265_v5, 0.0  ;;  %v2678_v26 = vmul.f32 0.01, %v2265_v5  ;;  %v2789_v19 = vpack.c.bf16 %v2740_v55, %v2724_v59 }
 0x284   : > { %v2270_v1 = vpop.f32.mrf.mxu1  ;;  %v2692_v7 = vmul.f32 0.01, %v2218_v3  ;;  %v2220_v57 = vadd.f32 %v2219_v47, %v4966_v49  ;;  %vm2628_vm0 = vcmp.gt.f32.partialorder %v2218_v3, 0.0  ;;  %v2755_v38 = vsel %vm2627_vm14, %v2216_v31, %v2691_v14 }
 0x285   : > { %v2271_v54 = vadd.f32 %v2270_v1, %v4964_v17  ;;  %v2221_v46 = vpop.f32.mrf.mxu0  ;;  %v2693_v43 = vmul.f32 0.01, %v2269_v16  ;;  %vm2629_vm5 = vcmp.gt.f32.partialorder %v2269_v16, 0.0  ;;  %v2742_v0 = vsel %vm2614_vm15, %v2265_v5, %v2678_v26 }
 0x286   : > { %v2272_v41 = vpop.f32.mrf.mxu1  ;;  %v2222_v36 = vadd.f32 %v2221_v46, %v4966_v49  ;;  %vm2643_vm1 = vcmp.gt.f32.partialorder %v2220_v57, 0.0  ;;  %v2707_v56 = vmul.f32 0.01, %v2220_v57  ;;  %v2756_v32 = vsel %vm2628_vm0, %v2218_v3, %v2692_v7 }
 0x287   : > { %v2273_v35 = vadd.f32 %v2272_v41, %v4966_v49  ;;  %vm2630_vm3 = vcmp.gt.f32.partialorder %v2271_v54, 0.0  ;;  %v2694_v50 = vmul.f32 0.01, %v2271_v54  ;;  %v2757_v13 = vsel %vm2629_vm5, %v2269_v16, %v2693_v43 }
 0x288   : > { %vm2644_vm2 = vcmp.gt.f32.partialorder %v2222_v36, 0.0  ;;  %v2708_v42 = vmul.f32 0.01, %v2222_v36  ;;  %v2274_v4 = vpop.f32.mrf.mxu1  ;;  %v2771_v61 = vsel %vm2643_vm1, %v2220_v57, %v2707_v56  ;;  %v2788_v20 = vpack.c.bf16 %v2739_v62, %v2723_v63 }
 0x289   : > { %v2275_v45 = vadd.f32 %v2274_v4, %v4966_v49  ;;  %vm2645_vm4 = vcmp.gt.f32.partialorder %v2273_v35, 0.0  ;;  %v2709_v52 = vmul.f32 0.01, %v2273_v35  ;;  %v2804_v15 = vpack.c.bf16 %v2771_v61, %v2755_v38 }
 0x28a   : > { %v2772_v9 = vsel %vm2644_vm2, %v2222_v36, %v2708_v42  ;;  %v2758_v23 = vsel %vm2630_vm3, %v2271_v54, %v2694_v50  ;;  %v2741_v24 = vsel %vm2613_vm7, %v2263_v53, %v2677_v18  ;;  %v2791_v2 = vpack.c.bf16 %v2742_v0, %v2726_v58 }
 0x28b   : > { %vm2646_vm6 = vcmp.gt.f32.partialorder %v2275_v45, 0.0  ;;  %v2710_v51 = vmul.f32 0.01, %v2275_v45  ;;  %v2805_v21 = vpack.c.bf16 %v2772_v9, %v2756_v32  ;;  %v2773_v25 = vsel %vm2645_vm4, %v2273_v35, %v2709_v52 }
 0x28c   : > { %v2806_v39 = vpack.c.bf16 %v2773_v25, %v2757_v13  ;;  %v2725_v8 = vsel %vm2597_vm8, %v4986_v10, %v2661_v44 }
 0x28d   : > { %2841 = vmatprep.subr.bf16.mxu0 %v2805_v21  ;;  %v2774_v40 = vsel %vm2646_vm6, %v2275_v45, %v2710_v51  ;;  %v2790_v22 = vpack.c.bf16 %v2741_v24, %v2725_v8 }
 0x28e   : > { %v2807_v12 = vpack.c.bf16 %v2774_v40, %v2758_v23  ;;  %2842 = vmatpush1.bf16.msra.mxu0 %v2804_v15 }
 0x28f   : > { %2843 = vmatprep.subr.bf16.mxu0 %v2789_v19 }
 0x290   : > { %2882 = vmatprep.subr.bf16.mxu1 %v2807_v12 }
 0x291   : > { %2883 = vmatpush1.bf16.msra.mxu1 %v2806_v39 }
 0x292   : > { %2884 = vmatprep.subr.bf16.mxu1 %v2791_v2  ;;  %2844 = vmatpush1.bf16.msra.mxu0 %v2788_v20 }
 0x294   : > { %v2311_v28 = vpop.f32.mrf.mxu0 }
 0x295   : > { %2885 = vmatpush1.bf16.msra.mxu1 %v2790_v22  ;;  %3428 = vmatmul.mubr.msk.bf16.vlgmr.msra.gmra.mxu0 %vm1470_vm11, %v5020_v11  ;;  %v5030_v60 = vadd.f32 %v2311_v28, %v4968_v6 }
 0x296   : > { %2943 = vmatprep.mubr.bf16.mxu0 %v5375_v29  ;;  %v2313_v31 = vpop.f32.mrf.mxu0 }
 0x297   : > { %v2314_v10 = vadd.f32 %v2313_v31, %v4968_v6  ;;  %v5039_v1 = vmul.f32 0.01, %v5030_v60  ;;  %vm2599_vm13 = vcmp.gt.f32.partialorder %v5030_v60, 0.0 }
 0x298   : > { %3429 = vmatmul.mubr.msk.bf16.vlgmr.msra.gmra.mxu1 %vm1470_vm11, %v5020_v11  ;;  %v2315_v34 = vpop.f32.mrf.mxu0 }
 0x299   : > { %v2364_v48 = vpop.f32.mrf.mxu1  ;;  %2984 = vmatprep.mubr.bf16.mxu1 %v5375_v29  ;;  %v2316_v5 = vadd.f32 %v2315_v34, %v4971_v33  ;;  %v2664_v16 = vmul.f32 0.01, %v2314_v10  ;;  %vm2600_vm9 = vcmp.gt.f32.partialorder %v2314_v10, 0.0 }
 0x29a   : > { %v2317_v27 = vpop.f32.mrf.mxu0  ;;  %v5042_v62 = vadd.f32 %v2364_v48, %v4968_v6 }
 0x29b   : > { %v2366_v37 = vpop.f32.mrf.mxu1  ;;  %v2318_v14 = vadd.f32 %v2317_v27, %v4971_v33  ;;  %v2679_v7 = vmul.f32 0.01, %v2316_v5  ;;  %vm2615_vm10 = vcmp.gt.f32.partialorder %v2316_v5, 0.0  ;;  %v2728_v43 = vsel %vm2600_vm9, %v2314_v10, %v2664_v16 }
 0x29c   : > { %v2321_v47 = vpop.f32.mrf.mxu0  ;;  %v5035_v59 = vadd.f32 %v2366_v37, %v4968_v6  ;;  %v2665_v10 = vmul.f32 0.01, %v5042_v62  ;;  %vm2601_vm9 = vcmp.gt.f32.partialorder %v5042_v62, 0.0 }
 0x29d   : > { %v2368_v3 = vpop.f32.mrf.mxu1  ;;  %v2322_v53 = vadd.f32 %v2321_v47, %v4964_v17  ;;  %v2680_v57 = vmul.f32 0.01, %v2318_v14  ;;  %vm2616_vm12 = vcmp.gt.f32.partialorder %v2318_v14, 0.0  ;;  %v2743_v4 = vsel %vm2615_vm10, %v2316_v5, %v2679_v7 }
 0x29e   : > { %v2323_v54 = vpop.f32.mrf.mxu0  ;;  %vm2602_vm14 = vcmp.gt.f32.partialorder %v5035_v59, 0.0  ;;  %v2666_v56 = vmul.f32 0.01, %v5035_v59  ;;  %v2369_v35 = vadd.f32 %v2368_v3, %v4971_v33  ;;  %v2727_v5 = vsel %vm2599_vm13, %v5030_v60, %v5039_v1 }
 0x29f   : > { %v2370_v30 = vpop.f32.mrf.mxu1  ;;  %v2324_v36 = vadd.f32 %v2323_v54, %v4964_v17  ;;  %v2695_v55 = vmul.f32 0.01, %v2322_v53  ;;  %vm2631_vm15 = vcmp.gt.f32.partialorder %v2322_v53, 0.0  ;;  %v2744_v51 = vsel %vm2616_vm12, %v2318_v14, %v2680_v57 }
 0x2a0   : > { %v2371_v46 = vadd.f32 %v2370_v30, %v4971_v33  ;;  %v2325_v38 = vpop.f32.mrf.mxu0  ;;  %vm2617_vm8 = vcmp.gt.f32.partialorder %v2369_v35, 0.0  ;;  %v2681_v24 = vmul.f32 0.01, %v2369_v35  ;;  %v2793_v31 = vpack.c.bf16 %v2744_v51, %v2728_v43 }
 0x2a1   : > { %v2374_v41 = vpop.f32.mrf.mxu1  ;;  %v2696_v50 = vmul.f32 0.01, %v2324_v36  ;;  %v2326_v32 = vadd.f32 %v2325_v38, %v4966_v49  ;;  %vm2632_vm1 = vcmp.gt.f32.partialorder %v2324_v36, 0.0  ;;  %v2759_v18 = vsel %vm2631_vm15, %v2322_v53, %v2695_v55 }
 0x2a2   : > { %v2375_v26 = vadd.f32 %v2374_v41, %v4964_v17  ;;  %v2327_v61 = vpop.f32.mrf.mxu0  ;;  %vm2618_vm0 = vcmp.gt.f32.partialorder %v2371_v46, 0.0  ;;  %v2682_v21 = vmul.f32 0.01, %v2371_v46  ;;  %v2730_v3 = vsel %vm2602_vm14, %v5035_v59, %v2666_v56 }
 0x2a3   : > { %v2376_v42 = vpop.f32.mrf.mxu1  ;;  %v2328_v9 = vadd.f32 %v2327_v61, %v4966_v49  ;;  %vm2647_vm2 = vcmp.gt.f32.partialorder %v2326_v32, 0.0  ;;  %v2711_v25 = vmul.f32 0.01, %v2326_v32  ;;  %v2760_v13 = vsel %vm2632_vm1, %v2324_v36, %v2696_v50 }
 0x2a4   : > { %v2377_v45 = vadd.f32 %v2376_v42, %v4964_v17  ;;  %v2697_v15 = vmul.f32 0.01, %v2375_v26  ;;  %vm2633_vm6 = vcmp.gt.f32.partialorder %v2375_v26, 0.0  ;;  %v2746_v48 = vsel %vm2618_vm0, %v2371_v46, %v2682_v21 }
 0x2a5   : > { %v2378_v52 = vpop.f32.mrf.mxu1  ;;  %vm2648_vm3 = vcmp.gt.f32.partialorder %v2328_v9, 0.0  ;;  %v2712_v40 = vmul.f32 0.01, %v2328_v9  ;;  %v2775_v12 = vsel %vm2647_vm2, %v2326_v32, %v2711_v25  ;;  %v2792_v14 = vpack.c.bf16 %v2743_v4, %v2727_v5 }
 0x2a6   : > { %v2379_v23 = vadd.f32 %v2378_v52, %v4966_v49  ;;  %vm2634_vm4 = vcmp.gt.f32.partialorder %v2377_v45, 0.0  ;;  %v2698_v0 = vmul.f32 0.01, %v2377_v45  ;;  %v2808_v2 = vpack.c.bf16 %v2775_v12, %v2759_v18 }
 0x2a7   : > { %v2380_v19 = vpop.f32.mrf.mxu1  ;;  %v2776_v39 = vsel %vm2648_vm3, %v2328_v9, %v2712_v40  ;;  %v2761_v34 = vsel %vm2633_vm6, %v2375_v26, %v2697_v15  ;;  %v2745_v16 = vsel %vm2617_vm8, %v2369_v35, %v2681_v24  ;;  %v2795_v47 = vpack.c.bf16 %v2746_v48, %v2730_v3 }
 0x2a8   : > { %v2381_v44 = vadd.f32 %v2380_v19, %v4966_v49  ;;  %vm2649_vm5 = vcmp.gt.f32.partialorder %v2379_v23, 0.0  ;;  %v2713_v63 = vmul.f32 0.01, %v2379_v23  ;;  %v2809_v20 = vpack.c.bf16 %v2776_v39, %v2760_v13 }
 0x2a9   : > { %v2762_v22 = vsel %vm2634_vm4, %v2377_v45, %v2698_v0  ;;  %v2729_v30 = vsel %vm2601_vm9, %v5042_v62, %v2665_v10 }
 0x2aa   : > { %vm2650_vm7 = vcmp.gt.f32.partialorder %v2381_v44, 0.0  ;;  %v2714_v58 = vmul.f32 0.01, %v2381_v44  ;;  %v2777_v8 = vsel %vm2649_vm5, %v2379_v23, %v2713_v63  ;;  %2923 = vmatprep.subr.bf16.mxu0 %v2809_v20  ;;  %v2794_v53 = vpack.c.bf16 %v2745_v16, %v2729_v30 }
 0x2ab   : > { %2924 = vmatpush1.bf16.msra.mxu0 %v2808_v2  ;;  %v2810_v27 = vpack.c.bf16 %v2777_v8, %v2761_v34 }
 0x2ac   : > { %v2778_v28 = vsel %vm2650_vm7, %v2381_v44, %v2714_v58  ;;  %2925 = vmatprep.subr.bf16.mxu0 %v2793_v31 }
 0x2ad   : > { %v2811_v37 = vpack.c.bf16 %v2778_v28, %v2762_v22 }
 0x2af   : > { %2964 = vmatprep.subr.bf16.mxu1 %v2811_v37  ;;  %2926 = vmatpush1.bf16.msra.mxu0 %v2792_v14 }
 0x2b0   : > { %2965 = vmatpush1.bf16.msra.mxu1 %v2810_v27 }
 0x2b1   : > { %2966 = vmatprep.subr.bf16.mxu1 %v2795_v47 }
 0x2b2   : > { %3430 = vmatmul.mubr.msk.bf16.vlgmr.msra.gmra.mxu0 %vm1470_vm11, %v5020_v11 }
 0x2b3   : > { %3025 = vmatprep.mubr.bf16.mxu0 %v5375_v29 }
 0x2b4   : > { %2967 = vmatpush1.bf16.msra.mxu1 %v2794_v53 }
 0x2b7   : > { %3431 = vmatmul.mubr.msk.bf16.vlgmr.msra.gmra.mxu1 %vm1470_vm11, %v5020_v11 }
 0x2b8   : > { %3066 = vmatprep.mubr.bf16.mxu1 %v5375_v29 }
 0x2ba   : > { %v2417_v60 = vpop.f32.mrf.mxu0 }
 0x2bb   : > { %v5081_v46 = vadd.f32 %v2417_v60, %v4968_v6 }
 0x2bc   : > { %v2419_v59 = vpop.f32.mrf.mxu0 }
 0x2bd   : > { %v2420_v62 = vadd.f32 %v2419_v59, %v4968_v6  ;;  %v5090_v4 = vmul.f32 0.01, %v5081_v46  ;;  %vm2603_vm14 = vcmp.gt.f32.partialorder %v5081_v46, 0.0 }
 0x2be   : > { %v2421_v7 = vpop.f32.mrf.mxu0 }
 0x2bf   : > { %v2470_v1 = vpop.f32.mrf.mxu1  ;;  %v2422_v41 = vadd.f32 %v2421_v7, %v4971_v33  ;;  %v2668_v38 = vmul.f32 0.01, %v2420_v62  ;;  %vm2604_vm10 = vcmp.gt.f32.partialorder %v2420_v62, 0.0 }
 0x2c0   : > { %v2423_v57 = vpop.f32.mrf.mxu0  ;;  %v5093_v50 = vadd.f32 %v2470_v1, %v4968_v6 }
 0x2c1   : > { %v2472_v54 = vpop.f32.mrf.mxu1  ;;  %v2424_v55 = vadd.f32 %v2423_v57, %v4971_v33  ;;  %v2683_v45 = vmul.f32 0.01, %v2422_v41  ;;  %vm2619_vm12 = vcmp.gt.f32.partialorder %v2422_v41, 0.0  ;;  %v2732_v15 = vsel %vm2604_vm10, %v2420_v62, %v2668_v38 }
 0x2c2   : > { %v2427_v26 = vpop.f32.mrf.mxu0  ;;  %v5086_v43 = vadd.f32 %v2472_v54, %v4968_v6  ;;  %v2669_v7 = vmul.f32 0.01, %v5093_v50  ;;  %v2731_v57 = vsel %vm2603_vm14, %v5081_v46, %v5090_v4  ;;  %vm2605_vm10 = vcmp.gt.f32.partialorder %v5093_v50, 0.0 }
 0x2c3   : > { %v2474_v36 = vpop.f32.mrf.mxu1  ;;  %v2428_v35 = vadd.f32 %v2427_v26, %v4964_v17  ;;  %v2684_v32 = vmul.f32 0.01, %v2424_v55  ;;  %vm2620_vm13 = vcmp.gt.f32.partialorder %v2424_v55, 0.0  ;;  %v2747_v0 = vsel %vm2619_vm12, %v2422_v41, %v2683_v45 }
 0x2c4   : > { %v2429_v42 = vpop.f32.mrf.mxu0  ;;  %vm2606_vm15 = vcmp.gt.f32.partialorder %v5086_v43, 0.0  ;;  %v2670_v25 = vmul.f32 0.01, %v5086_v43  ;;  %v2475_v23 = vadd.f32 %v2474_v36, %v4971_v33 }
 0x2c5   : > { %v2476_v56 = vpop.f32.mrf.mxu1  ;;  %v2430_v9 = vadd.f32 %v2429_v42, %v4964_v17  ;;  %v2699_v21 = vmul.f32 0.01, %v2428_v35  ;;  %vm2635_vm0 = vcmp.gt.f32.partialorder %v2428_v35, 0.0  ;;  %v2748_v58 = vsel %vm2620_vm13, %v2424_v55, %v2684_v32 }
 0x2c6   : > { %v2477_v61 = vadd.f32 %v2476_v56, %v4971_v33  ;;  %v2431_v51 = vpop.f32.mrf.mxu0  ;;  %vm2621_vm9 = vcmp.gt.f32.partialorder %v2475_v23, 0.0  ;;  %v2685_v16 = vmul.f32 0.01, %v2475_v23  ;;  %v2797_v59 = vpack.c.bf16 %v2748_v58, %v2732_v15 }
 0x2c7   : > { %v2480_v52 = vpop.f32.mrf.mxu1  ;;  %v2700_v44 = vmul.f32 0.01, %v2430_v9  ;;  %v2432_v12 = vadd.f32 %v2431_v51, %v4966_v49  ;;  %vm2636_vm2 = vcmp.gt.f32.partialorder %v2430_v9, 0.0  ;;  %v2763_v24 = vsel %vm2635_vm0, %v2428_v35, %v2699_v21 }
 0x2c8   : > { %v2481_v18 = vadd.f32 %v2480_v52, %v4964_v17  ;;  %v2433_v19 = vpop.f32.mrf.mxu0  ;;  %vm2622_vm1 = vcmp.gt.f32.partialorder %v2477_v61, 0.0  ;;  %v2686_v20 = vmul.f32 0.01, %v2477_v61  ;;  %v2734_v36 = vsel %vm2606_vm15, %v5086_v43, %v2670_v25 }
 0x2c9   : > { %v2482_v40 = vpop.f32.mrf.mxu1  ;;  %v2434_v39 = vadd.f32 %v2433_v19, %v4966_v49  ;;  %vm2651_vm3 = vcmp.gt.f32.partialorder %v2432_v12, 0.0  ;;  %v2715_v8 = vmul.f32 0.01, %v2432_v12  ;;  %v2764_v34 = vsel %vm2636_vm2, %v2430_v9, %v2700_v44 }
 0x2ca   : > { %v2483_v13 = vadd.f32 %v2482_v40, %v4964_v17  ;;  %v2701_v2 = vmul.f32 0.01, %v2481_v18  ;;  %vm2637_vm7 = vcmp.gt.f32.partialorder %v2481_v18, 0.0  ;;  %v2750_v1 = vsel %vm2622_vm1, %v2477_v61, %v2686_v20 }
 0x2cb   : > { %v2484_v63 = vpop.f32.mrf.mxu1  ;;  %vm2652_vm4 = vcmp.gt.f32.partialorder %v2434_v39, 0.0  ;;  %v2716_v28 = vmul.f32 0.01, %v2434_v39  ;;  %v2779_v37 = vsel %vm2651_vm3, %v2432_v12, %v2715_v8  ;;  %v2796_v55 = vpack.c.bf16 %v2747_v0, %v2731_v57 }
 0x2cc   : > { %v2485_v22 = vadd.f32 %v2484_v63, %v4966_v49  ;;  %vm2638_vm5 = vcmp.gt.f32.partialorder %v2483_v13, 0.0  ;;  %v2702_v48 = vmul.f32 0.01, %v2483_v13  ;;  %v2812_v47 = vpack.c.bf16 %v2779_v37, %v2763_v24 }
 0x2cd   : > { %v2486_v31 = vpop.f32.mrf.mxu1  ;;  %v2780_v27 = vsel %vm2652_vm4, %v2434_v39, %v2716_v28  ;;  %v2765_v62 = vsel %vm2637_vm7, %v2481_v18, %v2701_v2  ;;  %v2749_v26 = vsel %vm2621_vm9, %v2475_v23, %v2685_v16  ;;  %v2799_v38 = vpack.c.bf16 %v2750_v1, %v2734_v36 }
 0x2ce   : > { %v2487_v10 = vadd.f32 %v2486_v31, %v4966_v49  ;;  %vm2653_vm6 = vcmp.gt.f32.partialorder %v2485_v22, 0.0  ;;  %v2717_v5 = vmul.f32 0.01, %v2485_v22  ;;  %v2813_v14 = vpack.c.bf16 %v2780_v27, %v2764_v34 }
 0x2cf   : > { %v2766_v53 = vsel %vm2638_vm5, %v2483_v13, %v2702_v48  ;;  %v2733_v56 = vsel %vm2605_vm10, %v5093_v50, %v2669_v7 }
 0x2d0   : > { %vm2654_vm8 = vcmp.gt.f32.partialorder %v2487_v10, 0.0  ;;  %v2718_v3 = vmul.f32 0.01, %v2487_v10  ;;  %v2781_v30 = vsel %vm2653_vm6, %v2485_v22, %v2717_v5  ;;  %3005 = vmatprep.subr.bf16.mxu0 %v2813_v14  ;;  %v2798_v35 = vpack.c.bf16 %v2749_v26, %v2733_v56 }
 0x2d1   : > { %3006 = vmatpush1.bf16.msra.mxu0 %v2812_v47  ;;  %v2814_v41 = vpack.c.bf16 %v2781_v30, %v2765_v62 }
 0x2d2   : > { %v2782_v60 = vsel %vm2654_vm8, %v2487_v10, %v2718_v3  ;;  %3007 = vmatprep.subr.bf16.mxu0 %v2797_v59 }
 0x2d3   : > { %v2815_v54 = vpack.c.bf16 %v2782_v60, %v2766_v53 }
 0x2d5   : > { %3046 = vmatprep.subr.bf16.mxu1 %v2815_v54  ;;  %3008 = vmatpush1.bf16.msra.mxu0 %v2796_v55 }
 0x2d6   : > { %3047 = vmatpush1.bf16.msra.mxu1 %v2814_v41 }
 0x2d7   : > { %3048 = vmatprep.subr.bf16.mxu1 %v2799_v38 }
 0x2d8   : > { %3432 = vmatmul.mubr.msk.bf16.vlgmr.msra.gmra.mxu0 %vm1470_vm11, %v5020_v11 }
 0x2d9   : > { %3107 = vmatprep.mubr.bf16.mxu0 %v5375_v29 }
 0x2da   : > { %3049 = vmatpush1.bf16.msra.mxu1 %v2798_v35 }
 0x2dd   : > { %3433 = vmatmul.mubr.msk.bf16.vlgmr.msra.gmra.mxu1 %vm1470_vm11, %v5020_v11 }
 0x2de   : > { %3148 = vmatprep.mubr.bf16.mxu1 %v5375_v29 }
 0x2e0   : > { %v2523_v46 = vpop.f32.mrf.mxu0 }
 0x2e1   : > { %v5132_v61 = vadd.f32 %v2523_v46, %v4968_v6 }
 0x2e2   : > { %v2525_v43 = vpop.f32.mrf.mxu0 }
 0x2e3   : > { %v2526_v50 = vadd.f32 %v2525_v43, %v4968_v6  ;;  %v5141_v40 = vmul.f32 0.01, %v5132_v61  ;;  %vm2607_vm15 = vcmp.gt.f32.partialorder %v5132_v61, 0.0 }
 0x2e4   : > { %v2576_v42 = vpop.f32.mrf.mxu1  ;;  %v2527_v4 = vpop.f32.mrf.mxu0 }
 0x2e5   : > { %v2528_v52 = vadd.f32 %v2527_v4, %v4971_v33  ;;  %v2672_v18 = vmul.f32 0.01, %v2526_v50  ;;  %vm2608_vm12 = vcmp.gt.f32.partialorder %v2526_v50, 0.0  ;;  %v5144_v19 = vadd.f32 %v2576_v42, %v4968_v6 }
 0x2e6   : > { %v2578_v45 = vpop.f32.mrf.mxu1  ;;  %v2529_v32 = vpop.f32.mrf.mxu0  ;;  %v2735_v43 = vsel %vm2607_vm15, %v5132_v61, %v5141_v40 }
 0x2e7   : > { %v2530_v51 = vadd.f32 %v2529_v32, %v4971_v33  ;;  %v5137_v29 = vadd.f32 %v2578_v45, %v4968_v6  ;;  %v2687_v0 = vmul.f32 0.01, %v2528_v52  ;;  %vm2623_vm13 = vcmp.gt.f32.partialorder %v2528_v52, 0.0  ;;  %v5179_v61 = vpop.permute.xlu0 %2823 }
 0x2e8   : > { %v2580_v9 = vpop.f32.mrf.mxu1  ;;  %v2533_v21 = vpop.f32.mrf.mxu0  ;;  %v2736_v24 = vsel %vm2608_vm12, %v2526_v50, %v2672_v18  ;;  %v2673_v56 = vmul.f32 0.01, %v5144_v19  ;;  %vm2609_vm12 = vcmp.gt.f32.partialorder %v5144_v19, 0.0 }
 0x2e9   : > { %v2534_v25 = vadd.f32 %v2533_v21, %v4964_v17  ;;  %v2688_v44 = vmul.f32 0.01, %v2530_v51  ;;  %vm2624_vm14 = vcmp.gt.f32.partialorder %v2530_v51, 0.0  ;;  %vm2610_vm0 = vcmp.gt.f32.partialorder %v5137_v29, 0.0 }
 0x2ea   : > { %v2582_v15 = vpop.f32.mrf.mxu1  ;;  %v2535_v23 = vpop.f32.mrf.mxu0  ;;  %v2674_v6 = vmul.f32 0.01, %v5137_v29  ;;  %v2581_v2 = vadd.f32 %v2580_v9, %v4971_v33  ;;  %v2751_v28 = vsel %vm2623_vm13, %v2528_v52, %v2687_v0  ;;  %v2737_v52 = vsel %vm2609_vm12, %v5144_v19, %v2673_v56 }
 0x2eb   : > { %v2583_v13 = vadd.f32 %v2582_v15, %v4971_v33  ;;  %v2536_v63 = vadd.f32 %v2535_v23, %v4964_v17  ;;  %v2703_v58 = vmul.f32 0.01, %v2534_v25  ;;  %vm2639_vm1 = vcmp.gt.f32.partialorder %v2534_v25, 0.0 }
 0x2ec   : > { %v2586_v12 = vpop.f32.mrf.mxu1  ;;  %v2537_v39 = vpop.f32.mrf.mxu0  ;;  %v2752_v5 = vsel %vm2624_vm14, %v2530_v51, %v2688_v44  ;;  %vm2625_vm10 = vcmp.gt.f32.partialorder %v2581_v2, 0.0  ;;  %v2689_v57 = vmul.f32 0.01, %v2581_v2  ;;  %v2738_v4 = vsel %vm2610_vm0, %v5137_v29, %v2674_v6 }
 0x2ed   : > { %v2587_v20 = vadd.f32 %v2586_v12, %v4964_v17  ;;  %v2704_v31 = vmul.f32 0.01, %v2536_v63  ;;  %v2538_v10 = vadd.f32 %v2537_v39, %v4966_v49  ;;  %vm2626_vm2 = vcmp.gt.f32.partialorder %v2583_v13, 0.0 }
 0x2ee   : > { %v2588_v8 = vpop.f32.mrf.mxu1  ;;  %v2539_v22 = vpop.f32.mrf.mxu0  ;;  %vm2640_vm3 = vcmp.gt.f32.partialorder %v2536_v63, 0.0  ;;  %v2690_v27 = vmul.f32 0.01, %v2583_v13  ;;  %v2767_v3 = vsel %vm2639_vm1, %v2534_v25, %v2703_v58  ;;  %v2801_v38 = vpack.c.bf16 %v2752_v5, %v2736_v24 }
 0x2ef   : > { %v2589_v48 = vadd.f32 %v2588_v8, %v4964_v17  ;;  %v2540_v37 = vadd.f32 %v2539_v22, %v4966_v49  ;;  %v2705_v33 = vmul.f32 0.01, %v2587_v20  ;;  %vm2655_vm4 = vcmp.gt.f32.partialorder %v2538_v10, 0.0 }
 0x2f0   : > { %v2590_v34 = vpop.f32.mrf.mxu1  ;;  %v2719_v14 = vmul.f32 0.01, %v2538_v10  ;;  %v2768_v60 = vsel %vm2640_vm3, %v2536_v63, %v2704_v31  ;;  %vm2641_vm8 = vcmp.gt.f32.partialorder %v2587_v20, 0.0  ;;  %v2800_v50 = vpack.c.bf16 %v2751_v28, %v2735_v43 }
 0x2f1   : > { %v2591_v16 = vadd.f32 %v2590_v34, %v4966_v49  ;;  %vm2656_vm5 = vcmp.gt.f32.partialorder %v2540_v37, 0.0  ;;  %v2720_v47 = vmul.f32 0.01, %v2540_v37  ;;  %vm2642_vm6 = vcmp.gt.f32.partialorder %v2589_v48, 0.0 }
 0x2f2   : > { %v2592_v30 = vpop.f32.mrf.mxu1  ;;  %v2706_v17 = vmul.f32 0.01, %v2589_v48  ;;  %v2783_v59 = vsel %vm2655_vm4, %v2538_v10, %v2719_v14  ;;  %v2769_v35 = vsel %vm2641_vm8, %v2587_v20, %v2705_v33  ;;  %v2753_v45 = vsel %vm2625_vm10, %v2581_v2, %v2689_v57 }
 0x2f3   : > { %v2593_v53 = vadd.f32 %v2592_v30, %v4966_v49  ;;  %vm2657_vm7 = vcmp.gt.f32.partialorder %v2591_v16, 0.0  ;;  %v2721_v1 = vmul.f32 0.01, %v2591_v16  ;;  %v2784_v7 = vsel %vm2656_vm5, %v2540_v37, %v2720_v47 }
 0x2f4   : > { %v2817_v54 = vpack.c.bf16 %v2784_v7, %v2768_v60  ;;  %v2816_v41 = vpack.c.bf16 %v2783_v59, %v2767_v3  ;;  %v2770_v55 = vsel %vm2642_vm6, %v2589_v48, %v2706_v17  ;;  %v2754_v49 = vsel %vm2626_vm2, %v2583_v13, %v2690_v27 }
 0x2f5   : > { %vm2658_vm9 = vcmp.gt.f32.partialorder %v2593_v53, 0.0  ;;  %v2722_v62 = vmul.f32 0.01, %v2593_v53  ;;  %v2785_v36 = vsel %vm2657_vm7, %v2591_v16, %v2721_v1  ;;  %v2803_v32 = vpack.c.bf16 %v2754_v49, %v2738_v4 }
 0x2f6   : > { %3087 = vmatprep.subr.bf16.mxu0 %v2817_v54  ;;  %v2818_v42 = vpack.c.bf16 %v2785_v36, %v2769_v35  ;;  %v2802_v9 = vpack.c.bf16 %v2753_v45, %v2737_v52 }
 0x2f7   : > { %v2786_v26 = vsel %vm2658_vm9, %v2593_v53, %v2722_v62  ;;  %3088 = vmatpush1.bf16.msra.mxu0 %v2816_v41 }
 0x2f8   : > { %v2819_v46 = vpack.c.bf16 %v2786_v26, %v2770_v55  ;;  %3089 = vmatprep.subr.bf16.mxu0 %v2801_v38 }
 0x2fa   : > { %3128 = vmatprep.subr.bf16.mxu1 %v2819_v46 }
 0x2fb   : > { %3129 = vmatpush1.bf16.msra.mxu1 %v2818_v42  ;;  %3090 = vmatpush1.bf16.msra.mxu0 %v2800_v50 }
 0x2fc   : > { %3130 = vmatprep.subr.bf16.mxu1 %v2803_v32 }
 0x2fe   : > { %3434 = vmatmul.mubr.msk.bf16.vlgmr.msra.gmra.mxu0 %vm1470_vm11, %v5020_v11 }
 0x2ff   : > { %3131 = vmatpush1.bf16.msra.mxu1 %v2802_v9 }
 0x302   : > { %3435 = vmatmul.mubr.msk.bf16.vlgmr.msra.gmra.mxu1 %vm1470_vm11, %v5020_v11 }
 0x355   : > { %v2863_v51 = vpop.f32.mrf.mxu0 }
 0x356   : > { %v2864_v21 = vadd.f32 %v2863_v51, %v5179_v61 }
 0x357   : > { %v2865_v18 = vpop.f32.mrf.mxu0 }
 0x358   : > { %v3436_v29 = vmul.f32 -1.442695, %v2864_v21  ;;  %v2904_v15 = vpop.f32.mrf.mxu1  ;;  %v2866_v25 = vadd.f32 %v2865_v18, %v5179_v61 }
 0x359   : > { %v2905_v23 = vadd.f32 %v2904_v15, %v5179_v61  ;;  %v2867_v40 = vpop.f32.mrf.mxu0 }
 0x35a   : > { %3525 = vpow2.f32 %v3436_v29  ;;  %v3437_v19 = vmul.f32 -1.442695, %v2866_v25  ;;  %v2906_v0 = vpop.f32.mrf.mxu1 }
 0x35b   : > { %v3438_v44 = vmul.f32 -1.442695, %v2905_v23  ;;  %v2907_v13 = vadd.f32 %v2906_v0, %v5179_v61  ;;  %v2868_v11 = vpop.f32.mrf.mxu0 }
 0x35c   : > { %3527 = vpow2.f32 %v3437_v19  ;;  %v2908_v12 = vpop.f32.mrf.mxu1 }
 0x35d   : > { %3529 = vpow2.f32 %v3438_v44  ;;  %v3439_v63 = vmul.f32 -1.442695, %v2907_v13 }
 0x35e   : > { %v2909_v39 = vpop.f32.mrf.mxu1 }
 0x35f   : > { %3531 = vpow2.f32 %v3439_v63 }
 0x367   : > { %v3526_v58 = vpop.eup %3525 }
 0x368   : > { %v3205_v20 = vadd.f32 1.0, %v3526_v58 }
 0x369   : > { %v3528_v24 = vpop.eup %3527 }
 0x36a   : > { %v3530_v6 = vpop.eup %3529  ;;  %v3206_v2 = vadd.f32 1.0, %v3528_v24  ;;  %3533 = vrcp.f32 %v3205_v20 }
 0x36b   : > { %v3207_v8 = vadd.f32 1.0, %v3530_v6 }
 0x36c   : > { %v3532_v22 = vpop.eup %3531  ;;  %3535 = vrcp.f32 %v3206_v2 }
 0x36d   : > { %v3208_v28 = vadd.f32 1.0, %v3532_v22  ;;  %3537 = vrcp.f32 %v3207_v8 }
 0x36f   : > { %3539 = vrcp.f32 %v3208_v28 }
 0x372   : > { %v2945_v31 = vpop.f32.mrf.mxu0 }
 0x373   : > { %v2946_v48 = vadd.f32 %v2945_v31, %v5179_v61 }
 0x374   : > { %v2947_v10 = vpop.f32.mrf.mxu0 }
 0x375   : > { %v3440_v34 = vmul.f32 -1.442695, %v2946_v48  ;;  %v2948_v5 = vadd.f32 %v2947_v10, %v5179_v61 }
 0x376   : > { %v2949_v33 = vpop.f32.mrf.mxu0 }
 0x377   : > { %v2986_v37 = vpop.f32.mrf.mxu1  ;;  %v3534_v27 = vpop.eup %3533  ;;  %3541 = vpow2.f32 %v3440_v34  ;;  %v3441_v16 = vmul.f32 -1.442695, %v2948_v5 }
 0x378   : > { %v2987_v3 = vadd.f32 %v2986_v37, %v5179_v61  ;;  %v2950_v60 = vpop.f32.mrf.mxu0 }
 0x379   : > { %v3536_v14 = vpop.eup %3535  ;;  %v2988_v47 = vpop.f32.mrf.mxu1  ;;  %3543 = vpow2.f32 %v3441_v16 }
 0x37a   : > { %v3269_v30 = vcombine.low %v3534_v27, %v3536_v14  ;;  %v3442_v17 = vmul.f32 -1.442695, %v2987_v3  ;;  %v2989_v53 = vadd.f32 %v2988_v47, %v5179_v61  ;;  %v3538_v59 = vpop.eup %3537 }
 0x37b   : > { %v2990_v1 = vpop.f32.mrf.mxu1 }
 0x37c   : > { %v3540_v7 = vpop.eup %3539  ;;  %3285 = vst [vmem:[%s5192_s22] sm:$0xff] %v3269_v30  ;;  %3545 = vpow2.f32 %v3442_v17  ;;  %v3443_v62 = vmul.f32 -1.442695, %v2989_v53 }
 0x37d   : > { %v3270_v54 = vcombine.low %v3538_v59, %v3540_v7  ;;  %v2991_v57 = vpop.f32.mrf.mxu1 }
 0x37e   : > { %3547 = vpow2.f32 %v3443_v62 }
 0x37f   : > { %3286 = vst [vmem:[%s5192_s22 + $0x8] sm:$0xff] %v3270_v54 }
 0x384   : > { %v3542_v41 = vpop.eup %3541 }
 0x385   : > { %v3209_v36 = vadd.f32 1.0, %v3542_v41 }
 0x386   : > { %v3544_v55 = vpop.eup %3543 }
 0x387   : > { %v3210_v38 = vadd.f32 1.0, %v3544_v55  ;;  %3549 = vrcp.f32 %v3209_v36 }
 0x389   : > { %v3546_v26 = vpop.eup %3545  ;;  %3551 = vrcp.f32 %v3210_v38 }
 0x38a   : > { %v3211_v49 = vadd.f32 1.0, %v3546_v26 }
 0x38b   : > { %v3548_v56 = vpop.eup %3547 }
 0x38c   : > { %v3212_v35 = vadd.f32 1.0, %v3548_v56  ;;  %3553 = vrcp.f32 %v3211_v49 }
 0x38e   : > { %3555 = vrcp.f32 %v3212_v35 }
 0x394   : > { %v3550_v46 = vpop.eup %3549 }
 0x396   : > { %v3552_v43 = vpop.eup %3551 }
 0x397   : > { %v3271_v42 = vcombine.low %v3550_v46, %v3552_v43 }
 0x398   : > { %v3027_v50 = vpop.f32.mrf.mxu0 }
 0x399   : > { %v3554_v4 = vpop.eup %3553  ;;  %3287 = vst [vmem:[%s5192_s22 + $0x10] sm:$0xff] %v3271_v42  ;;  %v3028_v32 = vadd.f32 %v3027_v50, %v5179_v61 }
 0x39a   : > { %v3029_v9 = vpop.f32.mrf.mxu0 }
 0x39b   : > { %v3556_v45 = vpop.eup %3555  ;;  %v3444_v51 = vmul.f32 -1.442695, %v3028_v32  ;;  %v3030_v18 = vadd.f32 %v3029_v9, %v5179_v61 }
 0x39c   : > { %v3272_v52 = vcombine.low %v3554_v4, %v3556_v45  ;;  %v3031_v15 = vpop.f32.mrf.mxu0 }
 0x39d   : > { %v3068_v21 = vpop.f32.mrf.mxu1  ;;  %3557 = vpow2.f32 %v3444_v51  ;;  %v3445_v25 = vmul.f32 -1.442695, %v3030_v18 }
 0x39e   : > { %3288 = vst [vmem:[%s5192_s22 + $0x18] sm:$0xff] %v3272_v52  ;;  %v3069_v29 = vadd.f32 %v3068_v21, %v5179_v61  ;;  %v3032_v0 = vpop.f32.mrf.mxu0 }
 0x39f   : > { %v3070_v23 = vpop.f32.mrf.mxu1  ;;  %3559 = vpow2.f32 %v3445_v25 }
 0x3a0   : > { %v3446_v40 = vmul.f32 -1.442695, %v3069_v29  ;;  %v3071_v19 = vadd.f32 %v3070_v23, %v5179_v61 }
 0x3a1   : > { %v3072_v44 = vpop.f32.mrf.mxu1 }
 0x3a2   : > { %3561 = vpow2.f32 %v3446_v40  ;;  %v3447_v13 = vmul.f32 -1.442695, %v3071_v19 }
 0x3a3   : > { %v3073_v11 = vpop.f32.mrf.mxu1 }
 0x3a4   : > { %3563 = vpow2.f32 %v3447_v13 }
 0x3aa   : > { %v3558_v12 = vpop.eup %3557 }
 0x3ab   : > { %v3213_v63 = vadd.f32 1.0, %v3558_v12 }
 0x3ac   : > { %v3560_v39 = vpop.eup %3559 }
 0x3ad   : > { %v3214_v20 = vadd.f32 1.0, %v3560_v39  ;;  %3565 = vrcp.f32 %v3213_v63 }
 0x3af   : > { %v3562_v58 = vpop.eup %3561  ;;  %3567 = vrcp.f32 %v3214_v20 }
 0x3b0   : > { %v3215_v24 = vadd.f32 1.0, %v3562_v58 }
 0x3b1   : > { %v3564_v6 = vpop.eup %3563 }
 0x3b2   : > { %v3216_v2 = vadd.f32 1.0, %v3564_v6  ;;  %3569 = vrcp.f32 %v3215_v24 }
 0x3b4   : > { %3571 = vrcp.f32 %v3216_v2 }
 0x3ba   : > { %v3566_v8 = vpop.eup %3565 }
 0x3bc   : > { %v3568_v22 = vpop.eup %3567 }
 0x3bd   : > { %v3273_v28 = vcombine.low %v3566_v8, %v3568_v22 }
 0x3be   : > { %v3109_v48 = vpop.f32.mrf.mxu0 }
 0x3bf   : > { %v3570_v31 = vpop.eup %3569  ;;  %3289 = vst [vmem:[%s5192_s22 + $0x20] sm:$0xff] %v3273_v28  ;;  %v3110_v34 = vadd.f32 %v3109_v48, %v5179_v61 }
 0x3c0   : > { %v3111_v5 = vpop.f32.mrf.mxu0 }
 0x3c1   : > { %v3572_v10 = vpop.eup %3571  ;;  %v3448_v27 = vmul.f32 -1.442695, %v3110_v34  ;;  %v3112_v33 = vadd.f32 %v3111_v5, %v5179_v61 }
 0x3c2   : > { %v3274_v37 = vcombine.low %v3570_v31, %v3572_v10  ;;  %v3150_v3 = vpop.f32.mrf.mxu1  ;;  %v3113_v16 = vpop.f32.mrf.mxu0 }
 0x3c3   : > { %v3151_v14 = vadd.f32 %v3150_v3, %v5179_v61  ;;  %3573 = vpow2.f32 %v3448_v27  ;;  %v3449_v47 = vmul.f32 -1.442695, %v3112_v33 }
 0x3c4   : > { %3290 = vst [vmem:[%s5192_s22 + $0x28] sm:$0xff] %v3274_v37  ;;  %v3152_v30 = vpop.f32.mrf.mxu1  ;;  %v3114_v60 = vpop.f32.mrf.mxu0 }
 0x3c5   : > { %v3450_v17 = vmul.f32 -1.442695, %v3151_v14  ;;  %v3153_v53 = vadd.f32 %v3152_v30, %v5179_v61  ;;  %3575 = vpow2.f32 %v3449_v47 }
 0x3c6   : > { %v3154_v59 = vpop.f32.mrf.mxu1 }
 0x3c7   : > { %3577 = vpow2.f32 %v3450_v17  ;;  %v3451_v1 = vmul.f32 -1.442695, %v3153_v53 }
 0x3c8   : > { %v3155_v7 = vpop.f32.mrf.mxu1 }
 0x3c9   : > { %3579 = vpow2.f32 %v3451_v1 }
 0x3d0   : > { %v3574_v62 = vpop.eup %3573 }
 0x3d1   : > { %v3217_v54 = vadd.f32 1.0, %v3574_v62 }
 0x3d2   : > { %v3576_v57 = vpop.eup %3575 }
 0x3d3   : > { %v3218_v36 = vadd.f32 1.0, %v3576_v57  ;;  %3581 = vrcp.f32 %v3217_v54 }
 0x3d4   : > { %v3578_v41 = vpop.eup %3577 }
 0x3d5   : > { %v3219_v55 = vadd.f32 1.0, %v3578_v41  ;;  %3583 = vrcp.f32 %v3218_v36 }
 0x3d6   : > { %v3580_v26 = vpop.eup %3579 }
 0x3d7   : > { %v3220_v61 = vadd.f32 1.0, %v3580_v26  ;;  %3585 = vrcp.f32 %v3219_v55 }
 0x3d9   : > { %3587 = vrcp.f32 %v3220_v61 }
 0x3e0   : > { %v3582_v38 = vpop.eup %3581 }
 0x3e2   : > { %v3584_v49 = vpop.eup %3583 }
 0x3e3   : > { %v3275_v56 = vcombine.low %v3582_v38, %v3584_v49 }
 0x3e4   : > { %v3586_v35 = vpop.eup %3585 }
 0x3e5   : > { %3291 = vst [vmem:[%s5192_s22 + $0x30] sm:$0xff] %v3275_v56 }
 0x3e6   : > { %v3588_v46 = vpop.eup %3587 }
 0x3e7   : > { %v3276_v43 = vcombine.low %v3586_v35, %v3588_v46 }
 0x3e9   : > { %3292 = vst [vmem:[%s5192_s22 + $0x38] sm:$0xff] %v3276_v43 }
 0x3ea   : > { %3629 = shalt.err (!%p3626_p0)
}
 0x3eb   : > { %s3630_s18 = scalar_lea.hbm %s3306_s13, 1024  ;;  %s3634_s21 = scalar_lea.hbm %s5253_s7, 2048 }
 0x3ec   : > { %p3631_p1 = scmp.ne.s32.totalorder %s3306_s13, %s3630_s18  ;;  %p3635_p4 = scmp.lt.s32.totalorder %s3306_s13, %s5253_s7 }
 0x3ed   : > { %p3636_p7 = scmp.lt.s32.totalorder %s3634_s21, %s3630_s18 }
 0x3ee   : > { %p3632_p2 = pnand %p3631_p1, %p3767_p5 }
 0x3ef   : > { %p3637_p6 = por %p3636_p7, %p3635_p4 }
 0x3f0   : > { %p3633_p3 = pneg %p3632_p2 }
 0x3f2   : > { %p3638_p8 = pnand %p3637_p6, %p3633_p3 }
 0x3f4   : > { %3641 = shalt.err (!%p3638_p8)
}
 0x3f5   : > { %3462 = dma.vmem_to_hbm [thread:$0]  (%p3767_p5), %s3309_s29, 1024, %s3306_s13, %s3294_s14  }
 0x3f6 PF: > { %p3474_p9 = scmp.ge.s32.totalorder %s3680_s27, 2  ;;  %s3320_s8 = sand.u32 1, %s3668_s24  }
 0x3f7   : > { %p5421_p10 = scmp.ne.s32.totalorder %s5314_s12, 0  ;;  %s3321_s9 = scalar_lea.sflag [#allocation4], %s3320_s8 }
 0x3f9   : > { %p3469_p11 = pnand %p3474_p9, %p5421_p10 }
 0x3fb   : > { %p3470_p12 = pneg %p3469_p11 }
 0x3fd   : > { %3663 = dma.done.wait (%p3470_p12), %s3321_s9, 1024  }
 0x3fe   : > { %3665 = vsyncadd (%p3470_p12), %s3321_s9, 4294966272  ;;  %p18_p13 = scmp.ge.s32.totalorder %s3754_s30, 4   ;;  %s5422_s24 = smov %s3672_s25 }
 0x3ff   : > { %s5423_s25 = smov %s3676_s26  ;;  %s5424_s26 = smov %s3765_s10 }
 0x400   : > { %s5425_s27 = smov %s3754_s30  ;;  %20 = sbr.rel (!%p18_p13) target bundleno = 4 (0x4), region = 90 }
 0x405   :  { %3326 = vsyncpa [#allocation3], 1 }
 0x406   :  { %3328 = vsyncpa [#allocation3 + $0x1], 1 }
 0x407   :  { %3329 = vsyncpa [#allocation4], 1 }
 0x408   :  { %3331 = vsyncpa [#allocation4 + $0x1], 1 }

</bundles_post_ra>
